<compile_context>
chip_gen: v7x
topology: tpu7x:2x2x1
jax: 0.10.0
libtpu: 0.0.40
codegen_flags: <defaults>
</compile_context>

<pallas_src>
import jax
import jax.numpy as jnp
import numpy as np
from jax.experimental import pallas as pl
from jax.experimental.pallas import tpu as pltpu

EPS = 1e-5          # BatchNorm eps
KS = 5              # conv kernel size
PAD = 2             # conv padding
CHANS = [16, 32, 64, 128]
FC_OUT = 100
FC_OUT_PAD = 128    # lane-dense FC output (sliced back to 100 outside)


# ------------------------------ kernel bodies -------------------------------

def _conv_pool_block(h, w_ref, b_ref, s_ref):
    """Conv1d(k=5,pad=2)+foldedBN+ReLU+MaxPool(2,2) on one lane-packed tile.

    h:     (Cin, B*(T+4)) bf16, per-sample layout [2 zeros | T data | 2 zeros]
    w_ref: (Cout, KS*Cin)  bf16 folded conv+BN weights (tap-major columns)
    b_ref: (Cout, 1)       f32  folded bias
    s_ref: (B*(T+4)-5, Wout) bf16 0/1 selection matrix: picks the even column of
           each in-sample pair, drops inter-sample junk conv columns and
           re-inserts per-sample zero padding (or none, for the last block).
    returns (Cout, Wout) bf16
    """
    win = h.shape[1]
    wc = win - 2 * PAD                               # packed conv-output width
    # im2col: stack the 5 tap-shifted views along sublanes -> one deep dot.
    cols = jnp.concatenate([h[:, k:k + wc] for k in range(KS)], axis=0)
    acc = jnp.dot(w_ref[...], cols, preferred_element_type=jnp.float32)
    acc = jnp.maximum(acc + b_ref[...], 0.0)         # bias + ReLU in f32 (VPU)
    # Pairwise max of neighbouring lanes (lane shift on XLU + VPU max),
    # then one selection matmul does the stride-2 pick / junk drop / re-pad.
    m = jnp.maximum(acc[:, :wc - 1], acc[:, 1:])
    pooled = jnp.dot(m.astype(jnp.bfloat16), s_ref[...],
                     preferred_element_type=jnp.float32)
    return pooled.astype(jnp.bfloat16)


def _features_kernel(x_ref, w1, b1, s1, w2, b2, s2, w3, b3, s3, w4, b4, s4,
                     out_ref):
    # x_ref: (1, Cpad, B*(T+4)) lane-packed, per-sample zero-padded input block
    h = x_ref[0]
    for w, b, s in ((w1, b1, s1), (w2, b2, s2), (w3, b3, s3), (w4, b4, s4)):
        h = _conv_pool_block(h, w, b, s)
    out_ref[0] = h                                   # (128, B*(T//16)) bf16


def _fc_relu_kernel(x_ref, w_ref, b_ref, o_ref):
    y = jnp.dot(x_ref[...], w_ref[...], preferred_element_type=jnp.float32)
    o_ref[...] = jnp.maximum(y + b_ref[...], 0.0)


# --------------------------- host-side constants ----------------------------

def _pool_selector(n_pack, t_in, pad_out):
    """0/1 matrix mapping the pairwise-max tile to the next packed layout."""
    tp_in = t_in + 2 * PAD
    rows = n_pack * tp_in - 2 * PAD - 1      # width of the pairwise-max tile
    t_out = t_in // 2
    off = PAD if pad_out else 0
    tp_out = t_out + 2 * off
    sel = np.zeros((rows, n_pack * tp_out), np.float32)
    for s in range(n_pack):
        for p in range(t_out):
            sel[s * tp_in + 2 * p, s * tp_out + off + p] = 1.0
    return jnp.asarray(sel, jnp.bfloat16)


# --------------------------------- wrapper ----------------------------------

def tstr_feature_extractor(x, params, pack=16):
    """x: (N, C, T) float32, NCW like the PyTorch module (eval mode)."""
    N, C, T = x.shape
    assert T % 16 == 0, "need 4 levels of stride-2 pooling"

    # ---- batch lane-packing setup (keep the grid >=2 blocks on v7x) --------
    B = max(1, min(pack, N))
    G = -(-N // B)
    n_pad = G * B
    c_pad = ((C + 15) // 16) * 16            # bf16 sublane-tile aligned channels

    # Fused batch/channel pad + pack + time pad (single XLA chain, no separate
    # full-array pad round trip).
    xb = jnp.pad(x.astype(jnp.bfloat16),
                 ((0, n_pad - N), (0, c_pad - C), (0, 0)))
    xp = xb.reshape(G, B, c_pad, T).transpose(0, 2, 1, 3)
    xp = jnp.pad(xp, ((0, 0), (0, 0), (0, 0), (PAD, PAD)))
    xp = xp.reshape(G, c_pad, B * (T + 2 * PAD))

    # ---- fold eval-mode BatchNorm into conv, im2col weight layout ----------
    chans = [c_pad] + CHANS
    weights, biases, selectors = [], [], []
    t_i = T
    for i in range(4):
        cin, cout = chans[i], chans[i + 1]
        w = params[f"conv{i+1}_w"]                       # (Cout, Cin, KS)
        if i == 0 and c_pad != C:
            w = jnp.pad(w, ((0, 0), (0, c_pad - C), (0, 0)))
        b = params[f"conv{i+1}_b"]
        g = params[f"bn{i+1}_gamma"]
        be = params[f"bn{i+1}_beta"]
        mu = params[f"bn{i+1}_mean"]
        var = params[f"bn{i+1}_var"]
        scale = g / jnp.sqrt(var + EPS)
        wf = (w * scale[:, None, None]).transpose(0, 2, 1)   # (Cout, KS, Cin)
        weights.append(wf.reshape(cout, KS * cin).astype(jnp.bfloat16))
        biases.append(((b - mu) * scale + be).astype(jnp.float32)[:, None])
        selectors.append(_pool_selector(B, t_i, pad_out=(i < 3)))
        t_i //= 2
    t_last = T // 16

    in_specs = [pl.BlockSpec((1, c_pad, B * (T + 2 * PAD)), lambda n: (n, 0, 0))]
    operands = [xp]
    for i in range(4):
        operands += [weights[i], biases[i], selectors[i]]
        in_specs += [pl.BlockSpec(weights[i].shape, lambda n: (0, 0)),
                     pl.BlockSpec(biases[i].shape, lambda n: (0, 0)),
                     pl.BlockSpec(selectors[i].shape, lambda n: (0, 0))]

    feat = pl.pallas_call(
        _features_kernel,
        out_shape=jax.ShapeDtypeStruct((G, CHANS[-1], B * t_last), jnp.bfloat16),
        grid=(G,),
        in_specs=in_specs,
        out_specs=pl.BlockSpec((1, CHANS[-1], B * t_last), lambda n: (n, 0, 0)),
        compiler_params=pltpu.CompilerParams(dimension_semantics=("parallel",)),
    )(*operands)

    # ---- unpack + flatten (matches torch's x.view(B, -1) ordering) ---------
    flat = feat.reshape(G, CHANS[-1], B, t_last).transpose(0, 2, 1, 3)
    flat = flat.reshape(n_pad, CHANS[-1] * t_last)
    # Dropout(p=0.25) is identity at inference.

    fin = CHANS[-1] * t_last
    wfc = jnp.zeros((fin, FC_OUT_PAD), jnp.bfloat16)
    wfc = wfc.at[:, :FC_OUT].set(params["fc_w"].T.astype(jnp.bfloat16))
    bfc = jnp.zeros((1, FC_OUT_PAD), jnp.float32)
    bfc = bfc.at[:, :FC_OUT].set(params["fc_b"].astype(jnp.float32)[None])

    tn = n_pad
    for t in (256, 128, 64, 32, 16, 8):
        if n_pad % t == 0:
            tn = t
            break

    out = pl.pallas_call(
        _fc_relu_kernel,
        out_shape=jax.ShapeDtypeStruct((n_pad, FC_OUT_PAD), jnp.float32),
        grid=(n_pad // tn,),
        in_specs=[pl.BlockSpec((tn, fin), lambda i: (i, 0)),
                  pl.BlockSpec((fin, FC_OUT_PAD), lambda i: (0, 0)),
                  pl.BlockSpec((1, FC_OUT_PAD), lambda i: (0, 0))],
        out_specs=pl.BlockSpec((tn, FC_OUT_PAD), lambda i: (i, 0)),
        compiler_params=pltpu.CompilerParams(dimension_semantics=("parallel",)),
    )(flat, wfc, bfc)
    return out[:N, :FC_OUT]


# ----------------------- deterministic parameter init -----------------------

def init_params(key, num_timesteps=128, num_channels=3):
    chans = [num_channels] + CHANS
    keys = iter(jax.random.split(key, 32))
    params = {}
    for i in range(4):
        cin, cout = chans[i], chans[i + 1]
        bound = (cin * KS) ** -0.5
        params[f"conv{i+1}_w"] = jax.random.uniform(
            next(keys), (cout, cin, KS), jnp.float32, -bound, bound)
        params[f"conv{i+1}_b"] = jax.random.uniform(
            next(keys), (cout,), jnp.float32, -bound, bound)
        params[f"bn{i+1}_gamma"] = 1.0 + 0.1 * jax.random.normal(next(keys), (cout,), jnp.float32)
        params[f"bn{i+1}_beta"] = 0.1 * jax.random.normal(next(keys), (cout,), jnp.float32)
        params[f"bn{i+1}_mean"] = 0.1 * jax.random.normal(next(keys), (cout,), jnp.float32)
        params[f"bn{i+1}_var"] = 1.0 + 0.1 * jax.random.uniform(next(keys), (cout,), jnp.float32)
    fin = num_timesteps * 8
    bound = fin ** -0.5
    params["fc_w"] = jax.random.uniform(next(keys), (FC_OUT, fin), jnp.float32, -bound, bound)
    params["fc_b"] = jax.random.uniform(next(keys), (FC_OUT,), jnp.float32, -bound, bound)
    return params


# ------------------------------ pure-JAX reference ---------------------------

def reference_forward(x, params):
    h = x.astype(jnp.float32)
    for i in range(4):
        w = params[f"conv{i+1}_w"]
        b = params[f"conv{i+1}_b"]
        h = jax.lax.conv_general_dilated(
            h, w, window_strides=(1,), padding=((PAD, PAD),),
            dimension_numbers=("NCH", "OIH", "NCH"),
            precision=jax.lax.Precision.HIGHEST) + b[None, :, None]
        g = params[f"bn{i+1}_gamma"]
        be = params[f"bn{i+1}_beta"]
        m = params[f"bn{i+1}_mean"]
        v = params[f"bn{i+1}_var"]
        h = (h - m[None, :, None]) / jnp.sqrt(v + EPS)[None, :, None] \
            * g[None, :, None] + be[None, :, None]
        h = jax.nn.relu(h)
        n, c, t = h.shape
        h = jnp.max(h.reshape(n, c, t // 2, 2), axis=-1)
    h = h.reshape(h.shape[0], -1)
    return jax.nn.relu(h @ params["fc_w"].T + params["fc_b"])


# ----------------------------------- main ------------------------------------

if __name__ == "__main__":
    key = jax.random.PRNGKey(0)
    pkey, xkey = jax.random.split(key)
    N, C, T = 16, 3, 128   # module defaults: 3 channels, 128 timesteps
    params = init_params(pkey, num_timesteps=T, num_channels=C)
    x = jax.random.normal(xkey, (N, C, T), jnp.float32)

    # pack=8 keeps the feature grid at 2 blocks for this small demo batch
    # (so both v7x TensorCores get work); larger batches can use the default
    # pack=16 for fully lane-dense (>=128) tiles at every layer.
    out = jax.block_until_ready(tstr_feature_extractor(x, params, pack=8))
    ref = jax.block_until_ready(reference_forward(x, params))

    assert out.shape == (N, FC_OUT), out.shape
    max_err = float(jnp.max(jnp.abs(out - ref)))
    assert max_err < 5e-2, f"mismatch vs reference: max abs err = {max_err}"
    print("KERNEL_OK")
</pallas_src>

<mosaic_0001>
module attributes {stable_mosaic.version = 11 : i64} {
  func.func @_features_kernel(%arg0: i32, %arg1: memref<1x16x1056xbf16, #tpu.memory_space<vmem>>, %arg2: memref<16x80xbf16, #tpu.memory_space<vmem>>, %arg3: memref<16x1xf32, #tpu.memory_space<vmem>>, %arg4: memref<1051x544xbf16, #tpu.memory_space<vmem>>, %arg5: memref<32x80xbf16, #tpu.memory_space<vmem>>, %arg6: memref<32x1xf32, #tpu.memory_space<vmem>>, %arg7: memref<539x288xbf16, #tpu.memory_space<vmem>>, %arg8: memref<64x160xbf16, #tpu.memory_space<vmem>>, %arg9: memref<64x1xf32, #tpu.memory_space<vmem>>, %arg10: memref<283x160xbf16, #tpu.memory_space<vmem>>, %arg11: memref<128x320xbf16, #tpu.memory_space<vmem>>, %arg12: memref<128x1xf32, #tpu.memory_space<vmem>>, %arg13: memref<155x64xbf16, #tpu.memory_space<vmem>>, %arg14: memref<1x128x64xbf16, #tpu.memory_space<vmem>>) attributes {dimension_semantics = [#tpu.dimension_semantics<parallel>], iteration_bounds = array<i64: 2>, scalar_prefetch = 0 : i64, scratch_operands = 0 : i64, tpu.core_type = #tpu.core_type<tc>, window_params = [{transform_indices = @transform_0, window_bounds = array<i64: 1, 16, 1056>}, {pipeline_mode = #tpu.pipeline_mode<synchronous>, transform_indices = @transform_1, window_bounds = array<i64: 16, 80>}, {pipeline_mode = #tpu.pipeline_mode<synchronous>, transform_indices = @transform_2, window_bounds = array<i64: 16, 1>}, {pipeline_mode = #tpu.pipeline_mode<synchronous>, transform_indices = @transform_3, window_bounds = array<i64: 1051, 544>}, {pipeline_mode = #tpu.pipeline_mode<synchronous>, transform_indices = @transform_4, window_bounds = array<i64: 32, 80>}, {pipeline_mode = #tpu.pipeline_mode<synchronous>, transform_indices = @transform_5, window_bounds = array<i64: 32, 1>}, {pipeline_mode = #tpu.pipeline_mode<synchronous>, transform_indices = @transform_6, window_bounds = array<i64: 539, 288>}, {pipeline_mode = #tpu.pipeline_mode<synchronous>, transform_indices = @transform_7, window_bounds = array<i64: 64, 160>}, {pipeline_mode = #tpu.pipeline_mode<synchronous>, transform_indices = @transform_8, window_bounds = array<i64: 64, 1>}, {pipeline_mode = #tpu.pipeline_mode<synchronous>, transform_indices = @transform_9, window_bounds = array<i64: 283, 160>}, {pipeline_mode = #tpu.pipeline_mode<synchronous>, transform_indices = @transform_10, window_bounds = array<i64: 128, 320>}, {pipeline_mode = #tpu.pipeline_mode<synchronous>, transform_indices = @transform_11, window_bounds = array<i64: 128, 1>}, {pipeline_mode = #tpu.pipeline_mode<synchronous>, transform_indices = @transform_12, window_bounds = array<i64: 155, 64>}, {transform_indices = @transform_13, window_bounds = array<i64: 1, 128, 64>}]} {
    %c0 = arith.constant 0 : index
    %c0_0 = arith.constant 0 : index
    %c0_1 = arith.constant 0 : index
    %0 = vector.load %arg1[%c0, %c0_0, %c0_1] : memref<1x16x1056xbf16, #tpu.memory_space<vmem>>, vector<1x16x1056xbf16>
    %1 = vector.shape_cast %0 : vector<1x16x1056xbf16> to vector<16x1056xbf16>
    %2 = vector.extract_strided_slice %1 {offsets = [0, 0], sizes = [16, 1052], strides = [1, 1]} : vector<16x1056xbf16> to vector<16x1052xbf16>
    %3 = vector.extract_strided_slice %1 {offsets = [0, 1], sizes = [16, 1052], strides = [1, 1]} : vector<16x1056xbf16> to vector<16x1052xbf16>
    %4 = vector.extract_strided_slice %1 {offsets = [0, 2], sizes = [16, 1052], strides = [1, 1]} : vector<16x1056xbf16> to vector<16x1052xbf16>
    %5 = vector.extract_strided_slice %1 {offsets = [0, 3], sizes = [16, 1052], strides = [1, 1]} : vector<16x1056xbf16> to vector<16x1052xbf16>
    %6 = vector.extract_strided_slice %1 {offsets = [0, 4], sizes = [16, 1052], strides = [1, 1]} : vector<16x1056xbf16> to vector<16x1052xbf16>
    %7 = tpu.concatenate %2, %3, %4, %5, %6 in 0 : vector<16x1052xbf16>, vector<16x1052xbf16>, vector<16x1052xbf16>, vector<16x1052xbf16>, vector<16x1052xbf16> -> vector<80x1052xbf16>
    %c0_2 = arith.constant 0 : index
    %c0_3 = arith.constant 0 : index
    %8 = vector.load %arg2[%c0_2, %c0_3] : memref<16x80xbf16, #tpu.memory_space<vmem>>, vector<16x80xbf16>
    %cst = arith.constant dense<0.000000e+00> : vector<16x1052xf32>
    %9 = tpu.matmul %8, %7, %cst {dimension_numbers = #tpu.dot_dimension_numbers<[1], [0], [0], [1], [0, 0, 1, 1], [], []>} : vector<16x80xbf16>, vector<80x1052xbf16>, vector<16x1052xf32> -> vector<16x1052xf32>
    %c0_4 = arith.constant 0 : index
    %c0_5 = arith.constant 0 : index
    %10 = vector.load %arg3[%c0_4, %c0_5] : memref<16x1xf32, #tpu.memory_space<vmem>>, vector<16x1xf32>
    %11 = vector.broadcast %10 : vector<16x1xf32> to vector<16x1052xf32>
    %12 = arith.addf %9, %11 : vector<16x1052xf32>
    %cst_6 = arith.constant 0.000000e+00 : f32
    %13 = vector.broadcast %cst_6 : f32 to vector<16x1052xf32>
    %14 = arith.maximumf %12, %13 : vector<16x1052xf32>
    %15 = vector.extract_strided_slice %14 {offsets = [0, 0], sizes = [16, 1051], strides = [1, 1]} : vector<16x1052xf32> to vector<16x1051xf32>
    %16 = vector.extract_strided_slice %14 {offsets = [0, 1], sizes = [16, 1051], strides = [1, 1]} : vector<16x1052xf32> to vector<16x1051xf32>
    %17 = arith.maximumf %15, %16 : vector<16x1051xf32>
    %18 = arith.truncf %17 : vector<16x1051xf32> to vector<16x1051xbf16>
    %c0_7 = arith.constant 0 : index
    %c0_8 = arith.constant 0 : index
    %19 = vector.load %arg4[%c0_7, %c0_8] : memref<1051x544xbf16, #tpu.memory_space<vmem>>, vector<1051x544xbf16>
    %cst_9 = arith.constant dense<0.000000e+00> : vector<16x544xf32>
    %20 = tpu.matmul %18, %19, %cst_9 {dimension_numbers = #tpu.dot_dimension_numbers<[1], [0], [0], [1], [0, 0, 1, 1], [], []>} : vector<16x1051xbf16>, vector<1051x544xbf16>, vector<16x544xf32> -> vector<16x544xf32>
    %21 = arith.truncf %20 : vector<16x544xf32> to vector<16x544xbf16>
    %22 = vector.extract_strided_slice %21 {offsets = [0, 0], sizes = [16, 540], strides = [1, 1]} : vector<16x544xbf16> to vector<16x540xbf16>
    %23 = vector.extract_strided_slice %21 {offsets = [0, 1], sizes = [16, 540], strides = [1, 1]} : vector<16x544xbf16> to vector<16x540xbf16>
    %24 = vector.extract_strided_slice %21 {offsets = [0, 2], sizes = [16, 540], strides = [1, 1]} : vector<16x544xbf16> to vector<16x540xbf16>
    %25 = vector.extract_strided_slice %21 {offsets = [0, 3], sizes = [16, 540], strides = [1, 1]} : vector<16x544xbf16> to vector<16x540xbf16>
    %26 = vector.extract_strided_slice %21 {offsets = [0, 4], sizes = [16, 540], strides = [1, 1]} : vector<16x544xbf16> to vector<16x540xbf16>
    %27 = tpu.concatenate %22, %23, %24, %25, %26 in 0 : vector<16x540xbf16>, vector<16x540xbf16>, vector<16x540xbf16>, vector<16x540xbf16>, vector<16x540xbf16> -> vector<80x540xbf16>
    %c0_10 = arith.constant 0 : index
    %c0_11 = arith.constant 0 : index
    %28 = vector.load %arg5[%c0_10, %c0_11] : memref<32x80xbf16, #tpu.memory_space<vmem>>, vector<32x80xbf16>
    %cst_12 = arith.constant dense<0.000000e+00> : vector<32x540xf32>
    %29 = tpu.matmul %28, %27, %cst_12 {dimension_numbers = #tpu.dot_dimension_numbers<[1], [0], [0], [1], [0, 0, 1, 1], [], []>} : vector<32x80xbf16>, vector<80x540xbf16>, vector<32x540xf32> -> vector<32x540xf32>
    %c0_13 = arith.constant 0 : index
    %c0_14 = arith.constant 0 : index
    %30 = vector.load %arg6[%c0_13, %c0_14] : memref<32x1xf32, #tpu.memory_space<vmem>>, vector<32x1xf32>
    %31 = vector.broadcast %30 : vector<32x1xf32> to vector<32x540xf32>
    %32 = arith.addf %29, %31 : vector<32x540xf32>
    %cst_15 = arith.constant 0.000000e+00 : f32
    %33 = vector.broadcast %cst_15 : f32 to vector<32x540xf32>
    %34 = arith.maximumf %32, %33 : vector<32x540xf32>
    %35 = vector.extract_strided_slice %34 {offsets = [0, 0], sizes = [32, 539], strides = [1, 1]} : vector<32x540xf32> to vector<32x539xf32>
    %36 = vector.extract_strided_slice %34 {offsets = [0, 1], sizes = [32, 539], strides = [1, 1]} : vector<32x540xf32> to vector<32x539xf32>
    %37 = arith.maximumf %35, %36 : vector<32x539xf32>
    %38 = arith.truncf %37 : vector<32x539xf32> to vector<32x539xbf16>
    %c0_16 = arith.constant 0 : index
    %c0_17 = arith.constant 0 : index
    %39 = vector.load %arg7[%c0_16, %c0_17] : memref<539x288xbf16, #tpu.memory_space<vmem>>, vector<539x288xbf16>
    %cst_18 = arith.constant dense<0.000000e+00> : vector<32x288xf32>
    %40 = tpu.matmul %38, %39, %cst_18 {dimension_numbers = #tpu.dot_dimension_numbers<[1], [0], [0], [1], [0, 0, 1, 1], [], []>} : vector<32x539xbf16>, vector<539x288xbf16>, vector<32x288xf32> -> vector<32x288xf32>
    %41 = arith.truncf %40 : vector<32x288xf32> to vector<32x288xbf16>
    %42 = vector.extract_strided_slice %41 {offsets = [0, 0], sizes = [32, 284], strides = [1, 1]} : vector<32x288xbf16> to vector<32x284xbf16>
    %43 = vector.extract_strided_slice %41 {offsets = [0, 1], sizes = [32, 284], strides = [1, 1]} : vector<32x288xbf16> to vector<32x284xbf16>
    %44 = vector.extract_strided_slice %41 {offsets = [0, 2], sizes = [32, 284], strides = [1, 1]} : vector<32x288xbf16> to vector<32x284xbf16>
    %45 = vector.extract_strided_slice %41 {offsets = [0, 3], sizes = [32, 284], strides = [1, 1]} : vector<32x288xbf16> to vector<32x284xbf16>
    %46 = vector.extract_strided_slice %41 {offsets = [0, 4], sizes = [32, 284], strides = [1, 1]} : vector<32x288xbf16> to vector<32x284xbf16>
    %47 = tpu.concatenate %42, %43, %44, %45, %46 in 0 : vector<32x284xbf16>, vector<32x284xbf16>, vector<32x284xbf16>, vector<32x284xbf16>, vector<32x284xbf16> -> vector<160x284xbf16>
    %c0_19 = arith.constant 0 : index
    %c0_20 = arith.constant 0 : index
    %48 = vector.load %arg8[%c0_19, %c0_20] : memref<64x160xbf16, #tpu.memory_space<vmem>>, vector<64x160xbf16>
    %cst_21 = arith.constant dense<0.000000e+00> : vector<64x284xf32>
    %49 = tpu.matmul %48, %47, %cst_21 {dimension_numbers = #tpu.dot_dimension_numbers<[1], [0], [0], [1], [0, 0, 1, 1], [], []>} : vector<64x160xbf16>, vector<160x284xbf16>, vector<64x284xf32> -> vector<64x284xf32>
    %c0_22 = arith.constant 0 : index
    %c0_23 = arith.constant 0 : index
    %50 = vector.load %arg9[%c0_22, %c0_23] : memref<64x1xf32, #tpu.memory_space<vmem>>, vector<64x1xf32>
    %51 = vector.broadcast %50 : vector<64x1xf32> to vector<64x284xf32>
    %52 = arith.addf %49, %51 : vector<64x284xf32>
    %cst_24 = arith.constant 0.000000e+00 : f32
    %53 = vector.broadcast %cst_24 : f32 to vector<64x284xf32>
    %54 = arith.maximumf %52, %53 : vector<64x284xf32>
    %55 = vector.extract_strided_slice %54 {offsets = [0, 0], sizes = [64, 283], strides = [1, 1]} : vector<64x284xf32> to vector<64x283xf32>
    %56 = vector.extract_strided_slice %54 {offsets = [0, 1], sizes = [64, 283], strides = [1, 1]} : vector<64x284xf32> to vector<64x283xf32>
    %57 = arith.maximumf %55, %56 : vector<64x283xf32>
    %58 = arith.truncf %57 : vector<64x283xf32> to vector<64x283xbf16>
    %c0_25 = arith.constant 0 : index
    %c0_26 = arith.constant 0 : index
    %59 = vector.load %arg10[%c0_25, %c0_26] : memref<283x160xbf16, #tpu.memory_space<vmem>>, vector<283x160xbf16>
    %cst_27 = arith.constant dense<0.000000e+00> : vector<64x160xf32>
    %60 = tpu.matmul %58, %59, %cst_27 {dimension_numbers = #tpu.dot_dimension_numbers<[1], [0], [0], [1], [0, 0, 1, 1], [], []>} : vector<64x283xbf16>, vector<283x160xbf16>, vector<64x160xf32> -> vector<64x160xf32>
    %61 = arith.truncf %60 : vector<64x160xf32> to vector<64x160xbf16>
    %62 = vector.extract_strided_slice %61 {offsets = [0, 0], sizes = [64, 156], strides = [1, 1]} : vector<64x160xbf16> to vector<64x156xbf16>
    %63 = vector.extract_strided_slice %61 {offsets = [0, 1], sizes = [64, 156], strides = [1, 1]} : vector<64x160xbf16> to vector<64x156xbf16>
    %64 = vector.extract_strided_slice %61 {offsets = [0, 2], sizes = [64, 156], strides = [1, 1]} : vector<64x160xbf16> to vector<64x156xbf16>
    %65 = vector.extract_strided_slice %61 {offsets = [0, 3], sizes = [64, 156], strides = [1, 1]} : vector<64x160xbf16> to vector<64x156xbf16>
    %66 = vector.extract_strided_slice %61 {offsets = [0, 4], sizes = [64, 156], strides = [1, 1]} : vector<64x160xbf16> to vector<64x156xbf16>
    %67 = tpu.concatenate %62, %63, %64, %65, %66 in 0 : vector<64x156xbf16>, vector<64x156xbf16>, vector<64x156xbf16>, vector<64x156xbf16>, vector<64x156xbf16> -> vector<320x156xbf16>
    %c0_28 = arith.constant 0 : index
    %c0_29 = arith.constant 0 : index
    %68 = vector.load %arg11[%c0_28, %c0_29] : memref<128x320xbf16, #tpu.memory_space<vmem>>, vector<128x320xbf16>
    %cst_30 = arith.constant dense<0.000000e+00> : vector<128x156xf32>
    %69 = tpu.matmul %68, %67, %cst_30 {dimension_numbers = #tpu.dot_dimension_numbers<[1], [0], [0], [1], [0, 0, 1, 1], [], []>} : vector<128x320xbf16>, vector<320x156xbf16>, vector<128x156xf32> -> vector<128x156xf32>
    %c0_31 = arith.constant 0 : index
    %c0_32 = arith.constant 0 : index
    %70 = vector.load %arg12[%c0_31, %c0_32] : memref<128x1xf32, #tpu.memory_space<vmem>>, vector<128x1xf32>
    %71 = vector.broadcast %70 : vector<128x1xf32> to vector<128x156xf32>
    %72 = arith.addf %69, %71 : vector<128x156xf32>
    %cst_33 = arith.constant 0.000000e+00 : f32
    %73 = vector.broadcast %cst_33 : f32 to vector<128x156xf32>
    %74 = arith.maximumf %72, %73 : vector<128x156xf32>
    %75 = vector.extract_strided_slice %74 {offsets = [0, 0], sizes = [128, 155], strides = [1, 1]} : vector<128x156xf32> to vector<128x155xf32>
    %76 = vector.extract_strided_slice %74 {offsets = [0, 1], sizes = [128, 155], strides = [1, 1]} : vector<128x156xf32> to vector<128x155xf32>
    %77 = arith.maximumf %75, %76 : vector<128x155xf32>
    %78 = arith.truncf %77 : vector<128x155xf32> to vector<128x155xbf16>
    %c0_34 = arith.constant 0 : index
    %c0_35 = arith.constant 0 : index
    %79 = vector.load %arg13[%c0_34, %c0_35] : memref<155x64xbf16, #tpu.memory_space<vmem>>, vector<155x64xbf16>
    %cst_36 = arith.constant dense<0.000000e+00> : vector<128x64xf32>
    %80 = tpu.matmul %78, %79, %cst_36 {dimension_numbers = #tpu.dot_dimension_numbers<[1], [0], [0], [1], [0, 0, 1, 1], [], []>} : vector<128x155xbf16>, vector<155x64xbf16>, vector<128x64xf32> -> vector<128x64xf32>
    %81 = arith.truncf %80 : vector<128x64xf32> to vector<128x64xbf16>
    %c0_37 = arith.constant 0 : index
    %c0_38 = arith.constant 0 : index
    %c0_39 = arith.constant 0 : index
    %82 = vector.load %arg14[%c0_37, %c0_38, %c0_39] : memref<1x128x64xbf16, #tpu.memory_space<vmem>>, vector<1x128x64xbf16>
    %83 = vector.shape_cast %82 : vector<1x128x64xbf16> to vector<128x64xbf16>
    %84 = vector.shape_cast %81 : vector<128x64xbf16> to vector<1x128x64xbf16>
    tpu.vector_store %arg14[%c0_37, %c0_38, %c0_39], %84 {strides = array<i32>} : memref<1x128x64xbf16, #tpu.memory_space<vmem>>, vector<1x128x64xbf16>,
    return
  }
  func.func @transform_0(%arg0: i32) -> (i32, i32, i32) {
    %c0_i32 = arith.constant 0 : i32
    %c0_i32_0 = arith.constant 0 : i32
    %c0_i32_1 = arith.constant 0 : i32
    return %arg0, %c0_i32, %c0_i32_0 : i32, i32, i32
  }
  func.func @transform_1(%arg0: i32) -> (i32, i32) {
    %c0_i32 = arith.constant 0 : i32
    %c0_i32_0 = arith.constant 0 : i32
    %c0_i32_1 = arith.constant 0 : i32
    return %c0_i32, %c0_i32_0 : i32, i32
  }
  func.func @transform_2(%arg0: i32) -> (i32, i32) {
    %c0_i32 = arith.constant 0 : i32
    %c0_i32_0 = arith.constant 0 : i32
    %c0_i32_1 = arith.constant 0 : i32
    return %c0_i32, %c0_i32_0 : i32, i32
  }
  func.func @transform_3(%arg0: i32) -> (i32, i32) {
    %c0_i32 = arith.constant 0 : i32
    %c0_i32_0 = arith.constant 0 : i32
    %c0_i32_1 = arith.constant 0 : i32
    return %c0_i32, %c0_i32_0 : i32, i32
  }
  func.func @transform_4(%arg0: i32) -> (i32, i32) {
    %c0_i32 = arith.constant 0 : i32
    %c0_i32_0 = arith.constant 0 : i32
    %c0_i32_1 = arith.constant 0 : i32
    return %c0_i32, %c0_i32_0 : i32, i32
  }
  func.func @transform_5(%arg0: i32) -> (i32, i32) {
    %c0_i32 = arith.constant 0 : i32
    %c0_i32_0 = arith.constant 0 : i32
    %c0_i32_1 = arith.constant 0 : i32
    return %c0_i32, %c0_i32_0 : i32, i32
  }
  func.func @transform_6(%arg0: i32) -> (i32, i32) {
    %c0_i32 = arith.constant 0 : i32
    %c0_i32_0 = arith.constant 0 : i32
    %c0_i32_1 = arith.constant 0 : i32
    return %c0_i32, %c0_i32_0 : i32, i32
  }
  func.func @transform_7(%arg0: i32) -> (i32, i32) {
    %c0_i32 = arith.constant 0 : i32
    %c0_i32_0 = arith.constant 0 : i32
    %c0_i32_1 = arith.constant 0 : i32
    return %c0_i32, %c0_i32_0 : i32, i32
  }
  func.func @transform_8(%arg0: i32) -> (i32, i32) {
    %c0_i32 = arith.constant 0 : i32
    %c0_i32_0 = arith.constant 0 : i32
    %c0_i32_1 = arith.constant 0 : i32
    return %c0_i32, %c0_i32_0 : i32, i32
  }
  func.func @transform_9(%arg0: i32) -> (i32, i32) {
    %c0_i32 = arith.constant 0 : i32
    %c0_i32_0 = arith.constant 0 : i32
    %c0_i32_1 = arith.constant 0 : i32
    return %c0_i32, %c0_i32_0 : i32, i32
  }
  func.func @transform_10(%arg0: i32) -> (i32, i32) {
    %c0_i32 = arith.constant 0 : i32
    %c0_i32_0 = arith.constant 0 : i32
    %c0_i32_1 = arith.constant 0 : i32
    return %c0_i32, %c0_i32_0 : i32, i32
  }
  func.func @transform_11(%arg0: i32) -> (i32, i32) {
    %c0_i32 = arith.constant 0 : i32
    %c0_i32_0 = arith.constant 0 : i32
    %c0_i32_1 = arith.constant 0 : i32
    return %c0_i32, %c0_i32_0 : i32, i32
  }
  func.func @transform_12(%arg0: i32) -> (i32, i32) {
    %c0_i32 = arith.constant 0 : i32
    %c0_i32_0 = arith.constant 0 : i32
    %c0_i32_1 = arith.constant 0 : i32
    return %c0_i32, %c0_i32_0 : i32, i32
  }
  func.func @transform_13(%arg0: i32) -> (i32, i32, i32) {
    %c0_i32 = arith.constant 0 : i32
    %c0_i32_0 = arith.constant 0 : i32
    %c0_i32_1 = arith.constant 0 : i32
    return %arg0, %c0_i32, %c0_i32_0 : i32, i32, i32
  }
}

</mosaic_0001>

<bundles_post_ra>
// kernel: tpu_custom_call.1
= control target key start
LH: loop header
LB: loop body
LE: loop exit
PB: predicated region body
PF: predicated region fallthrough
CT: control target
= control target key end

     0   :  { %s9299_s25 = smov 0   ;;  %s12437_s0 = inlined_call_operand.vmem [shape: bf16[2,16,1056], index: 0, kind: input, shape index: {}]   ;;  %s12438_s1 = inlined_call_operand.vmem [shape: bf16[16,80], index: 1, kind: input, shape index: {}]   ;;  %s12439_s2 = inlined_call_operand.vmem [shape: f32[16,1], index: 2, kind: input, shape index: {}]   ;;  %s12440_s3 = inlined_call_operand.vmem [shape: bf16[1051,544], index: 3, kind: input, shape index: {}]   ;;  %s12441_s4 = inlined_call_operand.vmem [shape: bf16[32,80], index: 4, kind: input, shape index: {}]   ;;  %s12442_s5 = inlined_call_operand.vmem [shape: f32[32,1], index: 5, kind: input, shape index: {}]   ;;  %s12443_s6 = inlined_call_operand.vmem [shape: bf16[539,288], index: 6, kind: input, shape index: {}]   ;;  %s12444_s7 = inlined_call_operand.vmem [shape: bf16[64,160], index: 7, kind: input, shape index: {}]   ;;  %s12445_s8 = inlined_call_operand.vmem [shape: f32[64,1], index: 8, kind: input, shape index: {}]   ;;  %s12446_s9 = inlined_call_operand.vmem [shape: bf16[283,160], index: 9, kind: input, shape index: {}]   ;;  %s12447_s10 = inlined_call_operand.vmem [shape: bf16[128,320], index: 10, kind: input, shape index: {}]   ;;  %s12448_s11 = inlined_call_operand.vmem [shape: f32[128,1], index: 11, kind: input, shape index: {}]   ;;  %s12449_s12 = inlined_call_operand.vmem [shape: bf16[155,64], index: 12, kind: input, shape index: {}]   ;;  %s12450_s13 = inlined_call_operand.vmem [shape: bf16[2,128,64], index: 13, kind: output, shape index: {}]  }
   0x1 LB: > { %s7289_s26 = sadd.s32 4294967295, %s9219_s25   ;;  %p7293_p0 = scmp.ge.s32.totalorder %s9219_s25, 1  ;;  %s9219_s25 = sphi %s9299_s25, %s23_s25  }
   0x2   : > { %p387_p1 = scmp.lt.s32.totalorder %s9219_s25, 3 }
   0x4   : > { %p388_p2 = pnand %p7293_p0, %p387_p1 }
   0x5   : > { %p431_p3 = scmp.lt.s32.totalorder (!%p388_p2), %s7289_s26, 1  ;;  %s9221_s14 = smov (!%p388_p2), 127   ;;  %v9224_v4 = vmov (!%p388_p2), 0   ;;  %v644_v10 = vld [vmem:[%s12439_s2] sm:$0xff] (!%p388_p2)  ;;  %v645_v11 = vld [vmem:[%s12439_s2 + $0x8] sm:$0xff] (!%p388_p2)  ;;  %vm516_vm0 = vcmask (!%p388_p2), 1039360  }
   0x6   : > { %391 = sbr.rel (%p388_p2) target bundleno = 3521 (0xdc1), region = 72  ;;  %s9222_s15 = smov (!%p388_p2), 126   ;;  %697 = vmatprep.mubr.bf16.mxu0 (!%p388_p2), %v9224_v4  ;;  %740 = vmatprep.mubr.bf16.mxu1 (!%p388_p2), %v9224_v4  ;;  %vm552_vm1 = vcmask (!%p388_p2), 1031168   ;;  %vm588_vm2 = vcmask (!%p388_p2), 1022976   ;;  %vm624_vm3 = vcmask (!%p388_p2), 1014784   ;;  %v9414_v29 = vld [vmem:[%s12438_s1] sm:$0xff] (!%p388_p2)  }
   0x7   : > { %s9223_s16 = smov (!%p388_p2), 125   ;;  %8254 = vset.pattern.permute.xlu1 (!%p388_p2), %v9224_v4  ;;  %8253 = vset.pattern.permute.xlu0 (!%p388_p2), %v9224_v4  ;;  %s9225_s17 = smov (!%p388_p2), 124   ;;  %vm661_vm4 = vcmask (!%p388_p2), 654336   ;;  %v9226_v54 = vmov (!%p388_p2), 0.0   ;;  %vm9227_vm5 = vmmov (!%p388_p2), 0   ;;  %vm3123_vm6 = vcmask (!%p388_p2), 1044480  }
   0x8   : > { %vm3124_vm7 = vcmask (!%p388_p2), 1045504   ;;  %vm3119_vm8 = vcmask (!%p388_p2), 220160   ;;  %vm5398_vm9 = vcmask (!%p388_p2), 261120   ;;  %vm6475_vm10 = vcmask (!%p388_p2), 523264  }
   0x9   : > { %vm7217_vm11 = vcmask (!%p388_p2), 519168  }
   0xd   : > { %s12490_s26 = smov (!%p431_p3, %s7289_s26), 1 }
   0xe   : > { %s8236_s27 = smul.u32 72, %s12490_s26 }
  0x10   : > { %s9313_s30 = scalar_lea.vmem %s12437_s0, %s8236_s27 }
  0x11   : > { %v8490_v0 = vld [vmem:[%s9313_s30 + $0x4] ss:$36 sps:$4 sm:$0xff]   ;;  %v8501_v3 = vld [vmem:[%s9313_s30 + $0xc] ss:$36 sps:$4 sm:$0xff]   ;;  %v9334_v5 = vld [vmem:[%s9313_s30 + $0x14] ss:$36 sps:$4 sm:$0xff]  }
  0x12   : > { %v8492_v1 = vld [vmem:[%s9313_s30] ss:$36 sps:$4 sm:$0xff]   ;;  %500 = vrot.lane.b32.xlu0 %v8490_v0, %s9221_s14  ;;  %v8493_v2 = vld [vmem:[%s9313_s30 + $0x8] ss:$36 sps:$4 sm:$0xff]   ;;  %665 = vmatprep.subr.bf16.mxu0 %v8490_v0  ;;  %v8497_v6 = vld [vmem:[%s9313_s30 + $0x18] ss:$36 sps:$4 sm:$0xff]  }
  0x13   : > { %498 = vrot.lane.b32.xlu1 %v8492_v1, %s9221_s14  ;;  %666 = vmatpush1.bf16.msra.mxu0 %v8492_v1  ;;  %v9340_v7 = vld [vmem:[%s9313_s30 + $0x10] ss:$36 sps:$4 sm:$0xff]   ;;  %v9360_v8 = vld [vmem:[%s9313_s30 + $0x20] ss:$36 sps:$4 sm:$0xff]  }
  0x14   : > { %708 = vmatprep.subr.bf16.mxu1 %v8501_v3  ;;  %v9376_v9 = vld [vmem:[%s9313_s30 + $0x1c] ss:$36 sps:$4 sm:$0xff]  }
  0x15   : > { %709 = vmatpush1.bf16.msra.mxu1 %v8493_v2 }
  0x16   : > { %502 = vrot.lane.b32.xlu0 %v8493_v2, %s9221_s14 }
  0x17   : > { %536 = vrot.lane.b32.xlu1 %v8490_v0, %s9222_s15 }
  0x1a   : > { %538 = vrot.lane.b32.xlu0 %v8493_v2, %s9222_s15 }
  0x1b   : > { %534 = vrot.lane.b32.xlu1 %v8492_v1, %s9222_s15 }
  0x1e   : > { %572 = vrot.lane.b32.xlu0 %v8490_v0, %s9223_s16 }
  0x1f   : > { %574 = vrot.lane.b32.xlu1 %v8493_v2, %s9223_s16 }
  0x22   : > { %570 = vrot.lane.b32.xlu0 %v8492_v1, %s9223_s16 }
  0x23   : > { %608 = vrot.lane.b32.xlu1 %v8490_v0, %s9225_s17 }
  0x26   : > { %610 = vrot.lane.b32.xlu0 %v8493_v2, %s9225_s17 }
  0x27   : > { %606 = vrot.lane.b32.xlu1 %v8492_v1, %s9225_s17 }
  0x2a   : > { %508 = vrot.lane.b32.xlu0 %v9334_v5, %s9221_s14 }
  0x2b   : > { %510 = vrot.lane.b32.xlu1 %v8497_v6, %s9221_s14 }
  0x2e   : > { %506 = vrot.lane.b32.xlu0 %v9340_v7, %s9221_s14 }
  0x2f   : > { %544 = vrot.lane.b32.xlu1 %v9334_v5, %s9222_s15 }
  0x32   : > { %546 = vrot.lane.b32.xlu0 %v8497_v6, %s9222_s15 }
  0x33   : > { %542 = vrot.lane.b32.xlu1 %v9340_v7, %s9222_s15 }
  0x36   : > { %580 = vrot.lane.b32.xlu0 %v9334_v5, %s9223_s16 }
  0x37   : > { %582 = vrot.lane.b32.xlu1 %v8497_v6, %s9223_s16 }
  0x3a   : > { %578 = vrot.lane.b32.xlu0 %v9340_v7, %s9223_s16 }
  0x3b   : > { %616 = vrot.lane.b32.xlu1 %v9334_v5, %s9225_s17 }
  0x3e   : > { %618 = vrot.lane.b32.xlu0 %v8497_v6, %s9225_s17 }
  0x3f   : > { %614 = vrot.lane.b32.xlu1 %v9340_v7, %s9225_s17 }
  0x42   : > { %514 = vrot.lane.b32.xlu0 %v9360_v8, %s9221_s14 }
  0x43   : > { %550 = vrot.lane.b32.xlu1 %v9360_v8, %s9222_s15 }
  0x46   : > { %586 = vrot.lane.b32.xlu0 %v9360_v8, %s9223_s16 }
  0x47   : > { %622 = vrot.lane.b32.xlu1 %v9360_v8, %s9225_s17 }
  0x4a   : > { %504 = vrot.lane.b32.xlu0 %v8501_v3, %s9221_s14 }
  0x4b   : > { %540 = vrot.lane.b32.xlu1 %v8501_v3, %s9222_s15 }
  0x4e   : > { %576 = vrot.lane.b32.xlu0 %v8501_v3, %s9223_s16 }
  0x4f   : > { %612 = vrot.lane.b32.xlu1 %v8501_v3, %s9225_s17 }
  0x52   : > { %512 = vrot.lane.b32.xlu0 %v9376_v9, %s9221_s14 }
  0x53   : > { %548 = vrot.lane.b32.xlu1 %v9376_v9, %s9222_s15 }
  0x56   : > { %584 = vrot.lane.b32.xlu0 %v9376_v9, %s9223_s16 }
  0x57   : > { %620 = vrot.lane.b32.xlu1 %v9376_v9, %s9225_s17 }
  0x5a   : > { %648 = vperm.xlu0 %8253, %v644_v10  }
  0x5b   : > { %653 = vperm.xlu1 %8254, %v645_v11  }
  0x84   : > { %v501_v12 = vpop.permute.xlu0 %500 }
  0x85   : > { %v499_v13 = vpop.permute.xlu1 %498 }
  0x86   : > { %v517_v17 = vsel %vm516_vm0, %v499_v13, %v501_v12 }
  0x88   : > { %v9394_v14 = vpop.permute.xlu0 %502 }
  0x89   : > { %v537_v15 = vpop.permute.xlu1 %536  ;;  %v518_v16 = vsel %vm516_vm0, %v501_v12, %v9394_v14 }
  0x8a   : > { %667 = vmatprep.subr.bf16.mxu0 %v518_v16 }
  0x8b   : > { %668 = vmatpush1.bf16.msra.mxu0 %v517_v17 }
  0x8c   : > { %v9399_v18 = vpop.permute.xlu0 %538 }
  0x8d   : > { %v535_v19 = vpop.permute.xlu1 %534  ;;  %v554_v20 = vsel %vm552_vm1, %v537_v15, %v9399_v18 }
  0x8e   : > { %669 = vmatprep.subr.bf16.mxu0 %v554_v20  ;;  %v553_v21 = vsel %vm552_vm1, %v535_v19, %v537_v15  ;;  %v8504_v20 = vld [vmem:[%s12440_s3] ss:$20 sps:$4 sm:$0xff]  }
  0x8f   : > { %670 = vmatpush1.bf16.msra.mxu0 %v553_v21  ;;  %v8506_v21 = vld [vmem:[%s12440_s3 + $0x4] ss:$20 sps:$4 sm:$0xff]  }
  0x90   : > { %v573_v22 = vpop.permute.xlu0 %572 }
  0x91   : > { %v9404_v23 = vpop.permute.xlu1 %574 }
  0x92   : > { %v590_v24 = vsel %vm588_vm2, %v573_v22, %v9404_v23 }
  0x93   : > { %671 = vmatprep.subr.bf16.mxu0 %v590_v24  ;;  %v8512_v24 = vld [vmem:[%s12440_s3 + $0x54] ss:$20 sps:$4 sm:$0xff]  }
  0x94   : > { %v571_v25 = vpop.permute.xlu0 %570 }
  0x95   : > { %v609_v26 = vpop.permute.xlu1 %608  ;;  %v589_v27 = vsel %vm588_vm2, %v571_v25, %v573_v22  ;;  %v8509_v22 = vld [vmem:[%s12440_s3 + $0x2c] ss:$20 sps:$4 sm:$0xff]   ;;  %v8510_v25 = vld [vmem:[%s12440_s3 + $0x50] ss:$20 sps:$4 sm:$0xff]  }
  0x96   : > { %672 = vmatpush1.bf16.msra.mxu0 %v589_v27  ;;  %v8543_v27 = vld [vmem:[%s12440_s3 + $0xa00] ss:$20 sps:$4 sm:$0xff]  }
  0x98   : > { %v9409_v28 = vpop.permute.xlu0 %610 }
  0x99   : > { %v607_v30 = vpop.permute.xlu1 %606  ;;  %v626_v31 = vsel %vm624_vm3, %v609_v26, %v9409_v28 }
  0x9a   : > { %673 = vmatprep.subr.bf16.mxu0 %v626_v31  ;;  %v625_v32 = vsel %vm624_vm3, %v607_v30, %v609_v26  ;;  %v8515_v26 = vld [vmem:[%s12440_s3 + $0x7c] ss:$20 sps:$4 sm:$0xff]   ;;  %v8518_v30 = vld [vmem:[%s12440_s3 + $0xa4] ss:$20 sps:$4 sm:$0xff]   ;;  %v8516_v31 = vld [vmem:[%s12440_s3 + $0xa0] ss:$20 sps:$4 sm:$0xff]  }
  0x9b   : > { %674 = vmatpush1.bf16.msra.mxu0 %v625_v32  ;;  %v8521_v32 = vld [vmem:[%s12440_s3 + $0xcc] ss:$20 sps:$4 sm:$0xff]  }
  0x9c   : > { %v509_v33 = vpop.permute.xlu0 %508  ;;  %751 = vmatprep.subr.bf16.mxu0 %v9334_v5 }
  0x9d   : > { %v9420_v34 = vpop.permute.xlu1 %510 }
  0x9e   : > { %7307 = vmatmul.mubr.msk.bf16.vlgmr.msra.gmra.mrb[0].mxu0 %vm661_vm4, %v9414_v29  ;;  %v522_v35 = vsel %vm516_vm0, %v509_v33, %v9420_v34 }
  0x9f   : > { %752 = vmatpush1.bf16.msra.mxu0 %v9340_v7  ;;  %783 = vmatprep.mubr.bf16.mxu0 %v9224_v4 }
  0xa0   : > { %v507_v36 = vpop.permute.xlu0 %506  ;;  %753 = vmatprep.subr.bf16.mxu0 %v522_v35  ;;  %v8522_v35 = vld [vmem:[%s12440_s3 + $0xf0] ss:$20 sps:$4 sm:$0xff]  }
  0xa1   : > { %v545_v37 = vpop.permute.xlu1 %544  ;;  %v521_v38 = vsel %vm516_vm0, %v507_v36, %v509_v33  ;;  %v8519_v33 = vld [vmem:[%s12440_s3 + $0xc8] ss:$20 sps:$4 sm:$0xff]  }
  0xa3   : > { %754 = vmatpush1.bf16.msra.mxu0 %v521_v38  ;;  %v8530_v38 = vld [vmem:[%s12440_s3 + $0x144] ss:$20 sps:$4 sm:$0xff]  }
  0xa4   : > { %v9429_v39 = vpop.permute.xlu0 %546 }
  0xa5   : > { %v543_v40 = vpop.permute.xlu1 %542  ;;  %v558_v41 = vsel %vm552_vm1, %v545_v37, %v9429_v39 }
  0xa6   : > { %755 = vmatprep.subr.bf16.mxu0 %v558_v41  ;;  %v557_v42 = vsel %vm552_vm1, %v543_v40, %v545_v37  ;;  %v8525_v37 = vld [vmem:[%s12440_s3 + $0x118] ss:$20 sps:$4 sm:$0xff]   ;;  %v8531_v41 = vld [vmem:[%s12440_s3 + $0x168] ss:$20 sps:$4 sm:$0xff]  }
  0xa7   : > { %756 = vmatpush1.bf16.msra.mxu0 %v557_v42  ;;  %v8536_v42 = vld [vmem:[%s12440_s3 + $0x194] ss:$20 sps:$4 sm:$0xff]  }
  0xa8   : > { %v581_v43 = vpop.permute.xlu0 %580 }
  0xa9   : > { %v9434_v44 = vpop.permute.xlu1 %582 }
  0xaa   : > { %v594_v45 = vsel %vm588_vm2, %v581_v43, %v9434_v44 }
  0xab   : > { %757 = vmatprep.subr.bf16.mxu0 %v594_v45  ;;  %v8537_v45 = vld [vmem:[%s12440_s3 + $0x1b8] ss:$20 sps:$4 sm:$0xff]  }
  0xac   : > { %v579_v46 = vpop.permute.xlu0 %578 }
  0xad   : > { %v617_v47 = vpop.permute.xlu1 %616  ;;  %v593_v48 = vsel %vm588_vm2, %v579_v46, %v581_v43  ;;  %v8534_v43 = vld [vmem:[%s12440_s3 + $0x190] ss:$20 sps:$4 sm:$0xff]  }
  0xae   : > { %758 = vmatpush1.bf16.msra.mxu0 %v593_v48 }
  0xb0   : > { %v9439_v49 = vpop.permute.xlu0 %618 }
  0xb1   : > { %v615_v50 = vpop.permute.xlu1 %614  ;;  %v630_v51 = vsel %vm624_vm3, %v617_v47, %v9439_v49 }
  0xb2   : > { %759 = vmatprep.subr.bf16.mxu0 %v630_v51  ;;  %v629_v52 = vsel %vm624_vm3, %v615_v50, %v617_v47  ;;  %v8540_v47 = vld [vmem:[%s12440_s3 + $0x1e0] ss:$20 sps:$4 sm:$0xff]  }
  0xb3   : > { %760 = vmatpush1.bf16.msra.mxu0 %v629_v52 }
  0xb4   : > { %v515_v53 = vpop.permute.xlu0 %514  ;;  %8064 = vmatprep.subr.bf16.mxu0 %v9226_v54 }
  0xb5   : > { %v551_v55 = vpop.permute.xlu1 %550 }
  0xb6   : > { %7309 = vmatmul.mubr.msk.bf16.vlgmr.msra.gmra.mrb[4].mxu0 %vm661_vm4, %v9414_v29 }
  0xb7   : > { %8065 = vmatpush3.bf16.msra.mxu0 %v9360_v8  ;;  %8074 = vmatprep.mubr.msk.bf16.mxu0 %vm9227_vm5, %v9226_v54  ;;  %v9212_v8 = vld [vmem:[%s9313_s30 + $0x18] ss:$36 sps:$4 sm:$0xff]  }
  0xb8   : > { %v587_v56 = vpop.permute.xlu0 %586  ;;  %8066 = vmatprep.subr.bf16.mxu0 %v9226_v54 }
  0xb9   : > { %v623_v57 = vpop.permute.xlu1 %622 }
  0xbb   : > { %8067 = vmatpush3.bf16.msra.mxu0 %v515_v53 }
  0xbc   : > { %v505_v58 = vpop.permute.xlu0 %504  ;;  %8068 = vmatprep.subr.bf16.mxu0 %v9226_v54 }
  0xbd   : > { %v541_v59 = vpop.permute.xlu1 %540  ;;  %v520_v60 = vsel %vm516_vm0, %v505_v58, %v507_v36  ;;  %v519_v61 = vsel %vm516_vm0, %v9394_v14, %v505_v58  ;;  %v8527_v36 = vld [vmem:[%s12440_s3 + $0x11c] ss:$20 sps:$4 sm:$0xff]   ;;  %v9228_v58 = vmov 65535  }
  0xbe   : > { %710 = vmatprep.subr.bf16.mxu1 %v520_v60  ;;  %v556_v62 = vsel %vm552_vm1, %v541_v59, %v543_v40  ;;  %v555_v0 = vsel %vm552_vm1, %v9399_v18, %v541_v59  ;;  %v8533_v40 = vld [vmem:[%s12440_s3 + $0x16c] ss:$20 sps:$4 sm:$0xff]   ;;  %v3125_v59 = vsel %vm3123_vm6, 4294967295, %v9228_v58 }
  0xbf   : > { %711 = vmatpush1.bf16.msra.mxu1 %v519_v61  ;;  %8069 = vmatpush3.bf16.msra.mxu0 %v551_v55  ;;  %v8548_v60 = vld [vmem:[%s12440_s3 + $0x20c] ss:$20 sps:$4 sm:$0xff]   ;;  %v8549_v61 = vld [vmem:[%s12440_s3 + $0xa28] ss:$20 sps:$4 sm:$0x3f]  }
  0xc0   : > { %v577_v63 = vpop.permute.xlu0 %576  ;;  %712 = vmatprep.subr.bf16.mxu1 %v556_v62  ;;  %8070 = vmatprep.subr.bf16.mxu0 %v9226_v54  ;;  %v9585_v62 = vsel %vm3124_vm7, %v3125_v59, 0 }
  0xc1   : > { %v592_v1 = vsel %vm588_vm2, %v577_v63, %v579_v46  ;;  %v613_v2 = vpop.permute.xlu1 %612  ;;  %v591_v3 = vsel %vm588_vm2, %v9404_v23, %v577_v63  ;;  %v8507_v23 = vld [vmem:[%s12440_s3 + $0x28] ss:$20 sps:$4 sm:$0xff]   ;;  %v8542_v46 = vld [vmem:[%s12440_s3 + $0x1e4] ss:$20 sps:$4 sm:$0xff]  }
  0xc2   : > { %v628_v5 = vsel %vm624_vm3, %v613_v2, %v615_v50  ;;  %v627_v6 = vsel %vm624_vm3, %v9409_v28, %v613_v2  ;;  %v8545_v28 = vld [vmem:[%s12440_s3 + $0xa04] ss:$20 sps:$4 sm:$0xff]   ;;  %v8546_v63 = vld [vmem:[%s12440_s3 + $0x208] ss:$20 sps:$4 sm:$0xff]  }
  0xc3   : > { %713 = vmatpush1.bf16.msra.mxu1 %v555_v0  ;;  %8071 = vmatpush3.bf16.msra.mxu0 %v587_v56 }
  0xc4   : > { %714 = vmatprep.subr.bf16.mxu1 %v592_v1  ;;  %8072 = vmatprep.subr.bf16.mxu0 %v9226_v54  ;;  %v513_v7 = vpop.permute.xlu0 %512  ;;  %v3128_v1 = vand.u32 %v8549_v61, %v9585_v62 }
  0xc5   : > { %v524_v10 = vsel %vm516_vm0, %v513_v7, %v515_v53  ;;  %v549_v11 = vpop.permute.xlu1 %548  ;;  %v523_v12 = vsel %vm516_vm0, %v9420_v34, %v513_v7  ;;  %v8524_v34 = vld [vmem:[%s12440_s3 + $0xf4] ss:$20 sps:$4 sm:$0xff]  }
  0xc6   : > { %v560_v13 = vsel %vm552_vm1, %v549_v11, %v551_v55 }
  0xc7   : > { %715 = vmatpush1.bf16.msra.mxu1 %v591_v3  ;;  %8073 = vmatpush3.bf16.msra.mxu0 %v623_v57  ;;  %v8554_v3 = vld [vmem:[%s12440_s3 + $0x234] ss:$20 sps:$4 sm:$0xff]  }
  0xc8   : > { %716 = vmatprep.subr.bf16.mxu1 %v628_v5  ;;  %v585_v14 = vpop.permute.xlu0 %584  ;;  %3314 = vmatprep.subr.bf16.mxu0 %v8545_v28 }
  0xc9   : > { %v596_v15 = vsel %vm588_vm2, %v585_v14, %v587_v56  ;;  %v621_v16 = vpop.permute.xlu1 %620  ;;  %v595_v17 = vsel %vm588_vm2, %v9434_v44, %v585_v14  ;;  %v8539_v44 = vld [vmem:[%s12440_s3 + $0x1bc] ss:$20 sps:$4 sm:$0xff]  }
  0xca   : > { %8075 = vmatmul.mubr.msk.bf16.vlgmr.msra.gmra.mrb[8].mxu0 %vm661_vm4, %v9414_v29  ;;  %v632_v18 = vsel %vm624_vm3, %v621_v16, %v623_v57  ;;  %v631_v19 = vsel %vm624_vm3, %v9439_v49, %v621_v16  ;;  %v8551_v57 = vld [vmem:[%s12440_s3 + $0xa2c] ss:$20 sps:$4 sm:$0x3f]  }
  0xcb   : > { %717 = vmatpush1.bf16.msra.mxu1 %v627_v6  ;;  %3346 = vmatprep.mubr.bf16.mxu0 %v9224_v4  ;;  %v3131_v0 = vand.u32 %v8551_v57, %v9585_v62  ;;  %v8552_v6 = vld [vmem:[%s12440_s3 + $0x230] ss:$20 sps:$4 sm:$0xff]  }
  0xcc   : > { %794 = vmatprep.subr.bf16.mxu1 %v9376_v9  ;;  %v559_v9 = vsel %vm552_vm1, %v9429_v39, %v549_v11  ;;  %3315 = vmatpush1.bf16.msra.mxu0 %v8543_v27  ;;  %v8528_v39 = vld [vmem:[%s12440_s3 + $0x140] ss:$20 sps:$4 sm:$0xff]  }
  0xcd   : > { %3316 = vmatprep.subr.bf16.mxu0 %v3131_v0  ;;  %v8557_v11 = vld [vmem:[%s12440_s3 + $0xc] ss:$20 sps:$4 sm:$0xff]  }
  0xce   : > { %7308 = vmatmul.mubr.msk.bf16.vlgmr.msra.gmra.mrb[0].mxu1 %vm661_vm4, %v9414_v29 }
  0xcf   : > { %795 = vmatpush1.bf16.msra.mxu1 %v9212_v8  ;;  %826 = vmatprep.mubr.bf16.mxu1 %v9224_v4 }
  0xd0   : > { %796 = vmatprep.subr.bf16.mxu1 %v524_v10  ;;  %3317 = vmatpush1.bf16.msra.mxu0 %v3128_v1 }
  0xd1   : > { %3357 = vmatprep.subr.bf16.mxu0 %v8557_v11 }
  0xd3   : > { %797 = vmatpush1.bf16.msra.mxu1 %v523_v12 }
  0xd4   : > { %798 = vmatprep.subr.bf16.mxu1 %v560_v13 }
  0xd7   : > { %799 = vmatpush1.bf16.msra.mxu1 %v559_v9 }
  0xd8   : > { %800 = vmatprep.subr.bf16.mxu1 %v596_v15  ;;  %v8560_v15 = vld [vmem:[%s12440_s3 + $0x25c] ss:$20 sps:$4 sm:$0xff]  }
  0xd9   : > { %v9592_v2 = vpop.permute.xlu0 %648 }
  0xda   : > { %v9600_v7 = vpop.permute.xlu1 %653 }
  0xdb   : > { %801 = vmatpush1.bf16.msra.mxu1 %v595_v17 }
  0xdc   : > { %802 = vmatprep.subr.bf16.mxu1 %v632_v18 }
  0xdf   : > { %803 = vmatpush1.bf16.msra.mxu1 %v631_v19 }
  0xe0   : > { %3142 = vmatprep.subr.bf16.mxu1 %v8506_v21 }
  0xe2   : > { %7310 = vmatmul.mubr.msk.bf16.vlgmr.msra.gmra.mrb[4].mxu1 %vm661_vm4, %v9414_v29  ;;  %v8513_v29 = vld [vmem:[%s12440_s3 + $0x78] ss:$20 sps:$4 sm:$0xff]  }
  0xe3   : > { %3143 = vmatpush1.bf16.msra.mxu1 %v8504_v20  ;;  %v8558_v20 = vld [vmem:[%s12440_s3 + $0x258] ss:$20 sps:$4 sm:$0xff]  }
  0xe4   : > { %3144 = vmatprep.subr.bf16.mxu1 %v8509_v22 }
  0xe7   : > { %3145 = vmatpush1.bf16.msra.mxu1 %v8507_v23 }
  0xe8   : > { %3146 = vmatprep.subr.bf16.mxu1 %v8512_v24 }
  0xeb   : > { %3147 = vmatpush1.bf16.msra.mxu1 %v8510_v25 }
  0xec   : > { %3148 = vmatprep.subr.bf16.mxu1 %v8515_v26 }
  0xef   : > { %3149 = vmatpush1.bf16.msra.mxu1 %v8513_v29 }
  0xf0   : > { %3150 = vmatprep.subr.bf16.mxu1 %v8518_v30 }
  0xf3   : > { %3151 = vmatpush1.bf16.msra.mxu1 %v8516_v31 }
  0xf4   : > { %3152 = vmatprep.subr.bf16.mxu1 %v8521_v32  ;;  %v8566_v32 = vld [vmem:[%s12440_s3 + $0x284] ss:$20 sps:$4 sm:$0xff]  }
  0xf7   : > { %3153 = vmatpush1.bf16.msra.mxu1 %v8519_v33 }
  0xf8   : > { %3154 = vmatprep.subr.bf16.mxu1 %v8524_v34 }
  0xfb   : > { %3155 = vmatpush1.bf16.msra.mxu1 %v8522_v35 }
  0xfc   : > { %3156 = vmatprep.subr.bf16.mxu1 %v8527_v36 }
  0xff   : > { %3157 = vmatpush1.bf16.msra.mxu1 %v8525_v37 }
 0x100   : > { %3158 = vmatprep.subr.bf16.mxu1 %v8530_v38 }
 0x103   : > { %3159 = vmatpush1.bf16.msra.mxu1 %v8528_v39 }
 0x104   : > { %3160 = vmatprep.subr.bf16.mxu1 %v8533_v40 }
 0x107   : > { %3161 = vmatpush1.bf16.msra.mxu1 %v8531_v41 }
 0x108   : > { %3162 = vmatprep.subr.bf16.mxu1 %v8536_v42 }
 0x10b   : > { %3163 = vmatpush1.bf16.msra.mxu1 %v8534_v43 }
 0x10c   : > { %3164 = vmatprep.subr.bf16.mxu1 %v8539_v44 }
 0x10f   : > { %3165 = vmatpush1.bf16.msra.mxu1 %v8537_v45 }
 0x110   : > { %3166 = vmatprep.subr.bf16.mxu1 %v8542_v46 }
 0x113   : > { %3167 = vmatpush1.bf16.msra.mxu1 %v8540_v47 }
 0x114   : > { %3168 = vmatprep.subr.bf16.mxu1 %v8548_v60 }
 0x117   : > { %3169 = vmatpush1.bf16.msra.mxu1 %v8546_v63 }
 0x118   : > { %3170 = vmatprep.subr.bf16.mxu1 %v8554_v3 }
 0x11b   : > { %3171 = vmatpush1.bf16.msra.mxu1 %v8552_v6 }
 0x11c   : > { %3172 = vmatprep.subr.bf16.mxu1 %v8560_v15 }
 0x11f   : > { %3173 = vmatpush1.bf16.msra.mxu1 %v8558_v20 }
 0x120   : > { %3185 = vmatprep.subr.bf16.mxu1 %v8566_v32 }
 0x171   : > { %v699_v48 = vpop.f32.mrb[0].mxu0 }
 0x172   : > { %v701_v49 = vpop.f32.mrb[1].mxu0  ;;  %v9621_v18 = vadd.f32 %v699_v48, %v9592_v2 }
 0x173   : > { %v703_v50 = vpop.f32.mrb[2].mxu0  ;;  %v9609_v13 = vadd.f32 %v701_v49, %v9592_v2 }
 0x174   : > { %v705_v51 = vpop.f32.mrb[3].mxu0  ;;  %v9624_v19 = vadd.f32 %v703_v50, %v9600_v7  ;;  %v878_v34 = vmax.f32 %v9621_v18, 0.0  ;;  %v8567_v18 = vld [vmem:[%s12440_s3 + $0x58] ss:$20 sps:$4 sm:$0xff]  }
 0x175   : > { %v9618_v16 = vadd.f32 %v705_v51, %v9600_v7  ;;  %v879_v25 = vmax.f32 %v9609_v13, 0.0 }
 0x176   : > { %v887_v35 = vmax.f32 %v9624_v19, 0.0 }
 0x177   : > { %v888_v33 = vmax.f32 %v9618_v16, 0.0 }
 0x178   : > { %v8270_v45 = vpack.i.bf16 %v887_v35, %v878_v34 }
 0x189   : > { %v785_v52 = vpop.f32.mrb[4].mxu0 }
 0x18a   : > { %v9572_v53 = vpop.f32.mrb[5].mxu0  ;;  %v9651_v36 = vadd.f32 %v785_v52, %v9592_v2 }
 0x18b   : > { %v789_v55 = vpop.f32.mrb[6].mxu0  ;;  %v9692_v49 = vadd.f32 %v9572_v53, %v9592_v2 }
 0x18c   : > { %v9574_v56 = vpop.f32.mrb[7].mxu0  ;;  %v9663_v40 = vadd.f32 %v789_v55, %v9600_v7  ;;  %v882_v43 = vmax.f32 %v9651_v36, 0.0 }
 0x18d   : > { %v9696_v51 = vadd.f32 %v9574_v56, %v9600_v7  ;;  %v883_v59 = vmax.f32 %v9692_v49, 0.0  ;;  %v8666_v49 = vld [vmem:[%s12440_s3 + $0x528] ss:$20 sps:$4 sm:$0xff]  }
 0x18e   : > { %v891_v46 = vmax.f32 %v9663_v40, 0.0  ;;  %v8599_v40 = vld [vmem:[%s12440_s3 + $0x124] ss:$20 sps:$4 sm:$0xff]  }
 0x18f   : > { %v892_v56 = vmax.f32 %v9696_v51, 0.0  ;;  %v8668_v51 = vld [vmem:[%s12440_s3 + $0x52c] ss:$20 sps:$4 sm:$0xff]  }
 0x19d   : > { %v871_v5 = vpop.f32.mrb[8].mxu0 }
 0x19e   : > { %v9603_v8 = vadd.f32 %v871_v5, %v9592_v2  ;;  %v8076_v10 = vpop.f32.mrb[9].mxu0 }
 0x19f   : > { %v874_v12 = vpop.f32.mrb[10].mxu0 }
 0x1a0   : > { %v9612_v14 = vadd.f32 %v874_v12, %v9600_v7  ;;  %v8077_v9 = vpop.f32.mrb[11].mxu0  ;;  %v886_v21 = vmax.f32 %v9603_v8, 0.0 }
 0x1a1   : > { %v742_v17 = vpop.f32.mrb[0].mxu1 }
 0x1a2   : > { %v895_v22 = vmax.f32 %v9612_v14, 0.0  ;;  %v9632_v23 = vadd.f32 %v742_v17, %v9592_v2  ;;  %v744_v24 = vpop.f32.mrb[1].mxu1 }
 0x1a3   : > { %v746_v26 = vpop.f32.mrb[2].mxu1  ;;  %v9639_v29 = vadd.f32 %v744_v24, %v9592_v2  ;;  %v8555_v24 = vld [vmem:[%s12440_s3 + $0x8] ss:$20 sps:$4 sm:$0xff]  }
 0x1a4   : > { %v8255_v27 = vpack.i.bf16 %v895_v22, %v886_v21  ;;  %v880_v28 = vmax.f32 %v9632_v23, 0.0  ;;  %v9642_v30 = vadd.f32 %v746_v26, %v9600_v7  ;;  %v748_v31 = vpop.f32.mrb[3].mxu1 }
 0x1a5   : > { %v9659_v39 = vadd.f32 %v748_v31, %v9600_v7  ;;  %v881_v41 = vmax.f32 %v9639_v29, 0.0  ;;  %v8578_v29 = vld [vmem:[%s12440_s3 + $0x2d4] ss:$20 sps:$4 sm:$0xff]  }
 0x1a6   : > { %v8260_v37 = vpack.i.bf16 %v880_v28, %v879_v25  ;;  %v889_v38 = vmax.f32 %v9642_v30, 0.0  ;;  %8256 = vrot.lane.b32.xlu1 %v8255_v27, %s9221_s14 }
 0x1a7   : > { %v890_v44 = vmax.f32 %v9659_v39, 0.0  ;;  %v8275_v47 = vpack.i.bf16 %v882_v43, %v881_v41  ;;  %v8576_v39 = vld [vmem:[%s12440_s3 + $0x2d0] ss:$20 sps:$4 sm:$0xff]  }
 0x1a8   : > { %v8265_v42 = vpack.i.bf16 %v889_v38, %v888_v33  ;;  %8261 = vrot.lane.b32.xlu0 %v8260_v37, %s9221_s14 }
 0x1a9   : > { %v8280_v48 = vpack.i.bf16 %v891_v46, %v890_v44 }
 0x1aa   : > { %8266 = vrot.lane.b32.xlu1 %v8265_v42, %s9221_s14 }
 0x1ac   : > { %8271 = vrot.lane.b32.xlu0 %v8270_v45, %s9221_s14 }
 0x1ae   : > { %8276 = vrot.lane.b32.xlu1 %v8275_v47, %s9221_s14  ;;  %v8561_v47 = vld [vmem:[%s12440_s3 + $0x30] ss:$20 sps:$4 sm:$0xff]  }
 0x1b0   : > { %8281 = vrot.lane.b32.xlu0 %v8280_v48, %s9221_s14 }
 0x1b5   : > { %v828_v50 = vpop.f32.mrb[4].mxu1 }
 0x1b6   : > { %v9699_v52 = vadd.f32 %v828_v50, %v9592_v2  ;;  %v830_v55 = vpop.f32.mrb[5].mxu1 }
 0x1b7   : > { %v9702_v57 = vadd.f32 %v830_v55, %v9592_v2  ;;  %v832_v58 = vpop.f32.mrb[6].mxu1 }
 0x1b8   : > { %v884_v60 = vmax.f32 %v9699_v52, 0.0  ;;  %v9707_v53 = vadd.f32 %v832_v58, %v9600_v7  ;;  %v834_v61 = vpop.f32.mrb[7].mxu1  ;;  %v8597_v52 = vld [vmem:[%s12440_s3 + $0x120] ss:$20 sps:$4 sm:$0xff]  }
 0x1b9   : > { %v9710_v63 = vadd.f32 %v834_v61, %v9600_v7  ;;  %v885_v2 = vmax.f32 %v9702_v57, 0.0  ;;  %v8605_v57 = vld [vmem:[%s12440_s3 + $0x14c] ss:$20 sps:$4 sm:$0xff]  }
 0x1ba   : > { %v8285_v0 = vpack.i.bf16 %v884_v60, %v883_v59  ;;  %v893_v1 = vmax.f32 %v9707_v53, 0.0 }
 0x1bb   : > { %v894_v3 = vmax.f32 %v9710_v63, 0.0  ;;  %v8600_v63 = vld [vmem:[%s12440_s3 + $0x370] ss:$20 sps:$4 sm:$0xff]  }
 0x1bc   : > { %v8290_v5 = vpack.i.bf16 %v893_v1, %v892_v56  ;;  %8286 = vrot.lane.b32.xlu1 %v8285_v0, %s9221_s14 }
 0x1bd   : > { %v8295_v6 = vpack.i.bf16 %v894_v3, %v885_v2 }
 0x1be   : > { %8291 = vrot.lane.b32.xlu0 %v8290_v5, %s9221_s14  ;;  %v8569_v5 = vld [vmem:[%s12440_s3 + $0x5c] ss:$20 sps:$4 sm:$0xff]  }
 0x1c0   : > { %8296 = vrot.lane.b32.xlu1 %v8295_v6, %s9221_s14 }
 0x218   : > { %v9731_v7 = vpop.permute.xlu1 %8256 }
 0x219   : > { %v8259_v10 = vunpack.i.h.bf16 %v9731_v7  ;;  %v8258_v11 = vunpack.i.l.bf16 %v9731_v7 }
 0x21a   : > { %v8262_v12 = vpop.permute.xlu0 %8261 }
 0x21b   : > { %v1002_v14 = vmax.f32 %v895_v22, %v8259_v10  ;;  %v993_v9 = vmax.f32 %v886_v21, %v8258_v11  ;;  %v8264_v15 = vunpack.i.h.bf16 %v8262_v12  ;;  %v8263_v17 = vunpack.i.l.bf16 %v8262_v12  ;;  %v8563_v22 = vld [vmem:[%s12440_s3 + $0x34] ss:$20 sps:$4 sm:$0xff]  }
 0x21c   : > { %v8267_v20 = vpop.permute.xlu1 %8266 }
 0x21d   : > { %v9744_v26 = vpack.c.bf16 %v1002_v14, %v993_v9  ;;  %v8269_v27 = vunpack.i.h.bf16 %v8267_v20  ;;  %v8268_v31 = vunpack.i.l.bf16 %v8267_v20  ;;  %v952_v32 = vsel %vm516_vm0, %v8263_v17, %v8264_v15  ;;  %v8564_v9 = vld [vmem:[%s12440_s3 + $0x280] ss:$20 sps:$4 sm:$0xff]   ;;  %v8575_v20 = vld [vmem:[%s12440_s3 + $0x84] ss:$20 sps:$4 sm:$0xff]  }
 0x21e   : > { %v8272_v8 = vpop.permute.xlu0 %8271  ;;  %v986_v48 = vmax.f32 %v879_v25, %v952_v32  ;;  %v8570_v32 = vld [vmem:[%s12440_s3 + $0x2a8] ss:$20 sps:$4 sm:$0xff]  }
 0x21f   : > { %v8274_v21 = vunpack.i.h.bf16 %v8272_v8  ;;  %v8273_v37 = vunpack.i.l.bf16 %v8272_v8  ;;  %7642 = vmatmul.mubr.msk.bf16.vlgmr.msra.gmra.mrb[12].mxu0 %vm3119_vm8, %v9744_v26  ;;  %v960_v42 = vsel %vm516_vm0, %v8268_v31, %v8269_v27  ;;  %v8587_v8 = vld [vmem:[%s12440_s3 + $0xd4] ss:$20 sps:$4 sm:$0xff]  }
 0x220   : > { %3358 = vmatpush1.bf16.msra.mxu0 %v8555_v24  ;;  %v9753_v45 = vpop.permute.xlu1 %8276  ;;  %v995_v50 = vmax.f32 %v888_v33, %v960_v42  ;;  %v8582_v42 = vld [vmem:[%s12440_s3 + $0x2f8] ss:$20 sps:$4 sm:$0xff]  }
 0x221   : > { %v959_v55 = vsel %vm516_vm0, %v8274_v21, %v8268_v31  ;;  %v951_v58 = vsel %vm516_vm0, %v8273_v37, %v8263_v17  ;;  %v8279_v61 = vunpack.i.h.bf16 %v9753_v45  ;;  %v8278_v0 = vunpack.i.l.bf16 %v9753_v45  ;;  %3359 = vmatprep.subr.bf16.mxu0 %v8563_v22 }
 0x222   : > { %v994_v13 = vmax.f32 %v887_v35, %v959_v55  ;;  %v985_v16 = vmax.f32 %v878_v34, %v951_v58  ;;  %v8282_v25 = vpop.permute.xlu0 %8281  ;;  %v9773_v33 = vpack.c.bf16 %v995_v50, %v986_v48  ;;  %v8572_v34 = vld [vmem:[%s12440_s3 + $0x2ac] ss:$20 sps:$4 sm:$0xff]   ;;  %v8590_v48 = vld [vmem:[%s12440_s3 + $0x324] ss:$20 sps:$4 sm:$0xff]   ;;  %v8593_v58 = vld [vmem:[%s12440_s3 + $0xfc] ss:$20 sps:$4 sm:$0xff]  }
 0x223   : > { %v953_v6 = vsel %vm516_vm0, %v8264_v15, %v8278_v0  ;;  %v8284_v12 = vunpack.i.h.bf16 %v8282_v25  ;;  %v8283_v14 = vunpack.i.l.bf16 %v8282_v25  ;;  %v954_v17 = vsel %vm516_vm0, %v8278_v0, %v8279_v61 }
 0x224   : > { %3360 = vmatpush1.bf16.msra.mxu0 %v8561_v47  ;;  %3174 = vmatprep.mubr.bf16.mxu1 %v9773_v33  ;;  %v9781_v19 = vpack.c.bf16 %v994_v13, %v985_v16  ;;  %v987_v24 = vmax.f32 %v880_v28, %v953_v6  ;;  %v8573_v28 = vld [vmem:[%s12440_s3 + $0x80] ss:$20 sps:$4 sm:$0xff]   ;;  %v8585_v47 = vld [vmem:[%s12440_s3 + $0xd0] ss:$20 sps:$4 sm:$0xff]  }
 0x225   : > { %v961_v35 = vsel %vm516_vm0, %v8269_v27, %v8283_v14  ;;  %3389 = vmatprep.mubr.bf16.mxu0 %v9773_v33  ;;  %3361 = vmatprep.subr.bf16.mxu0 %v8569_v5  ;;  %v962_v15 = vsel %vm516_vm0, %v8283_v14, %v8284_v12  ;;  %v988_v27 = vmax.f32 %v881_v41, %v954_v17  ;;  %v8579_v41 = vld [vmem:[%s12440_s3 + $0xa8] ss:$20 sps:$4 sm:$0xff]   ;;  %v8591_v17 = vld [vmem:[%s12440_s3 + $0xf8] ss:$20 sps:$4 sm:$0xff]  }
 0x226   : > { %v996_v31 = vmax.f32 %v889_v38, %v961_v35  ;;  %3175 = vmatmul.mubr.bf16.vlgmr.msra.gmra.mrb[8].mxu1 %v9781_v19  ;;  %v997_v22 = vmax.f32 %v890_v44, %v962_v15  ;;  %v8581_v38 = vld [vmem:[%s12440_s3 + $0xac] ss:$20 sps:$4 sm:$0xff]   ;;  %v8584_v44 = vld [vmem:[%s12440_s3 + $0x2fc] ss:$20 sps:$4 sm:$0xff]  }
 0x227   : > { %3186 = vmatpush1.bf16.msra.mxu1 %v8564_v9 }
 0x228   : > { %3362 = vmatpush1.bf16.msra.mxu0 %v8567_v18  ;;  %3187 = vmatprep.subr.bf16.mxu1 %v8572_v34  ;;  %v9807_v23 = vpack.c.bf16 %v997_v22, %v988_v27  ;;  %v9815_v30 = vpack.c.bf16 %v996_v31, %v987_v24  ;;  %v8606_v24 = vld [vmem:[%s12440_s3 + $0x398] ss:$20 sps:$4 sm:$0xff]   ;;  %v8609_v31 = vld [vmem:[%s12440_s3 + $0x170] ss:$20 sps:$4 sm:$0xff]  }
 0x229   : > { %3363 = vmatprep.subr.bf16.mxu0 %v8575_v20  ;;  %v8594_v20 = vld [vmem:[%s12440_s3 + $0x348] ss:$20 sps:$4 sm:$0xff]   ;;  %v8614_v27 = vld [vmem:[%s12440_s3 + $0x3c4] ss:$20 sps:$4 sm:$0xff]  }
 0x22a   : > { %3217 = vmatprep.mubr.bf16.mxu1 %v9807_v23  ;;  %v8617_v22 = vld [vmem:[%s12440_s3 + $0x19c] ss:$20 sps:$4 sm:$0xff]  }
 0x22b   : > { %3188 = vmatpush1.bf16.msra.mxu1 %v8570_v32  ;;  %v8612_v32 = vld [vmem:[%s12440_s3 + $0x3c0] ss:$20 sps:$4 sm:$0xff]  }
 0x22c   : > { %3364 = vmatpush1.bf16.msra.mxu0 %v8573_v28  ;;  %3189 = vmatprep.subr.bf16.mxu1 %v8578_v29  ;;  %v8615_v28 = vld [vmem:[%s12440_s3 + $0x198] ss:$20 sps:$4 sm:$0xff]  }
 0x22d   : > { %3365 = vmatprep.subr.bf16.mxu0 %v8581_v38  ;;  %v8620_v29 = vld [vmem:[%s12440_s3 + $0x3ec] ss:$20 sps:$4 sm:$0xff]   ;;  %v8623_v38 = vld [vmem:[%s12440_s3 + $0x1c4] ss:$20 sps:$4 sm:$0xff]  }
 0x22e   : > { %v9833_v21 = vpop.permute.xlu1 %8286 }
 0x22f   : > { %v8288_v37 = vunpack.i.l.bf16 %v9833_v21  ;;  %3190 = vmatpush1.bf16.msra.mxu1 %v8576_v39  ;;  %v8289_v0 = vunpack.i.h.bf16 %v9833_v21  ;;  %v8618_v39 = vld [vmem:[%s12440_s3 + $0x3e8] ss:$20 sps:$4 sm:$0xff]   ;;  %v8663_v21 = vld [vmem:[%s12440_s3 + $0x2d8] ss:$20 sps:$4 sm:$0xff]  }
 0x230   : > { %3366 = vmatpush1.bf16.msra.mxu0 %v8579_v41  ;;  %v9839_v45 = vpop.permute.xlu0 %8291  ;;  %3191 = vmatprep.subr.bf16.mxu1 %v8584_v44  ;;  %v8621_v41 = vld [vmem:[%s12440_s3 + $0x1c0] ss:$20 sps:$4 sm:$0xff]  }
 0x231   : > { %v955_v50 = vsel %vm516_vm0, %v8279_v61, %v8288_v37  ;;  %v8293_v55 = vunpack.i.l.bf16 %v9839_v45  ;;  %3367 = vmatprep.subr.bf16.mxu0 %v8587_v8  ;;  %v8294_v13 = vunpack.i.h.bf16 %v9839_v45  ;;  %v8588_v61 = vld [vmem:[%s12440_s3 + $0x320] ss:$20 sps:$4 sm:$0xff]   ;;  %v8662_v45 = vld [vmem:[%s12440_s3 + $0x504] ss:$20 sps:$4 sm:$0xff]  }
 0x232   : > { %v8297_v5 = vpop.permute.xlu1 %8296  ;;  %v989_v14 = vmax.f32 %v882_v43, %v955_v50  ;;  %v8626_v44 = vld [vmem:[%s12440_s3 + $0x414] ss:$20 sps:$4 sm:$0xff]   ;;  %v8629_v8 = vld [vmem:[%s12440_s3 + $0x1ec] ss:$20 sps:$4 sm:$0xff]  }
 0x233   : > { %v963_v16 = vsel %vm516_vm0, %v8284_v12, %v8293_v55  ;;  %v8299_v25 = vunpack.i.h.bf16 %v8297_v5  ;;  %v8298_v6 = vunpack.i.l.bf16 %v8297_v5  ;;  %3192 = vmatpush1.bf16.msra.mxu1 %v8582_v42  ;;  %v8596_v12 = vld [vmem:[%s12440_s3 + $0x34c] ss:$20 sps:$4 sm:$0xff]   ;;  %v8624_v42 = vld [vmem:[%s12440_s3 + $0x410] ss:$20 sps:$4 sm:$0xff]   ;;  %v8635_v50 = vld [vmem:[%s12440_s3 + $0x214] ss:$20 sps:$4 sm:$0xff]  }
 0x234   : > { %v998_v9 = vmax.f32 %v891_v46, %v963_v16  ;;  %3368 = vmatpush1.bf16.msra.mxu0 %v8585_v47  ;;  %3193 = vmatprep.subr.bf16.mxu1 %v8590_v48  ;;  %v8627_v47 = vld [vmem:[%s12440_s3 + $0x1e8] ss:$20 sps:$4 sm:$0xff]   ;;  %v8633_v5 = vld [vmem:[%s12440_s3 + $0x210] ss:$20 sps:$4 sm:$0xff]  }
 0x235   : > { %v957_v18 = vsel %vm516_vm0, %v8289_v0, %v8298_v6  ;;  %v965_v36 = vsel %vm516_vm0, %v8294_v13, %v8299_v25  ;;  %3369 = vmatprep.subr.bf16.mxu0 %v8593_v58  ;;  %v958_v43 = vsel %vm516_vm0, %v8298_v6, %v8258_v11  ;;  %v966_v46 = vsel %vm516_vm0, %v8299_v25, %v8259_v10  ;;  %v8611_v10 = vld [vmem:[%s12440_s3 + $0x174] ss:$20 sps:$4 sm:$0xff]   ;;  %v8632_v48 = vld [vmem:[%s12440_s3 + $0x43c] ss:$20 sps:$4 sm:$0xff]   ;;  %v8630_v58 = vld [vmem:[%s12440_s3 + $0x438] ss:$20 sps:$4 sm:$0xff]  }
 0x236   : > { %v991_v34 = vmax.f32 %v884_v60, %v957_v18  ;;  %v1000_v35 = vmax.f32 %v893_v1, %v965_v36  ;;  %v9891_v15 = vpack.c.bf16 %v998_v9, %v989_v14  ;;  %v992_v11 = vmax.f32 %v885_v2, %v958_v43  ;;  %v8602_v60 = vld [vmem:[%s12440_s3 + $0x374] ss:$20 sps:$4 sm:$0xff]   ;;  %v8638_v16 = vld [vmem:[%s12440_s3 + $0x464] ss:$20 sps:$4 sm:$0xff]   ;;  %v8641_v25 = vld [vmem:[%s12440_s3 + $0x23c] ss:$20 sps:$4 sm:$0xff]  }
 0x237   : > { %3194 = vmatpush1.bf16.msra.mxu1 %v8588_v61  ;;  %v1001_v7 = vmax.f32 %v894_v3, %v966_v46  ;;  %v8603_v2 = vld [vmem:[%s12440_s3 + $0x148] ss:$20 sps:$4 sm:$0xff]   ;;  %v8636_v6 = vld [vmem:[%s12440_s3 + $0x460] ss:$20 sps:$4 sm:$0xff]   ;;  %v8639_v61 = vld [vmem:[%s12440_s3 + $0x238] ss:$20 sps:$4 sm:$0xff]  }
 0x238   : > { %3370 = vmatpush1.bf16.msra.mxu0 %v8591_v17  ;;  %3195 = vmatprep.subr.bf16.mxu1 %v8596_v12  ;;  %v9906_v53 = vpack.c.bf16 %v1000_v35, %v991_v34  ;;  %v8608_v3 = vld [vmem:[%s12440_s3 + $0x39c] ss:$20 sps:$4 sm:$0xff]   ;;  %v8644_v14 = vld [vmem:[%s12440_s3 + $0x48c] ss:$20 sps:$4 sm:$0xff]   ;;  %v8647_v9 = vld [vmem:[%s12440_s3 + $0x264] ss:$20 sps:$4 sm:$0xff]   ;;  %v964_v35 = vsel %vm516_vm0, %v8293_v55, %v8294_v13  ;;  %v956_v55 = vsel %vm516_vm0, %v8288_v37, %v8289_v0 }
 0x239   : > { %3371 = vmatprep.subr.bf16.mxu0 %v8599_v40  ;;  %v9911_v1 = vpack.c.bf16 %v1001_v7, %v992_v11  ;;  %v8642_v17 = vld [vmem:[%s12440_s3 + $0x488] ss:$20 sps:$4 sm:$0xff]   ;;  %v8645_v12 = vld [vmem:[%s12440_s3 + $0x260] ss:$20 sps:$4 sm:$0xff]   ;;  %v8648_v40 = vld [vmem:[%s12440_s3 + $0x4b0] ss:$20 sps:$4 sm:$0xff]   ;;  %v999_v13 = vmax.f32 %v892_v56, %v964_v35 }
 0x23a   : > { %v8650_v18 = vld [vmem:[%s12440_s3 + $0x4b4] ss:$20 sps:$4 sm:$0xff]   ;;  %v8653_v36 = vld [vmem:[%s12440_s3 + $0x28c] ss:$20 sps:$4 sm:$0xff]   ;;  %v8656_v46 = vld [vmem:[%s12440_s3 + $0x4dc] ss:$20 sps:$4 sm:$0xff]  }
 0x23b   : > { %3196 = vmatpush1.bf16.msra.mxu1 %v8594_v20  ;;  %v8651_v43 = vld [vmem:[%s12440_s3 + $0x288] ss:$20 sps:$4 sm:$0xff]   ;;  %v8654_v20 = vld [vmem:[%s12440_s3 + $0x4d8] ss:$20 sps:$4 sm:$0xff]   ;;  %v8657_v11 = vld [vmem:[%s12440_s3 + $0x2b0] ss:$20 sps:$4 sm:$0xff]  }
 0x23c   : > { %3372 = vmatpush1.bf16.msra.mxu0 %v8597_v52  ;;  %3197 = vmatprep.subr.bf16.mxu1 %v8602_v60  ;;  %v8659_v34 = vld [vmem:[%s12440_s3 + $0x2b4] ss:$20 sps:$4 sm:$0xff]   ;;  %v8665_v7 = vld [vmem:[%s12440_s3 + $0x2dc] ss:$20 sps:$4 sm:$0xff]   ;;  %v990_v60 = vmax.f32 %v883_v59, %v956_v55  ;;  %v8671_v37 = vld [vmem:[%s12440_s3 + $0x304] ss:$20 sps:$4 sm:$0xff]  }
 0x23d   : > { %3373 = vmatprep.subr.bf16.mxu0 %v8605_v57  ;;  %v8660_v52 = vld [vmem:[%s12440_s3 + $0x500] ss:$20 sps:$4 sm:$0xff]   ;;  %v8726_v35 = vld [vmem:[%s12440_s3 + $0x6b8] ss:$20 sps:$4 sm:$0xff]  }
 0x23e   : > { %v10058_v56 = vpack.c.bf16 %v999_v13, %v990_v60  ;;  %v8669_v59 = vld [vmem:[%s12440_s3 + $0x300] ss:$20 sps:$4 sm:$0xff]   ;;  %v8735_v13 = vld [vmem:[%s12440_s3 + $0x4b8] ss:$20 sps:$4 sm:$0xff]   ;;  %v8738_v60 = vld [vmem:[%s12440_s3 + $0x708] ss:$20 sps:$4 sm:$0xff]  }
 0x23f   : > { %3198 = vmatpush1.bf16.msra.mxu1 %v8600_v63  ;;  %v8674_v0 = vld [vmem:[%s12440_s3 + $0x554] ss:$20 sps:$4 sm:$0xff]   ;;  %v8677_v57 = vld [vmem:[%s12440_s3 + $0x32c] ss:$20 sps:$4 sm:$0xff]   ;;  %v8672_v63 = vld [vmem:[%s12440_s3 + $0x550] ss:$20 sps:$4 sm:$0xff]  }
 0x240   : > { %3374 = vmatpush1.bf16.msra.mxu0 %v8603_v2  ;;  %3199 = vmatprep.subr.bf16.mxu1 %v8608_v3  ;;  %v8675_v2 = vld [vmem:[%s12440_s3 + $0x328] ss:$20 sps:$4 sm:$0xff]   ;;  %v8732_v55 = vld [vmem:[%s12440_s3 + $0x6e0] ss:$20 sps:$4 sm:$0xff]  }
 0x241   : > { %3375 = vmatprep.subr.bf16.mxu0 %v8611_v10  ;;  %v8680_v3 = vld [vmem:[%s12440_s3 + $0x57c] ss:$20 sps:$4 sm:$0xff]   ;;  %v8683_v10 = vld [vmem:[%s12440_s3 + $0x354] ss:$20 sps:$4 sm:$0xff]  }
 0x243   : > { %3200 = vmatpush1.bf16.msra.mxu1 %v8606_v24  ;;  %v8678_v24 = vld [vmem:[%s12440_s3 + $0x578] ss:$20 sps:$4 sm:$0xff]  }
 0x244   : > { %3376 = vmatpush1.bf16.msra.mxu0 %v8609_v31  ;;  %3201 = vmatprep.subr.bf16.mxu1 %v8614_v27  ;;  %v8681_v31 = vld [vmem:[%s12440_s3 + $0x350] ss:$20 sps:$4 sm:$0xff]  }
 0x245   : > { %3377 = vmatprep.subr.bf16.mxu0 %v8617_v22  ;;  %v8686_v27 = vld [vmem:[%s12440_s3 + $0x5a4] ss:$20 sps:$4 sm:$0xff]   ;;  %v8689_v22 = vld [vmem:[%s12440_s3 + $0x37c] ss:$20 sps:$4 sm:$0xff]  }
 0x247   : > { %3202 = vmatpush1.bf16.msra.mxu1 %v8612_v32  ;;  %v8684_v32 = vld [vmem:[%s12440_s3 + $0x5a0] ss:$20 sps:$4 sm:$0xff]  }
 0x248   : > { %3378 = vmatpush1.bf16.msra.mxu0 %v8615_v28  ;;  %3203 = vmatprep.subr.bf16.mxu1 %v8620_v29  ;;  %v8687_v28 = vld [vmem:[%s12440_s3 + $0x378] ss:$20 sps:$4 sm:$0xff]  }
 0x249   : > { %3379 = vmatprep.subr.bf16.mxu0 %v8623_v38  ;;  %v8692_v29 = vld [vmem:[%s12440_s3 + $0x5cc] ss:$20 sps:$4 sm:$0xff]   ;;  %v8695_v38 = vld [vmem:[%s12440_s3 + $0x3a4] ss:$20 sps:$4 sm:$0xff]  }
 0x24b   : > { %3204 = vmatpush1.bf16.msra.mxu1 %v8618_v39  ;;  %v8690_v39 = vld [vmem:[%s12440_s3 + $0x5c8] ss:$20 sps:$4 sm:$0xff]  }
 0x24c   : > { %3380 = vmatpush1.bf16.msra.mxu0 %v8621_v41  ;;  %3205 = vmatprep.subr.bf16.mxu1 %v8626_v44  ;;  %v8693_v41 = vld [vmem:[%s12440_s3 + $0x3a0] ss:$20 sps:$4 sm:$0xff]  }
 0x24d   : > { %3381 = vmatprep.subr.bf16.mxu0 %v8629_v8  ;;  %v8698_v44 = vld [vmem:[%s12440_s3 + $0x5f4] ss:$20 sps:$4 sm:$0xff]   ;;  %v8701_v8 = vld [vmem:[%s12440_s3 + $0x3cc] ss:$20 sps:$4 sm:$0xff]  }
 0x24f   : > { %3206 = vmatpush1.bf16.msra.mxu1 %v8624_v42  ;;  %v8696_v42 = vld [vmem:[%s12440_s3 + $0x5f0] ss:$20 sps:$4 sm:$0xff]  }
 0x250   : > { %3382 = vmatpush1.bf16.msra.mxu0 %v8627_v47  ;;  %3207 = vmatprep.subr.bf16.mxu1 %v8632_v48  ;;  %v8699_v47 = vld [vmem:[%s12440_s3 + $0x3c8] ss:$20 sps:$4 sm:$0xff]  }
 0x251   : > { %3383 = vmatprep.subr.bf16.mxu0 %v8635_v50  ;;  %v8704_v48 = vld [vmem:[%s12440_s3 + $0x61c] ss:$20 sps:$4 sm:$0xff]   ;;  %v8707_v50 = vld [vmem:[%s12440_s3 + $0x3f4] ss:$20 sps:$4 sm:$0xff]  }
 0x253   : > { %3208 = vmatpush1.bf16.msra.mxu1 %v8630_v58  ;;  %v8702_v58 = vld [vmem:[%s12440_s3 + $0x618] ss:$20 sps:$4 sm:$0xff]  }
 0x254   : > { %3384 = vmatpush1.bf16.msra.mxu0 %v8633_v5  ;;  %3209 = vmatprep.subr.bf16.mxu1 %v8638_v16  ;;  %v8705_v5 = vld [vmem:[%s12440_s3 + $0x3f0] ss:$20 sps:$4 sm:$0xff]  }
 0x255   : > { %3385 = vmatprep.subr.bf16.mxu0 %v8641_v25  ;;  %v8710_v16 = vld [vmem:[%s12440_s3 + $0x644] ss:$20 sps:$4 sm:$0xff]   ;;  %v8713_v25 = vld [vmem:[%s12440_s3 + $0x41c] ss:$20 sps:$4 sm:$0xff]  }
 0x257   : > { %3210 = vmatpush1.bf16.msra.mxu1 %v8636_v6  ;;  %v8708_v6 = vld [vmem:[%s12440_s3 + $0x640] ss:$20 sps:$4 sm:$0xff]  }
 0x258   : > { %3386 = vmatpush1.bf16.msra.mxu0 %v8639_v61  ;;  %3211 = vmatprep.subr.bf16.mxu1 %v8644_v14  ;;  %v8711_v61 = vld [vmem:[%s12440_s3 + $0x418] ss:$20 sps:$4 sm:$0xff]  }
 0x259   : > { %3387 = vmatprep.subr.bf16.mxu0 %v8647_v9  ;;  %v8716_v14 = vld [vmem:[%s12440_s3 + $0x66c] ss:$20 sps:$4 sm:$0xff]   ;;  %v8719_v9 = vld [vmem:[%s12440_s3 + $0x444] ss:$20 sps:$4 sm:$0xff]  }
 0x25b   : > { %3212 = vmatpush1.bf16.msra.mxu1 %v8642_v17  ;;  %v8714_v17 = vld [vmem:[%s12440_s3 + $0x668] ss:$20 sps:$4 sm:$0xff]  }
 0x25c   : > { %3388 = vmatpush1.bf16.msra.mxu0 %v8645_v12  ;;  %3213 = vmatprep.subr.bf16.mxu1 %v8650_v18  ;;  %v8717_v12 = vld [vmem:[%s12440_s3 + $0x440] ss:$20 sps:$4 sm:$0xff]  }
 0x25d   : > { %3400 = vmatprep.subr.bf16.mxu0 %v8653_v36  ;;  %v8722_v18 = vld [vmem:[%s12440_s3 + $0x694] ss:$20 sps:$4 sm:$0xff]   ;;  %v8725_v36 = vld [vmem:[%s12440_s3 + $0x46c] ss:$20 sps:$4 sm:$0xff]  }
 0x25f   : > { %3214 = vmatpush1.bf16.msra.mxu1 %v8648_v40  ;;  %3390 = vmatmul.mubr.bf16.vlgmr.msra.gmra.mrb[16].mxu0 %v9781_v19  ;;  %v8720_v40 = vld [vmem:[%s12440_s3 + $0x690] ss:$20 sps:$4 sm:$0xff]  }
 0x260   : > { %3401 = vmatpush1.bf16.msra.mxu0 %v8651_v43  ;;  %3432 = vmatprep.mubr.bf16.mxu0 %v9807_v23  ;;  %v8723_v43 = vld [vmem:[%s12440_s3 + $0x468] ss:$20 sps:$4 sm:$0xff]  }
 0x261   : > { %3215 = vmatprep.subr.bf16.mxu1 %v8656_v46  ;;  %3402 = vmatprep.subr.bf16.mxu0 %v8659_v34  ;;  %v8728_v46 = vld [vmem:[%s12440_s3 + $0x6bc] ss:$20 sps:$4 sm:$0xff]   ;;  %v8731_v34 = vld [vmem:[%s12440_s3 + $0x494] ss:$20 sps:$4 sm:$0xff]  }
 0x263   : > { %3216 = vmatpush1.bf16.msra.mxu1 %v8654_v20  ;;  %v8729_v20 = vld [vmem:[%s12440_s3 + $0x490] ss:$20 sps:$4 sm:$0xff]  }
 0x264   : > { %3403 = vmatpush1.bf16.msra.mxu0 %v8657_v11  ;;  %3228 = vmatprep.subr.bf16.mxu1 %v8662_v45  ;;  %v8734_v11 = vld [vmem:[%s12440_s3 + $0x6e4] ss:$20 sps:$4 sm:$0xff]   ;;  %v8737_v45 = vld [vmem:[%s12440_s3 + $0x4bc] ss:$20 sps:$4 sm:$0xff]  }
 0x265   : > { %3404 = vmatprep.subr.bf16.mxu0 %v8665_v7  ;;  %v8740_v7 = vld [vmem:[%s12440_s3 + $0x70c] ss:$20 sps:$4 sm:$0xff]  }
 0x266   : > { %3218 = vmatmul.mubr.bf16.vlgmr.msra.gmra.mrb[8].mxu1 %v9815_v30 }
 0x267   : > { %3229 = vmatpush1.bf16.msra.mxu1 %v8660_v52  ;;  %3260 = vmatprep.mubr.bf16.mxu1 %v10058_v56  ;;  %v8743_v52 = vld [vmem:[%s12440_s3 + $0x4e4] ss:$20 sps:$4 sm:$0xff]  }
 0x268   : > { %3405 = vmatpush1.bf16.msra.mxu0 %v8663_v21  ;;  %3230 = vmatprep.subr.bf16.mxu1 %v8668_v51  ;;  %v8741_v21 = vld [vmem:[%s12440_s3 + $0x4e0] ss:$20 sps:$4 sm:$0xff]  }
 0x269   : > { %3406 = vmatprep.subr.bf16.mxu0 %v8671_v37  ;;  %v8746_v51 = vld [vmem:[%s12440_s3 + $0x734] ss:$20 sps:$4 sm:$0xff]   ;;  %v8749_v37 = vld [vmem:[%s12440_s3 + $0x50c] ss:$20 sps:$4 sm:$0xff]  }
 0x26b   : > { %3231 = vmatpush1.bf16.msra.mxu1 %v8666_v49  ;;  %v8744_v49 = vld [vmem:[%s12440_s3 + $0x730] ss:$20 sps:$4 sm:$0xff]  }
 0x26c   : > { %3407 = vmatpush1.bf16.msra.mxu0 %v8669_v59  ;;  %3232 = vmatprep.subr.bf16.mxu1 %v8674_v0  ;;  %v8747_v59 = vld [vmem:[%s12440_s3 + $0x508] ss:$20 sps:$4 sm:$0xff]  }
 0x26d   : > { %3408 = vmatprep.subr.bf16.mxu0 %v8677_v57  ;;  %v8752_v0 = vld [vmem:[%s12440_s3 + $0x75c] ss:$20 sps:$4 sm:$0xff]   ;;  %v8755_v57 = vld [vmem:[%s12440_s3 + $0x534] ss:$20 sps:$4 sm:$0xff]  }
 0x26f   : > { %3233 = vmatpush1.bf16.msra.mxu1 %v8672_v63  ;;  %v8750_v63 = vld [vmem:[%s12440_s3 + $0x758] ss:$20 sps:$4 sm:$0xff]  }
 0x270   : > { %3409 = vmatpush1.bf16.msra.mxu0 %v8675_v2  ;;  %3234 = vmatprep.subr.bf16.mxu1 %v8680_v3  ;;  %v8753_v2 = vld [vmem:[%s12440_s3 + $0x530] ss:$20 sps:$4 sm:$0xff]  }
 0x271   : > { %3410 = vmatprep.subr.bf16.mxu0 %v8683_v10  ;;  %v8758_v3 = vld [vmem:[%s12440_s3 + $0x784] ss:$20 sps:$4 sm:$0xff]   ;;  %v8761_v10 = vld [vmem:[%s12440_s3 + $0x55c] ss:$20 sps:$4 sm:$0xff]  }
 0x273   : > { %3235 = vmatpush1.bf16.msra.mxu1 %v8678_v24  ;;  %v8756_v24 = vld [vmem:[%s12440_s3 + $0x780] ss:$20 sps:$4 sm:$0xff]  }
 0x274   : > { %3411 = vmatpush1.bf16.msra.mxu0 %v8681_v31  ;;  %3236 = vmatprep.subr.bf16.mxu1 %v8686_v27  ;;  %v8759_v31 = vld [vmem:[%s12440_s3 + $0x558] ss:$20 sps:$4 sm:$0xff]  }
 0x275   : > { %3412 = vmatprep.subr.bf16.mxu0 %v8689_v22  ;;  %v8764_v27 = vld [vmem:[%s12440_s3 + $0x7ac] ss:$20 sps:$4 sm:$0xff]   ;;  %v8767_v22 = vld [vmem:[%s12440_s3 + $0x584] ss:$20 sps:$4 sm:$0xff]  }
 0x277   : > { %3237 = vmatpush1.bf16.msra.mxu1 %v8684_v32  ;;  %v8762_v32 = vld [vmem:[%s12440_s3 + $0x7a8] ss:$20 sps:$4 sm:$0xff]  }
 0x278   : > { %3413 = vmatpush1.bf16.msra.mxu0 %v8687_v28  ;;  %3238 = vmatprep.subr.bf16.mxu1 %v8692_v29  ;;  %v8765_v28 = vld [vmem:[%s12440_s3 + $0x580] ss:$20 sps:$4 sm:$0xff]  }
 0x279   : > { %3414 = vmatprep.subr.bf16.mxu0 %v8695_v38  ;;  %v8770_v29 = vld [vmem:[%s12440_s3 + $0x7d4] ss:$20 sps:$4 sm:$0xff]   ;;  %v8773_v38 = vld [vmem:[%s12440_s3 + $0x5ac] ss:$20 sps:$4 sm:$0xff]  }
 0x27b   : > { %3239 = vmatpush1.bf16.msra.mxu1 %v8690_v39  ;;  %v8768_v39 = vld [vmem:[%s12440_s3 + $0x7d0] ss:$20 sps:$4 sm:$0xff]  }
 0x27c   : > { %3415 = vmatpush1.bf16.msra.mxu0 %v8693_v41  ;;  %3240 = vmatprep.subr.bf16.mxu1 %v8698_v44  ;;  %v8771_v41 = vld [vmem:[%s12440_s3 + $0x5a8] ss:$20 sps:$4 sm:$0xff]  }
 0x27d   : > { %3416 = vmatprep.subr.bf16.mxu0 %v8701_v8  ;;  %v8776_v44 = vld [vmem:[%s12440_s3 + $0x7fc] ss:$20 sps:$4 sm:$0xff]   ;;  %v8779_v8 = vld [vmem:[%s12440_s3 + $0x5d4] ss:$20 sps:$4 sm:$0xff]  }
 0x27f   : > { %3241 = vmatpush1.bf16.msra.mxu1 %v8696_v42  ;;  %v8774_v42 = vld [vmem:[%s12440_s3 + $0x7f8] ss:$20 sps:$4 sm:$0xff]  }
 0x280   : > { %3417 = vmatpush1.bf16.msra.mxu0 %v8699_v47  ;;  %3242 = vmatprep.subr.bf16.mxu1 %v8704_v48  ;;  %v8777_v47 = vld [vmem:[%s12440_s3 + $0x5d0] ss:$20 sps:$4 sm:$0xff]  }
 0x281   : > { %3418 = vmatprep.subr.bf16.mxu0 %v8707_v50  ;;  %v8782_v48 = vld [vmem:[%s12440_s3 + $0x824] ss:$20 sps:$4 sm:$0xff]   ;;  %v8785_v50 = vld [vmem:[%s12440_s3 + $0x5fc] ss:$20 sps:$4 sm:$0xff]  }
 0x283   : > { %3243 = vmatpush1.bf16.msra.mxu1 %v8702_v58  ;;  %v8780_v58 = vld [vmem:[%s12440_s3 + $0x820] ss:$20 sps:$4 sm:$0xff]  }
 0x284   : > { %3419 = vmatpush1.bf16.msra.mxu0 %v8705_v5  ;;  %3244 = vmatprep.subr.bf16.mxu1 %v8710_v16  ;;  %v8783_v5 = vld [vmem:[%s12440_s3 + $0x5f8] ss:$20 sps:$4 sm:$0xff]  }
 0x285   : > { %3420 = vmatprep.subr.bf16.mxu0 %v8713_v25  ;;  %v8788_v16 = vld [vmem:[%s12440_s3 + $0x84c] ss:$20 sps:$4 sm:$0xff]   ;;  %v8791_v25 = vld [vmem:[%s12440_s3 + $0x624] ss:$20 sps:$4 sm:$0xff]  }
 0x287   : > { %3245 = vmatpush1.bf16.msra.mxu1 %v8708_v6  ;;  %v8786_v6 = vld [vmem:[%s12440_s3 + $0x848] ss:$20 sps:$4 sm:$0xff]  }
 0x288   : > { %3421 = vmatpush1.bf16.msra.mxu0 %v8711_v61  ;;  %3246 = vmatprep.subr.bf16.mxu1 %v8716_v14  ;;  %v8789_v61 = vld [vmem:[%s12440_s3 + $0x620] ss:$20 sps:$4 sm:$0xff]  }
 0x289   : > { %3422 = vmatprep.subr.bf16.mxu0 %v8719_v9  ;;  %v8794_v14 = vld [vmem:[%s12440_s3 + $0x874] ss:$20 sps:$4 sm:$0xff]   ;;  %v8797_v9 = vld [vmem:[%s12440_s3 + $0x64c] ss:$20 sps:$4 sm:$0xff]  }
 0x28b   : > { %3247 = vmatpush1.bf16.msra.mxu1 %v8714_v17  ;;  %v8792_v17 = vld [vmem:[%s12440_s3 + $0x870] ss:$20 sps:$4 sm:$0xff]  }
 0x28c   : > { %3423 = vmatpush1.bf16.msra.mxu0 %v8717_v12  ;;  %3248 = vmatprep.subr.bf16.mxu1 %v8722_v18  ;;  %v8795_v12 = vld [vmem:[%s12440_s3 + $0x648] ss:$20 sps:$4 sm:$0xff]  }
 0x28d   : > { %3424 = vmatprep.subr.bf16.mxu0 %v8725_v36  ;;  %v8800_v18 = vld [vmem:[%s12440_s3 + $0x89c] ss:$20 sps:$4 sm:$0xff]   ;;  %v8803_v36 = vld [vmem:[%s12440_s3 + $0x674] ss:$20 sps:$4 sm:$0xff]  }
 0x28f   : > { %3249 = vmatpush1.bf16.msra.mxu1 %v8720_v40  ;;  %v8798_v40 = vld [vmem:[%s12440_s3 + $0x898] ss:$20 sps:$4 sm:$0xff]  }
 0x290   : > { %3425 = vmatpush1.bf16.msra.mxu0 %v8723_v43  ;;  %3250 = vmatprep.subr.bf16.mxu1 %v8728_v46  ;;  %v8801_v43 = vld [vmem:[%s12440_s3 + $0x670] ss:$20 sps:$4 sm:$0xff]  }
 0x291   : > { %3426 = vmatprep.subr.bf16.mxu0 %v8731_v34  ;;  %v8806_v46 = vld [vmem:[%s12440_s3 + $0x8c4] ss:$20 sps:$4 sm:$0xff]   ;;  %v8809_v34 = vld [vmem:[%s12440_s3 + $0x69c] ss:$20 sps:$4 sm:$0xff]  }
 0x293   : > { %3251 = vmatpush1.bf16.msra.mxu1 %v8726_v35  ;;  %v8804_v35 = vld [vmem:[%s12440_s3 + $0x8c0] ss:$20 sps:$4 sm:$0xff]  }
 0x294   : > { %3427 = vmatpush1.bf16.msra.mxu0 %v8729_v20  ;;  %3252 = vmatprep.subr.bf16.mxu1 %v8734_v11  ;;  %v8807_v20 = vld [vmem:[%s12440_s3 + $0x698] ss:$20 sps:$4 sm:$0xff]  }
 0x295   : > { %3428 = vmatprep.subr.bf16.mxu0 %v8737_v45  ;;  %v8812_v11 = vld [vmem:[%s12440_s3 + $0x8ec] ss:$20 sps:$4 sm:$0xff]   ;;  %v8815_v45 = vld [vmem:[%s12440_s3 + $0x6c4] ss:$20 sps:$4 sm:$0xff]  }
 0x297   : > { %3253 = vmatpush1.bf16.msra.mxu1 %v8732_v55  ;;  %v8810_v55 = vld [vmem:[%s12440_s3 + $0x8e8] ss:$20 sps:$4 sm:$0xff]  }
 0x298   : > { %3429 = vmatpush1.bf16.msra.mxu0 %v8735_v13  ;;  %3254 = vmatprep.subr.bf16.mxu1 %v8740_v7  ;;  %v8813_v13 = vld [vmem:[%s12440_s3 + $0x6c0] ss:$20 sps:$4 sm:$0xff]  }
 0x299   : > { %3430 = vmatprep.subr.bf16.mxu0 %v8743_v52  ;;  %v8818_v7 = vld [vmem:[%s12440_s3 + $0x914] ss:$20 sps:$4 sm:$0xff]   ;;  %v8821_v52 = vld [vmem:[%s12440_s3 + $0x6ec] ss:$20 sps:$4 sm:$0xff]  }
 0x29b   : > { %3255 = vmatpush1.bf16.msra.mxu1 %v8738_v60  ;;  %v8816_v60 = vld [vmem:[%s12440_s3 + $0x910] ss:$20 sps:$4 sm:$0xff]  }
 0x29c   : > { %3431 = vmatpush1.bf16.msra.mxu0 %v8741_v21  ;;  %3256 = vmatprep.subr.bf16.mxu1 %v8746_v51  ;;  %v8819_v21 = vld [vmem:[%s12440_s3 + $0x6e8] ss:$20 sps:$4 sm:$0xff]  }
 0x29d   : > { %3443 = vmatprep.subr.bf16.mxu0 %v8749_v37  ;;  %v8824_v51 = vld [vmem:[%s12440_s3 + $0x93c] ss:$20 sps:$4 sm:$0xff]   ;;  %v8827_v37 = vld [vmem:[%s12440_s3 + $0x714] ss:$20 sps:$4 sm:$0xff]  }
 0x29f   : > { %3257 = vmatpush1.bf16.msra.mxu1 %v8744_v49  ;;  %3433 = vmatmul.mubr.bf16.vlgmr.msra.gmra.mrb[16].mxu0 %v9815_v30  ;;  %v8822_v49 = vld [vmem:[%s12440_s3 + $0x938] ss:$20 sps:$4 sm:$0xff]  }
 0x2a0   : > { %3444 = vmatpush1.bf16.msra.mxu0 %v8747_v59  ;;  %3475 = vmatprep.mubr.bf16.mxu0 %v10058_v56  ;;  %v8825_v59 = vld [vmem:[%s12440_s3 + $0x710] ss:$20 sps:$4 sm:$0xff]  }
 0x2a1   : > { %3258 = vmatprep.subr.bf16.mxu1 %v8752_v0  ;;  %3445 = vmatprep.subr.bf16.mxu0 %v8755_v57  ;;  %v8830_v0 = vld [vmem:[%s12440_s3 + $0x964] ss:$20 sps:$4 sm:$0xff]   ;;  %v8833_v57 = vld [vmem:[%s12440_s3 + $0x73c] ss:$20 sps:$4 sm:$0xff]  }
 0x2a3   : > { %3259 = vmatpush1.bf16.msra.mxu1 %v8750_v63  ;;  %v8828_v63 = vld [vmem:[%s12440_s3 + $0x960] ss:$20 sps:$4 sm:$0xff]  }
 0x2a4   : > { %3446 = vmatpush1.bf16.msra.mxu0 %v8753_v2  ;;  %3271 = vmatprep.subr.bf16.mxu1 %v8758_v3  ;;  %v8831_v2 = vld [vmem:[%s12440_s3 + $0x738] ss:$20 sps:$4 sm:$0xff]  }
 0x2a5   : > { %3447 = vmatprep.subr.bf16.mxu0 %v8761_v10  ;;  %v8836_v3 = vld [vmem:[%s12440_s3 + $0x98c] ss:$20 sps:$4 sm:$0xff]   ;;  %v8839_v10 = vld [vmem:[%s12440_s3 + $0x764] ss:$20 sps:$4 sm:$0xff]  }
 0x2a6   : > { %3261 = vmatmul.mubr.bf16.vlgmr.msra.gmra.mrb[8].mxu1 %v9891_v15 }
 0x2a7   : > { %3272 = vmatpush1.bf16.msra.mxu1 %v8756_v24  ;;  %3303 = vmatprep.mubr.bf16.mxu1 %v9911_v1  ;;  %v8834_v24 = vld [vmem:[%s12440_s3 + $0x988] ss:$20 sps:$4 sm:$0xff]  }
 0x2a8   : > { %3448 = vmatpush1.bf16.msra.mxu0 %v8759_v31  ;;  %3273 = vmatprep.subr.bf16.mxu1 %v8764_v27  ;;  %v8837_v31 = vld [vmem:[%s12440_s3 + $0x760] ss:$20 sps:$4 sm:$0xff]  }
 0x2a9   : > { %3449 = vmatprep.subr.bf16.mxu0 %v8767_v22  ;;  %v8842_v27 = vld [vmem:[%s12440_s3 + $0x9b4] ss:$20 sps:$4 sm:$0xff]   ;;  %v8845_v22 = vld [vmem:[%s12440_s3 + $0x78c] ss:$20 sps:$4 sm:$0xff]  }
 0x2ab   : > { %3274 = vmatpush1.bf16.msra.mxu1 %v8762_v32  ;;  %v8840_v32 = vld [vmem:[%s12440_s3 + $0x9b0] ss:$20 sps:$4 sm:$0xff]  }
 0x2ac   : > { %3450 = vmatpush1.bf16.msra.mxu0 %v8765_v28  ;;  %3275 = vmatprep.subr.bf16.mxu1 %v8770_v29  ;;  %v8843_v28 = vld [vmem:[%s12440_s3 + $0x788] ss:$20 sps:$4 sm:$0xff]  }
 0x2ad   : > { %3451 = vmatprep.subr.bf16.mxu0 %v8773_v38  ;;  %v8848_v29 = vld [vmem:[%s12440_s3 + $0x9dc] ss:$20 sps:$4 sm:$0xff]   ;;  %v8851_v38 = vld [vmem:[%s12440_s3 + $0x7b4] ss:$20 sps:$4 sm:$0xff]  }
 0x2af   : > { %3276 = vmatpush1.bf16.msra.mxu1 %v8768_v39  ;;  %v8846_v39 = vld [vmem:[%s12440_s3 + $0x9d8] ss:$20 sps:$4 sm:$0xff]  }
 0x2b0   : > { %3452 = vmatpush1.bf16.msra.mxu0 %v8771_v41  ;;  %3277 = vmatprep.subr.bf16.mxu1 %v8776_v44  ;;  %v8849_v41 = vld [vmem:[%s12440_s3 + $0x7b0] ss:$20 sps:$4 sm:$0xff]  }
 0x2b1   : > { %3453 = vmatprep.subr.bf16.mxu0 %v8779_v8  ;;  %v8852_v44 = vld [vmem:[%s12440_s3 + $0x150] ss:$20 sps:$4 sm:$0xff]  }
 0x2b2   : > { %v8855_v8 = vld [vmem:[%s12440_s3 + $0x7dc] ss:$20 sps:$4 sm:$0xff]  }
 0x2b3   : > { %3278 = vmatpush1.bf16.msra.mxu1 %v8774_v42  ;;  %v8856_v42 = vld [vmem:[%s12440_s3 + $0x10] ss:$20 sps:$4 sm:$0xff]  }
 0x2b4   : > { %3454 = vmatpush1.bf16.msra.mxu0 %v8777_v47  ;;  %3279 = vmatprep.subr.bf16.mxu1 %v8782_v48  ;;  %v8853_v47 = vld [vmem:[%s12440_s3 + $0x7d8] ss:$20 sps:$4 sm:$0xff]  }
 0x2b5   : > { %3455 = vmatprep.subr.bf16.mxu0 %v8785_v50  ;;  %v8857_v48 = vld [vmem:[%s12440_s3 + $0x178] ss:$20 sps:$4 sm:$0xff]  }
 0x2b6   : > { %v8860_v50 = vld [vmem:[%s12440_s3 + $0x804] ss:$20 sps:$4 sm:$0xff]  }
 0x2b7   : > { %3280 = vmatpush1.bf16.msra.mxu1 %v8780_v58  ;;  %v8861_v58 = vld [vmem:[%s12440_s3 + $0x38] ss:$20 sps:$4 sm:$0xff]  }
 0x2b8   : > { %3456 = vmatpush1.bf16.msra.mxu0 %v8783_v5  ;;  %3281 = vmatprep.subr.bf16.mxu1 %v8788_v16  ;;  %v8858_v5 = vld [vmem:[%s12440_s3 + $0x800] ss:$20 sps:$4 sm:$0xff]  }
 0x2b9   : > { %3457 = vmatprep.subr.bf16.mxu0 %v8791_v25  ;;  %v8862_v16 = vld [vmem:[%s12440_s3 + $0x1a0] ss:$20 sps:$4 sm:$0xff]  }
 0x2ba   : > { %v8865_v25 = vld [vmem:[%s12440_s3 + $0x82c] ss:$20 sps:$4 sm:$0xff]  }
 0x2bb   : > { %3282 = vmatpush1.bf16.msra.mxu1 %v8786_v6  ;;  %v8863_v6 = vld [vmem:[%s12440_s3 + $0x828] ss:$20 sps:$4 sm:$0xff]  }
 0x2bc   : > { %3458 = vmatpush1.bf16.msra.mxu0 %v8789_v61  ;;  %3283 = vmatprep.subr.bf16.mxu1 %v8794_v14  ;;  %v8867_v61 = vld [vmem:[%s12440_s3 + $0x1c8] ss:$20 sps:$4 sm:$0xff]  }
 0x2bd   : > { %3459 = vmatprep.subr.bf16.mxu0 %v8797_v9  ;;  %v8870_v14 = vld [vmem:[%s12440_s3 + $0x854] ss:$20 sps:$4 sm:$0xff]  }
 0x2be   : > { %v8871_v9 = vld [vmem:[%s12440_s3 + $0x88] ss:$20 sps:$4 sm:$0xff]  }
 0x2bf   : > { %3284 = vmatpush1.bf16.msra.mxu1 %v8792_v17  ;;  %v8868_v17 = vld [vmem:[%s12440_s3 + $0x850] ss:$20 sps:$4 sm:$0xff]  }
 0x2c0   : > { %3460 = vmatpush1.bf16.msra.mxu0 %v8795_v12  ;;  %3285 = vmatprep.subr.bf16.mxu1 %v8800_v18  ;;  %v8872_v12 = vld [vmem:[%s12440_s3 + $0x1f0] ss:$20 sps:$4 sm:$0xff]  }
 0x2c1   : > { %3461 = vmatprep.subr.bf16.mxu0 %v8803_v36  ;;  %v8875_v18 = vld [vmem:[%s12440_s3 + $0x87c] ss:$20 sps:$4 sm:$0xff]  }
 0x2c3   : > { %3286 = vmatpush1.bf16.msra.mxu1 %v8798_v40 }
 0x2c4   : > { %3462 = vmatpush1.bf16.msra.mxu0 %v8801_v43  ;;  %3287 = vmatprep.subr.bf16.mxu1 %v8806_v46  ;;  %v8876_v43 = vld [vmem:[%s12440_s3 + $0xb0] ss:$20 sps:$4 sm:$0xff]  }
 0x2c5   : > { %3463 = vmatprep.subr.bf16.mxu0 %v8809_v34  ;;  %v8873_v34 = vld [vmem:[%s12440_s3 + $0x878] ss:$20 sps:$4 sm:$0xff]  }
 0x2c7   : > { %3288 = vmatpush1.bf16.msra.mxu1 %v8804_v35  ;;  %v8877_v35 = vld [vmem:[%s12440_s3 + $0x218] ss:$20 sps:$4 sm:$0xff]  }
 0x2c8   : > { %3464 = vmatpush1.bf16.msra.mxu0 %v8807_v20  ;;  %3289 = vmatprep.subr.bf16.mxu1 %v8812_v11  ;;  %v8880_v11 = vld [vmem:[%s12440_s3 + $0x8a4] ss:$20 sps:$4 sm:$0xff]  }
 0x2c9   : > { %3465 = vmatprep.subr.bf16.mxu0 %v8815_v45  ;;  %v8881_v45 = vld [vmem:[%s12440_s3 + $0xd8] ss:$20 sps:$4 sm:$0xff]  }
 0x2cb   : > { %3290 = vmatpush1.bf16.msra.mxu1 %v8810_v55  ;;  %v8878_v55 = vld [vmem:[%s12440_s3 + $0x8a0] ss:$20 sps:$4 sm:$0xff]  }
 0x2cc   : > { %3466 = vmatpush1.bf16.msra.mxu0 %v8813_v13  ;;  %3291 = vmatprep.subr.bf16.mxu1 %v8818_v7  ;;  %v8882_v13 = vld [vmem:[%s12440_s3 + $0x240] ss:$20 sps:$4 sm:$0xff]  }
 0x2cd   : > { %3467 = vmatprep.subr.bf16.mxu0 %v8821_v52  ;;  %v8885_v7 = vld [vmem:[%s12440_s3 + $0x8cc] ss:$20 sps:$4 sm:$0xff]  }
 0x2ce   : > { %v8886_v52 = vld [vmem:[%s12440_s3 + $0x100] ss:$20 sps:$4 sm:$0xff]  }
 0x2cf   : > { %3292 = vmatpush1.bf16.msra.mxu1 %v8816_v60  ;;  %v8883_v60 = vld [vmem:[%s12440_s3 + $0x8c8] ss:$20 sps:$4 sm:$0xff]  }
 0x2d0   : > { %3468 = vmatpush1.bf16.msra.mxu0 %v8819_v21  ;;  %3293 = vmatprep.subr.bf16.mxu1 %v8824_v51  ;;  %v8887_v21 = vld [vmem:[%s12440_s3 + $0x268] ss:$20 sps:$4 sm:$0xff]  }
 0x2d1   : > { %3469 = vmatprep.subr.bf16.mxu0 %v8827_v37  ;;  %v8890_v51 = vld [vmem:[%s12440_s3 + $0x8f4] ss:$20 sps:$4 sm:$0xff]  }
 0x2d2   : > { %v8891_v37 = vld [vmem:[%s12440_s3 + $0x128] ss:$20 sps:$4 sm:$0xff]  }
 0x2d3   : > { %3294 = vmatpush1.bf16.msra.mxu1 %v8822_v49  ;;  %v8888_v49 = vld [vmem:[%s12440_s3 + $0x8f0] ss:$20 sps:$4 sm:$0xff]  }
 0x2d4   : > { %3470 = vmatpush1.bf16.msra.mxu0 %v8825_v59  ;;  %3295 = vmatprep.subr.bf16.mxu1 %v8830_v0  ;;  %v8892_v59 = vld [vmem:[%s12440_s3 + $0x650] ss:$20 sps:$4 sm:$0xff]  }
 0x2d5   : > { %3471 = vmatprep.subr.bf16.mxu0 %v8833_v57  ;;  %v8895_v0 = vld [vmem:[%s12440_s3 + $0x91c] ss:$20 sps:$4 sm:$0xff]  }
 0x2d6   : > { %v8896_v57 = vld [vmem:[%s12440_s3 + $0x510] ss:$20 sps:$4 sm:$0xff]  }
 0x2d7   : > { %3296 = vmatpush1.bf16.msra.mxu1 %v8828_v63  ;;  %v8893_v63 = vld [vmem:[%s12440_s3 + $0x918] ss:$20 sps:$4 sm:$0xff]  }
 0x2d8   : > { %3472 = vmatpush1.bf16.msra.mxu0 %v8831_v2  ;;  %3297 = vmatprep.subr.bf16.mxu1 %v8836_v3  ;;  %v8897_v2 = vld [vmem:[%s12440_s3 + $0x678] ss:$20 sps:$4 sm:$0xff]  }
 0x2d9   : > { %3473 = vmatprep.subr.bf16.mxu0 %v8839_v10  ;;  %v8900_v3 = vld [vmem:[%s12440_s3 + $0x944] ss:$20 sps:$4 sm:$0xff]  }
 0x2da   : > { %v8901_v10 = vld [vmem:[%s12440_s3 + $0x538] ss:$20 sps:$4 sm:$0xff]  }
 0x2db   : > { %3298 = vmatpush1.bf16.msra.mxu1 %v8834_v24  ;;  %v8898_v24 = vld [vmem:[%s12440_s3 + $0x940] ss:$20 sps:$4 sm:$0xff]  }
 0x2dc   : > { %3474 = vmatpush1.bf16.msra.mxu0 %v8837_v31  ;;  %3299 = vmatprep.subr.bf16.mxu1 %v8842_v27  ;;  %v8902_v31 = vld [vmem:[%s12440_s3 + $0x6a0] ss:$20 sps:$4 sm:$0xff]   ;;  %v8903_v27 = vld [vmem:[%s12440_s3 + $0x968] ss:$20 sps:$4 sm:$0xff]  }
 0x2dd   : > { %3486 = vmatprep.subr.bf16.mxu0 %v8845_v22  ;;  %v8907_v22 = vld [vmem:[%s12440_s3 + $0x6c8] ss:$20 sps:$4 sm:$0xff]  }
 0x2df   : > { %3300 = vmatpush1.bf16.msra.mxu1 %v8840_v32  ;;  %3476 = vmatmul.mubr.bf16.vlgmr.msra.gmra.mrb[16].mxu0 %v9891_v15  ;;  %v8910_v32 = vld [vmem:[%s12440_s3 + $0x994] ss:$20 sps:$4 sm:$0xff]  }
 0x2e0   : > { %3487 = vmatpush1.bf16.msra.mxu0 %v8843_v28  ;;  %3518 = vmatprep.mubr.bf16.mxu0 %v9911_v1  ;;  %v8911_v28 = vld [vmem:[%s12440_s3 + $0x588] ss:$20 sps:$4 sm:$0xff]  }
 0x2e1   : > { %3301 = vmatprep.subr.bf16.mxu1 %v8848_v29  ;;  %3488 = vmatprep.subr.bf16.mxu0 %v8851_v38  ;;  %v8908_v29 = vld [vmem:[%s12440_s3 + $0x990] ss:$20 sps:$4 sm:$0xff]  }
 0x2e2   : > { %v8912_v38 = vld [vmem:[%s12440_s3 + $0x6f0] ss:$20 sps:$4 sm:$0xff]  }
 0x2e3   : > { %3302 = vmatpush1.bf16.msra.mxu1 %v8846_v39  ;;  %v8915_v39 = vld [vmem:[%s12440_s3 + $0x9bc] ss:$20 sps:$4 sm:$0xff]  }
 0x2e4   : > { %3489 = vmatpush1.bf16.msra.mxu0 %v8849_v41  ;;  %7906 = vmatprep.subr.bf16.mxu1 %v8852_v44  ;;  %v8916_v41 = vld [vmem:[%s12440_s3 + $0x5b0] ss:$20 sps:$4 sm:$0xff]   ;;  %v8913_v44 = vld [vmem:[%s12440_s3 + $0x9b8] ss:$20 sps:$4 sm:$0xff]  }
 0x2e5   : > { %3490 = vmatprep.subr.bf16.mxu0 %v8855_v8  ;;  %v8917_v8 = vld [vmem:[%s12440_s3 + $0x718] ss:$20 sps:$4 sm:$0xff]  }
 0x2e6   : > { %3304 = vmatmul.mubr.bf16.vlgmr.msra.gmra.mrb[8].mxu1 %v9906_v53 }
 0x2e7   : > { %7907 = vmatpush3.bf16.msra.mxu1 %v8856_v42  ;;  %3604 = vmatprep.mubr.bf16.mxu1 %v9773_v33  ;;  %v8866_v33 = vld [vmem:[%s12440_s3 + $0x60] ss:$20 sps:$4 sm:$0xff]   ;;  %v8920_v42 = vld [vmem:[%s12440_s3 + $0x9e4] ss:$20 sps:$4 sm:$0xff]  }
 0x2e8   : > { %3491 = vmatpush1.bf16.msra.mxu0 %v8853_v47  ;;  %7908 = vmatprep.subr.bf16.mxu1 %v8857_v48  ;;  %v8921_v47 = vld [vmem:[%s12440_s3 + $0x5d8] ss:$20 sps:$4 sm:$0xff]   ;;  %v8918_v48 = vld [vmem:[%s12440_s3 + $0x9e0] ss:$20 sps:$4 sm:$0xff]  }
 0x2e9   : > { %3492 = vmatprep.subr.bf16.mxu0 %v8860_v50  ;;  %v8922_v50 = vld [vmem:[%s12440_s3 + $0x740] ss:$20 sps:$4 sm:$0xff]  }
 0x2eb   : > { %7909 = vmatpush3.bf16.msra.mxu1 %v8861_v58  ;;  %v8925_v58 = vld [vmem:[%s12440_s3 + $0xa0c] ss:$20 sps:$4 sm:$0xff]  }
 0x2ec   : > { %3493 = vmatpush1.bf16.msra.mxu0 %v8858_v5  ;;  %7910 = vmatprep.subr.bf16.mxu1 %v8862_v16  ;;  %v8931_v5 = vld [vmem:[%s12440_s3 + $0xa34] ss:$20 sps:$4 sm:$0x3f]  }
 0x2ed   : > { %3494 = vmatprep.subr.bf16.mxu0 %v8865_v25  ;;  %v8923_v16 = vld [vmem:[%s12440_s3 + $0xa08] ss:$20 sps:$4 sm:$0xff]   ;;  %v8926_v25 = vld [vmem:[%s12440_s3 + $0x600] ss:$20 sps:$4 sm:$0xff]  }
 0x2ef   : > { %7911 = vmatpush3.bf16.msra.mxu1 %v8866_v33  ;;  %v8927_v33 = vld [vmem:[%s12440_s3 + $0x768] ss:$20 sps:$4 sm:$0xff]  }
 0x2f0   : > { %3495 = vmatpush1.bf16.msra.mxu0 %v8863_v6  ;;  %7912 = vmatprep.subr.bf16.mxu1 %v8867_v61  ;;  %v8929_v6 = vld [vmem:[%s12440_s3 + $0xa30] ss:$20 sps:$4 sm:$0x3f]   ;;  %v3137_v61 = vand.u32 %v8931_v5, %v9585_v62 }
 0x2f1   : > { %3496 = vmatprep.subr.bf16.mxu0 %v8870_v14  ;;  %v8928_v14 = vld [vmem:[%s12440_s3 + $0x628] ss:$20 sps:$4 sm:$0xff]  }
 0x2f2   : > { %v10493_v36 = vpop.f32.mrb[12].mxu0 }
 0x2f3   : > { %7913 = vmatpush3.bf16.msra.mxu1 %v8871_v9  ;;  %v10495_v40 = vpop.f32.mrb[13].mxu0  ;;  %v3134_v9 = vand.u32 %v8929_v6, %v9585_v62 }
 0x2f4   : > { %3497 = vmatpush1.bf16.msra.mxu0 %v8868_v17  ;;  %v10500_v46 = vpop.f32.mrb[14].mxu0  ;;  %7914 = vmatprep.subr.bf16.mxu1 %v8872_v12  ;;  %v8933_v17 = vld [vmem:[%s12440_s3 + $0x3d0] ss:$20 sps:$4 sm:$0xff]  }
 0x2f5   : > { %v10508_v20 = vpop.f32.mrb[15].mxu0  ;;  %3498 = vmatprep.subr.bf16.mxu0 %v8875_v18  ;;  %v8932_v12 = vld [vmem:[%s12440_s3 + $0xa10] ss:$20 sps:$4 sm:$0xff]   ;;  %v8935_v18 = vld [vmem:[%s12440_s3 + $0xa38] ss:$20 sps:$4 sm:$0x3f]  }
 0x2f7   : > { %7915 = vmatpush3.bf16.msra.mxu1 %v8876_v43  ;;  %v3140_v43 = vand.u32 %v8935_v18, %v9585_v62 }
 0x2f8   : > { %3499 = vmatpush1.bf16.msra.mxu0 %v8873_v34  ;;  %7916 = vmatprep.subr.bf16.mxu1 %v8877_v35  ;;  %v8934_v34 = vld [vmem:[%s12440_s3 + $0x290] ss:$20 sps:$4 sm:$0xff]   ;;  %v8936_v35 = vld [vmem:[%s12440_s3 + $0x3f8] ss:$20 sps:$4 sm:$0xff]  }
 0x2f9   : > { %3500 = vmatprep.subr.bf16.mxu0 %v8880_v11  ;;  %v8939_v11 = vld [vmem:[%s12440_s3 + $0x2e0] ss:$20 sps:$4 sm:$0xff]  }
 0x2fb   : > { %7917 = vmatpush3.bf16.msra.mxu1 %v8881_v45  ;;  %v8941_v45 = vld [vmem:[%s12440_s3 + $0x308] ss:$20 sps:$4 sm:$0xff]  }
 0x2fc   : > { %3501 = vmatpush1.bf16.msra.mxu0 %v8878_v55  ;;  %7918 = vmatprep.subr.bf16.mxu1 %v8882_v13  ;;  %v8943_v55 = vld [vmem:[%s12440_s3 + $0x330] ss:$20 sps:$4 sm:$0xff]   ;;  %v8944_v13 = vld [vmem:[%s12440_s3 + $0x498] ss:$20 sps:$4 sm:$0xff]  }
 0x2fd   : > { %3502 = vmatprep.subr.bf16.mxu0 %v8885_v7  ;;  %v8945_v7 = vld [vmem:[%s12440_s3 + $0x358] ss:$20 sps:$4 sm:$0xff]  }
 0x2ff   : > { %7919 = vmatpush3.bf16.msra.mxu1 %v8886_v52  ;;  %v8946_v52 = vld [vmem:[%s12440_s3 + $0x4c0] ss:$20 sps:$4 sm:$0xff]  }
 0x300   : > { %3503 = vmatpush1.bf16.msra.mxu0 %v8883_v60  ;;  %7920 = vmatprep.subr.bf16.mxu1 %v8887_v21  ;;  %v8947_v60 = vld [vmem:[%s12440_s3 + $0x380] ss:$20 sps:$4 sm:$0xff]   ;;  %v8948_v21 = vld [vmem:[%s12440_s3 + $0x4e8] ss:$20 sps:$4 sm:$0xff]  }
 0x301   : > { %3504 = vmatprep.subr.bf16.mxu0 %v8890_v51  ;;  %v8949_v51 = vld [vmem:[%s12440_s3 + $0x3a8] ss:$20 sps:$4 sm:$0xff]  }
 0x303   : > { %7921 = vmatpush3.bf16.msra.mxu1 %v8891_v37  ;;  %v8950_v37 = vld [vmem:[%s12440_s3 + $0x8d0] ss:$20 sps:$4 sm:$0xff]  }
 0x304   : > { %3505 = vmatpush1.bf16.msra.mxu0 %v8888_v49  ;;  %7950 = vmatprep.subr.bf16.mxu1 %v8892_v59  ;;  %v8951_v49 = vld [vmem:[%s12440_s3 + $0x790] ss:$20 sps:$4 sm:$0xff]   ;;  %v8952_v59 = vld [vmem:[%s12440_s3 + $0x8f8] ss:$20 sps:$4 sm:$0xff]  }
 0x305   : > { %3506 = vmatprep.subr.bf16.mxu0 %v8895_v0  ;;  %v8953_v0 = vld [vmem:[%s12440_s3 + $0x7b8] ss:$20 sps:$4 sm:$0xff]  }
 0x306   : > { %3605 = vmatmul.mubr.bf16.vlgmr.msra.gmra.mrb[12].mxu1 %v9781_v19  ;;  %v8905_v19 = vld [vmem:[%s12440_s3 + $0x96c] ss:$20 sps:$4 sm:$0xff]  }
 0x307   : > { %7951 = vmatpush3.bf16.msra.mxu1 %v8896_v57  ;;  %3686 = vmatprep.mubr.bf16.mxu1 %v10058_v56  ;;  %v8906_v56 = vld [vmem:[%s12440_s3 + $0x560] ss:$20 sps:$4 sm:$0xff]  }
 0x308   : > { %3507 = vmatpush1.bf16.msra.mxu0 %v8893_v63  ;;  %7952 = vmatprep.subr.bf16.mxu1 %v8897_v2  ;;  %v8954_v57 = vld [vmem:[%s12440_s3 + $0x920] ss:$20 sps:$4 sm:$0xff]   ;;  %v8958_v2 = vld [vmem:[%s12440_s3 + $0x970] ss:$20 sps:$4 sm:$0xff]  }
 0x309   : > { %3508 = vmatprep.subr.bf16.mxu0 %v8900_v3  ;;  %v8955_v63 = vld [vmem:[%s12440_s3 + $0x7e0] ss:$20 sps:$4 sm:$0xff]   ;;  %v8959_v3 = vld [vmem:[%s12440_s3 + $0x830] ss:$20 sps:$4 sm:$0xff]  }
 0x30b   : > { %7953 = vmatpush3.bf16.msra.mxu1 %v8901_v10  ;;  %v8960_v10 = vld [vmem:[%s12440_s3 + $0x998] ss:$20 sps:$4 sm:$0xff]  }
 0x30c   : > { %3509 = vmatpush1.bf16.msra.mxu0 %v8898_v24  ;;  %7954 = vmatprep.subr.bf16.mxu1 %v8902_v31  ;;  %v8961_v24 = vld [vmem:[%s12440_s3 + $0x858] ss:$20 sps:$4 sm:$0xff]   ;;  %v8962_v31 = vld [vmem:[%s12440_s3 + $0x9c0] ss:$20 sps:$4 sm:$0xff]  }
 0x30d   : > { %3510 = vmatprep.subr.bf16.mxu0 %v8905_v19  ;;  %v8963_v19 = vld [vmem:[%s12440_s3 + $0x880] ss:$20 sps:$4 sm:$0xff]  }
 0x30f   : > { %7955 = vmatpush3.bf16.msra.mxu1 %v8906_v56  ;;  %v8964_v56 = vld [vmem:[%s12440_s3 + $0x9e8] ss:$20 sps:$4 sm:$0xff]  }
 0x310   : > { %3511 = vmatpush1.bf16.msra.mxu0 %v8903_v27  ;;  %7956 = vmatprep.subr.bf16.mxu1 %v8907_v22  ;;  %v8965_v27 = vld [vmem:[%s12440_s3 + $0x8a8] ss:$20 sps:$4 sm:$0xff]  }
 0x311   : > { %3512 = vmatprep.subr.bf16.mxu0 %v8910_v32 }
 0x313   : > { %7957 = vmatpush3.bf16.msra.mxu1 %v8911_v28 }
 0x314   : > { %3513 = vmatpush1.bf16.msra.mxu0 %v8908_v29  ;;  %7958 = vmatprep.subr.bf16.mxu1 %v8912_v38 }
 0x315   : > { %3514 = vmatprep.subr.bf16.mxu0 %v8915_v39 }
 0x317   : > { %7959 = vmatpush3.bf16.msra.mxu1 %v8916_v41 }
 0x318   : > { %3515 = vmatpush1.bf16.msra.mxu0 %v8913_v44  ;;  %7960 = vmatprep.subr.bf16.mxu1 %v8917_v8 }
 0x319   : > { %3516 = vmatprep.subr.bf16.mxu0 %v8920_v42 }
 0x31b   : > { %7961 = vmatpush3.bf16.msra.mxu1 %v8921_v47 }
 0x31c   : > { %3517 = vmatpush1.bf16.msra.mxu0 %v8918_v48  ;;  %7962 = vmatprep.subr.bf16.mxu1 %v8922_v50 }
 0x31d   : > { %3529 = vmatprep.subr.bf16.mxu0 %v8925_v58 }
 0x31f   : > { %3519 = vmatmul.mubr.bf16.vlgmr.msra.gmra.mrb[16].mxu0 %v9906_v53  ;;  %7963 = vmatpush3.bf16.msra.mxu1 %v8926_v25 }
 0x320   : > { %3530 = vmatpush1.bf16.msra.mxu0 %v8923_v16  ;;  %7964 = vmatprep.subr.bf16.mxu1 %v8927_v33 }
 0x321   : > { %3531 = vmatprep.subr.bf16.mxu0 %v3137_v61  ;;  %3561 = vmatprep.mubr.bf16.mxu0 %v9224_v4 }
 0x323   : > { %7965 = vmatpush3.bf16.msra.mxu1 %v8928_v14 }
 0x324   : > { %3532 = vmatpush1.bf16.msra.mxu0 %v3134_v9  ;;  %8078 = vmatprep.subr.bf16.mxu1 %v9226_v54 }
 0x325   : > { %7928 = vmatprep.subr.bf16.mxu0 %v8933_v17 }
 0x326   : > { %3687 = vmatmul.mubr.bf16.vlgmr.msra.gmra.mrb[16].mxu1 %v9891_v15  ;;  %v8937_v15 = vld [vmem:[%s12440_s3 + $0x2b8] ss:$20 sps:$4 sm:$0xff]  }
 0x327   : > { %8079 = vmatpush3.bf16.msra.mxu1 %v8932_v12  ;;  %8082 = vmatprep.mubr.msk.bf16.mxu1 %vm9227_vm5, %v9226_v54 }
 0x328   : > { %8080 = vmatprep.subr.bf16.mxu1 %v9226_v54  ;;  %v8938_v54 = vld [vmem:[%s12440_s3 + $0x420] ss:$20 sps:$4 sm:$0xff]  }
 0x32b   : > { %7643 = vmatmul.mubr.msk.bf16.vlgmr.msra.gmra.mrb[16].mxu0 %vm3119_vm8, %v9744_v26  ;;  %8081 = vmatpush3.bf16.msra.mxu1 %v3140_v43 }
 0x32c   : > { %7929 = vmatpush3.bf16.msra.mxu0 %v8934_v34  ;;  %3645 = vmatprep.mubr.bf16.mxu0 %v9807_v23  ;;  %v8940_v23 = vld [vmem:[%s12440_s3 + $0x448] ss:$20 sps:$4 sm:$0xff]  }
 0x32d   : > { %7930 = vmatprep.subr.bf16.mxu0 %v8936_v35 }
 0x32e   : > { %8083 = vmatmul.mubr.msk.bf16.vlgmr.msra.gmra.mrb[20].mxu1 %vm3119_vm8, %v9744_v26  ;;  %v8942_v26 = vld [vmem:[%s12440_s3 + $0x470] ss:$20 sps:$4 sm:$0xff]  }
 0x32f   : > { %3939 = vmatprep.mubr.bf16.mxu1 %v9224_v4 }
 0x330   : > { %7931 = vmatpush3.bf16.msra.mxu0 %v8937_v15 }
 0x331   : > { %7932 = vmatprep.subr.bf16.mxu0 %v8938_v54 }
 0x334   : > { %7933 = vmatpush3.bf16.msra.mxu0 %v8939_v11 }
 0x335   : > { %7934 = vmatprep.subr.bf16.mxu0 %v8940_v23 }
 0x338   : > { %7935 = vmatpush3.bf16.msra.mxu0 %v8941_v45 }
 0x339   : > { %7936 = vmatprep.subr.bf16.mxu0 %v8942_v26 }
 0x33c   : > { %7937 = vmatpush3.bf16.msra.mxu0 %v8943_v55 }
 0x33d   : > { %7938 = vmatprep.subr.bf16.mxu0 %v8944_v13 }
 0x340   : > { %7939 = vmatpush3.bf16.msra.mxu0 %v8945_v7 }
 0x341   : > { %7940 = vmatprep.subr.bf16.mxu0 %v8946_v52 }
 0x344   : > { %7941 = vmatpush3.bf16.msra.mxu0 %v8947_v60 }
 0x345   : > { %7942 = vmatprep.subr.bf16.mxu0 %v8948_v21 }
 0x348   : > { %7943 = vmatpush3.bf16.msra.mxu0 %v8949_v51 }
 0x349   : > { %7972 = vmatprep.subr.bf16.mxu0 %v8950_v37 }
 0x34b   : > { %3646 = vmatmul.mubr.bf16.vlgmr.msra.gmra.mrb[20].mxu0 %v9815_v30  ;;  %v8956_v30 = vld [vmem:[%s12440_s3 + $0x948] ss:$20 sps:$4 sm:$0xff]  }
 0x34c   : > { %7973 = vmatpush3.bf16.msra.mxu0 %v8951_v49  ;;  %3727 = vmatprep.mubr.bf16.mxu0 %v9911_v1  ;;  %v8957_v1 = vld [vmem:[%s12440_s3 + $0x808] ss:$20 sps:$4 sm:$0xff]  }
 0x34d   : > { %7974 = vmatprep.subr.bf16.mxu0 %v8952_v59 }
 0x350   : > { %7975 = vmatpush3.bf16.msra.mxu0 %v8953_v0 }
 0x351   : > { %7976 = vmatprep.subr.bf16.mxu0 %v8954_v57 }
 0x354   : > { %7977 = vmatpush3.bf16.msra.mxu0 %v8955_v63 }
 0x355   : > { %7978 = vmatprep.subr.bf16.mxu0 %v8956_v30 }
 0x358   : > { %7979 = vmatpush3.bf16.msra.mxu0 %v8957_v1  ;;  %v3868_v1 = vld [vmem:[%s12442_s5 + $0x8] sm:$0xff] }
 0x359   : > { %7980 = vmatprep.subr.bf16.mxu0 %v8958_v2  ;;  %v3870_v2 = vld [vmem:[%s12442_s5 + $0x18] sm:$0xff] }
 0x35c   : > { %7981 = vmatpush3.bf16.msra.mxu0 %v8959_v3  ;;  %v3867_v3 = vld [vmem:[%s12442_s5] sm:$0xff] }
 0x35d   : > { %7982 = vmatprep.subr.bf16.mxu0 %v8960_v10  ;;  %v3869_v10 = vld [vmem:[%s12442_s5 + $0x10] sm:$0xff] }
 0x360   : > { %7983 = vmatpush3.bf16.msra.mxu0 %v8961_v24 }
 0x361   : > { %7984 = vmatprep.subr.bf16.mxu0 %v8962_v31 }
 0x364   : > { %7985 = vmatpush3.bf16.msra.mxu0 %v8963_v19 }
 0x365   : > { %7986 = vmatprep.subr.bf16.mxu0 %v8964_v56 }
 0x368   : > { %7987 = vmatpush3.bf16.msra.mxu0 %v8965_v27 }
 0x36b   : > { %3728 = vmatmul.mubr.bf16.vlgmr.msra.gmra.mrb[24].mxu0 %v9906_v53 }
 0x36c   : > { %3992 = vmatprep.mubr.bf16.mxu0 %v9224_v4 }
 0x3b9   : > { %v3305_v22 = vpop.f32.mrb[8].mxu1 }
 0x3ba   : > { %v8108_v32 = vadd.f32 %v10493_v36, %v3305_v22  ;;  %v3307_v28 = vpop.f32.mrb[9].mxu1 }
 0x3bb   : > { %v8109_v29 = vadd.f32 %v10495_v40, %v3307_v28  ;;  %v3309_v38 = vpop.f32.mrb[10].mxu1 }
 0x3bc   : > { %v8110_v39 = vadd.f32 %v10500_v46, %v3309_v38  ;;  %v3311_v41 = vpop.f32.mrb[11].mxu1 }
 0x3bd   : > { %v8111_v44 = vadd.f32 %v10508_v20, %v3311_v41 }
 0x3be   : > { %v10767_v8 = vpack.c.bf16 %v8110_v39, %v8108_v32 }
 0x3bf   : > { %v3778_v42 = vpack.c.bf16 %v8111_v44, %v8109_v29 }
 0x3c0   : > { %3806 = vrot.lane.b32.xlu1 %v10767_v8, %s9222_s15  ;;  %3787 = vrot.lane.b32.xlu0 %v10767_v8, %s9221_s14 }
 0x3c1   : > { %3907 = vmatprep.subr.bf16.mxu1 %v3778_v42 }
 0x3c2   : > { %3908 = vmatpush1.bf16.msra.mxu1 %v10767_v8 }
 0x3c4   : > { %3825 = vrot.lane.b32.xlu0 %v10767_v8, %s9223_s16  ;;  %3808 = vrot.lane.b32.xlu1 %v3778_v42, %s9222_s15 }
 0x3c8   : > { %3846 = vrot.lane.b32.xlu1 %v3778_v42, %s9225_s17  ;;  %3789 = vrot.lane.b32.xlu0 %v3778_v42, %s9221_s14 }
 0x3cc   : > { %3827 = vrot.lane.b32.xlu0 %v3778_v42, %s9223_s16 }
 0x3d9   : > { %v7922_v53 = vpop.f32.mrb[12].mxu1 }
 0x3da   : > { %v7923_v36 = vpop.f32.mrb[13].mxu1 }
 0x3db   : > { %v7924_v40 = vadd.f32 %v7923_v36, %v7922_v53  ;;  %v7925_v46 = vpop.f32.mrb[14].mxu1 }
 0x3dc   : > { %v7926_v20 = vpop.f32.mrb[15].mxu1 }
 0x3dd   : > { %v7927_v47 = vadd.f32 %v7926_v20, %v7925_v46 }
 0x3f9   : > { %v7966_v48 = vpop.f32.mrb[16].mxu1 }
 0x3fa   : > { %v7967_v50 = vpop.f32.mrb[17].mxu1 }
 0x3fb   : > { %v7968_v58 = vadd.f32 %v7967_v50, %v7966_v48  ;;  %v7969_v5 = vpop.f32.mrb[18].mxu1 }
 0x3fc   : > { %v7970_v16 = vpop.f32.mrb[19].mxu1 }
 0x3fd   : > { %v7971_v25 = vadd.f32 %v7970_v16, %v7969_v5 }
 0x3fe   : > { %v3563_v33 = vpop.f32.mrb[16].mxu0 }
 0x3ff   : > { %v3565_v6 = vpop.f32.mrb[17].mxu0 }
 0x400   : > { %v3567_v61 = vpop.f32.mrb[18].mxu0 }
 0x401   : > { %v3779_v14 = vpack.c.bf16 %v3567_v61, %v3563_v33  ;;  %v3569_v9 = vpop.f32.mrb[19].mxu0  ;;  %v3770_v17 = vpop.f32.mrb[20].mxu1  ;;  %v8966_v61 = vld [vmem:[%s12441_s4] sm:$0xff]  }
 0x402   : > { %v3780_v12 = vpack.c.bf16 %v3569_v9, %v3565_v6  ;;  %v8084_v18 = vpop.f32.mrb[21].mxu1 }
 0x403   : > { %v3773_v43 = vpop.f32.mrb[22].mxu1  ;;  %3791 = vrot.lane.b32.xlu1 %v3779_v14, %s9221_s14  ;;  %3810 = vrot.lane.b32.xlu0 %v3779_v14, %s9222_s15 }
 0x404   : > { %v8085_v34 = vpop.f32.mrb[23].mxu1  ;;  %3960 = vmatprep.subr.bf16.mxu0 %v3780_v12 }
 0x405   : > { %3961 = vmatpush1.bf16.msra.mxu0 %v3779_v14 }
 0x407   : > { %3829 = vrot.lane.b32.xlu1 %v3779_v14, %s9223_s16  ;;  %3812 = vrot.lane.b32.xlu0 %v3780_v12, %s9222_s15 }
 0x40b   : > { %3793 = vrot.lane.b32.xlu1 %v3780_v12, %s9221_s14 }
 0x40f   : > { %3831 = vrot.lane.b32.xlu1 %v3780_v12, %s9223_s16 }
 0x41e   : > { %v7944_v35 = vpop.f32.mrb[20].mxu0 }
 0x41f   : > { %v7945_v15 = vpop.f32.mrb[21].mxu0 }
 0x420   : > { %v7946_v54 = vadd.f32 %v7945_v15, %v7944_v35  ;;  %v7947_v11 = vpop.f32.mrb[22].mxu0  ;;  %v8967_v35 = vld [vmem:[%s12441_s4 + $0x8] sm:$0xff]  }
 0x421   : > { %v7948_v23 = vpop.f32.mrb[23].mxu0  ;;  %v8968_v15 = vld [vmem:[%s12443_s6] ss:$12 sps:$4 sm:$0xff]  }
 0x422   : > { %v3648_v45 = vadd.f32 %v7946_v54, %v7924_v40  ;;  %v7949_v26 = vadd.f32 %v7948_v23, %v7947_v11  ;;  %v8970_v54 = vld [vmem:[%s12443_s6 + $0x4] ss:$12 sps:$4 sm:$0xff]   ;;  %v8973_v11 = vld [vmem:[%s12443_s6 + $0x1c] ss:$12 sps:$4 sm:$0xff]  }
 0x423   : > { %v8971_v23 = vld [vmem:[%s12443_s6 + $0x18] ss:$12 sps:$4 sm:$0xff]  }
 0x424   : > { %v3651_v55 = vadd.f32 %v7949_v26, %v7927_v47  ;;  %v3689_v13 = vadd.f32 %v7968_v58, %v3648_v45  ;;  %v8976_v45 = vld [vmem:[%s12443_s6 + $0x34] ss:$12 sps:$4 sm:$0xff]  }
 0x425   : > { %v8995_v26 = vld [vmem:[%s12443_s6 + $0xc8] ss:$12 sps:$4 sm:$0xff]  }
 0x426   : > { %v3692_v7 = vadd.f32 %v7971_v25, %v3651_v55  ;;  %v8996_v55 = vld [vmem:[%s12443_s6 + $0x8] ss:$12 sps:$4 sm:$0xff]  }
 0x432   : > { %v3788_v24 = vpop.permute.xlu0 %3787  ;;  %v3807_v31 = vpop.permute.xlu1 %3806 }
 0x436   : > { %v3826_v19 = vpop.permute.xlu0 %3825  ;;  %v3809_v56 = vpop.permute.xlu1 %3808 }
 0x43a   : > { %v3790_v27 = vpop.permute.xlu0 %3789  ;;  %v3847_v22 = vpop.permute.xlu1 %3846 }
 0x43b   : > { %v3797_v39 = vsel %vm516_vm0, %v3788_v24, %v3790_v27  ;;  %v8986_v24 = vld [vmem:[%s12443_s6 + $0x90] ss:$12 sps:$4 sm:$0xff]  }
 0x43e   : > { %v7988_v52 = vpop.f32.mrb[24].mxu0  ;;  %v3828_v32 = vpop.permute.xlu0 %3827 }
 0x43f   : > { %v7989_v60 = vpop.f32.mrb[25].mxu0  ;;  %v3835_v53 = vsel %vm588_vm2, %v3826_v19, %v3828_v32  ;;  %v9021_v19 = vld [vmem:[%s12443_s6 + $0x80] ss:$12 sps:$4 sm:$0xff]  }
 0x440   : > { %v7990_v21 = vadd.f32 %v7989_v60, %v7988_v52  ;;  %v7991_v51 = vpop.f32.mrb[26].mxu0  ;;  %v8979_v52 = vld [vmem:[%s12443_s6 + $0x4c] ss:$12 sps:$4 sm:$0xff]  }
 0x441   : > { %v7992_v37 = vpop.f32.mrb[27].mxu0  ;;  %v9001_v60 = vld [vmem:[%s12443_s6 + $0x20] ss:$12 sps:$4 sm:$0xff]  }
 0x442   : > { %v3730_v49 = vadd.f32 %v7990_v21, %v3689_v13  ;;  %v7993_v59 = vadd.f32 %v7992_v37, %v7991_v51  ;;  %v8974_v13 = vld [vmem:[%s12443_s6 + $0x30] ss:$12 sps:$4 sm:$0xff]   ;;  %v9005_v21 = vld [vmem:[%s12443_s6 + $0xf8] ss:$12 sps:$4 sm:$0xff]   ;;  %v8977_v51 = vld [vmem:[%s12443_s6 + $0x48] ss:$12 sps:$4 sm:$0xff]  }
 0x443   : > { %v8982_v37 = vld [vmem:[%s12443_s6 + $0x64] ss:$12 sps:$4 sm:$0xff]  }
 0x444   : > { %v3771_v0 = vadd.f32 %v3770_v17, %v3730_v49  ;;  %v3733_v57 = vadd.f32 %v7993_v59, %v3692_v7  ;;  %v9000_v7 = vld [vmem:[%s12443_s6 + $0xe0] ss:$12 sps:$4 sm:$0xff]   ;;  %v9006_v49 = vld [vmem:[%s12443_s6 + $0x38] ss:$12 sps:$4 sm:$0xff]   ;;  %v9010_v59 = vld [vmem:[%s12443_s6 + $0x110] ss:$12 sps:$4 sm:$0xff]  }
 0x446   : > { %v3774_v63 = vadd.f32 %v3773_v43, %v3733_v57  ;;  %v8985_v57 = vld [vmem:[%s12443_s6 + $0x7c] ss:$12 sps:$4 sm:$0xff]  }
 0x448   : > { %v10786_v30 = vpack.c.bf16 %v3774_v63, %v3771_v0  ;;  %v8980_v0 = vld [vmem:[%s12443_s6 + $0x60] ss:$12 sps:$4 sm:$0xff]   ;;  %v9011_v63 = vld [vmem:[%s12443_s6 + $0x50] ss:$12 sps:$4 sm:$0xff]  }
 0x44a   : > { %3814 = vrot.lane.b32.xlu1 %v10786_v30, %s9222_s15  ;;  %3795 = vrot.lane.b32.xlu0 %v10786_v30, %s9221_s14 }
 0x44e   : > { %3844 = vrot.lane.b32.xlu1 %v10767_v8, %s9225_s17  ;;  %3848 = vrot.lane.b32.xlu0 %v3779_v14, %s9225_s17  ;;  %v3816_v8 = vsel %vm552_vm1, %v3807_v31, %v3809_v56  ;;  %v8991_v31 = vld [vmem:[%s12443_s6 + $0xac] ss:$12 sps:$4 sm:$0xff]  }
 0x452   : > { %3852 = vrot.lane.b32.xlu1 %v10786_v30, %s9225_s17  ;;  %3833 = vrot.lane.b32.xlu0 %v10786_v30, %s9223_s16 }
 0x456   : > { %3878 = vperm.xlu1 %8254, %v3868_v1   ;;  %3850 = vrot.lane.b32.xlu0 %v3780_v12, %s9225_s17  ;;  %v8983_v1 = vld [vmem:[%s12443_s6 + $0x78] ss:$12 sps:$4 sm:$0xff]  }
 0x45a   : > { %3888 = vperm.xlu1 %8254, %v3870_v2   ;;  %3873 = vperm.xlu0 %8253, %v3867_v3   ;;  %v8988_v2 = vld [vmem:[%s12443_s6 + $0x94] ss:$12 sps:$4 sm:$0xff]  }
 0x45b   : > { %v9016_v3 = vld [vmem:[%s12443_s6 + $0x68] ss:$12 sps:$4 sm:$0xff]  }
 0x45e   : > { %3883 = vperm.xlu0 %8253, %v3869_v10   ;;  %v9020_v10 = vld [vmem:[%s12443_s6 + $0x140] ss:$12 sps:$4 sm:$0xff]  }
 0x475   : > { %v3792_v28 = vpop.permute.xlu1 %3791  ;;  %v3811_v29 = vpop.permute.xlu0 %3810 }
 0x476   : > { %v3798_v38 = vsel %vm516_vm0, %v3790_v27, %v3792_v28  ;;  %v3817_v41 = vsel %vm552_vm1, %v3809_v56, %v3811_v29  ;;  %v8989_v56 = vld [vmem:[%s12443_s6 + $0xa8] ss:$12 sps:$4 sm:$0xff]   ;;  %v8994_v27 = vld [vmem:[%s12443_s6 + $0xc4] ss:$12 sps:$4 sm:$0xff]  }
 0x477   : > { %3909 = vmatprep.subr.bf16.mxu1 %v3798_v38  ;;  %v9002_v38 = vld [vmem:[%s12443_s6 + $0xf0] ss:$12 sps:$4 sm:$0xff]  }
 0x478   : > { %3910 = vmatpush1.bf16.msra.mxu1 %v3797_v39  ;;  %v9009_v39 = vld [vmem:[%s12443_s6 + $0x10c] ss:$12 sps:$4 sm:$0xff]  }
 0x479   : > { %v3830_v44 = vpop.permute.xlu1 %3829  ;;  %3911 = vmatprep.subr.bf16.mxu1 %v3817_v41  ;;  %v3813_v40 = vpop.permute.xlu0 %3812  ;;  %v9007_v41 = vld [vmem:[%s12443_s6 + $0x108] ss:$12 sps:$4 sm:$0xff]  }
 0x47a   : > { %v3836_v42 = vsel %vm588_vm2, %v3828_v32, %v3830_v44  ;;  %v3818_v6 = vsel %vm552_vm1, %v3811_v29, %v3813_v40  ;;  %v8999_v32 = vld [vmem:[%s12443_s6 + $0xdc] ss:$12 sps:$4 sm:$0xff]   ;;  %v9004_v29 = vld [vmem:[%s12443_s6 + $0xf4] ss:$12 sps:$4 sm:$0xff]  }
 0x47c   : > { %3912 = vmatpush1.bf16.msra.mxu1 %v3816_v8  ;;  %v9012_v8 = vld [vmem:[%s12443_s6 + $0x120] ss:$12 sps:$4 sm:$0xff]  }
 0x47d   : > { %3913 = vmatprep.subr.bf16.mxu1 %v3836_v42  ;;  %v3794_v36 = vpop.permute.xlu1 %3793  ;;  %v9019_v42 = vld [vmem:[%s12443_s6 + $0x13c] ss:$12 sps:$4 sm:$0xff]  }
 0x47e   : > { %v3799_v50 = vsel %vm516_vm0, %v3792_v28, %v3794_v36  ;;  %v8997_v28 = vld [vmem:[%s12443_s6 + $0xd8] ss:$12 sps:$4 sm:$0xff]  }
 0x480   : > { %3914 = vmatpush1.bf16.msra.mxu1 %v3835_v53  ;;  %v9017_v53 = vld [vmem:[%s12443_s6 + $0x138] ss:$12 sps:$4 sm:$0xff]  }
 0x481   : > { %v3832_v46 = vpop.permute.xlu1 %3831 }
 0x482   : > { %v3837_v17 = vsel %vm588_vm2, %v3830_v44, %v3832_v46  ;;  %v9014_v44 = vld [vmem:[%s12443_s6 + $0x124] ss:$12 sps:$4 sm:$0xff]  }
 0x4bc   : > { %v3815_v20 = vpop.permute.xlu1 %3814  ;;  %v3796_v47 = vpop.permute.xlu0 %3795 }
 0x4bd   : > { %v3800_v48 = vsel %vm516_vm0, %v3794_v36, %v3796_v47  ;;  %v3819_v58 = vsel %vm552_vm1, %v3813_v40, %v3815_v20 }
 0x4be   : > { %3962 = vmatprep.subr.bf16.mxu0 %v3800_v48 }
 0x4bf   : > { %3963 = vmatpush1.bf16.msra.mxu0 %v3799_v50  ;;  %v9022_v50 = vld [vmem:[%s12443_s6 + $0x150] ss:$12 sps:$4 sm:$0xff]  }
 0x4c0   : > { %v3845_v5 = vpop.permute.xlu1 %3844  ;;  %3964 = vmatprep.subr.bf16.mxu0 %v3819_v58  ;;  %v3849_v16 = vpop.permute.xlu0 %3848  ;;  %v9026_v58 = vld [vmem:[%s12443_s6 + $0x98] ss:$12 sps:$4 sm:$0xff]  }
 0x4c1   : > { %v3854_v25 = vsel %vm624_vm3, %v3845_v5, %v3847_v22  ;;  %v3855_v33 = vsel %vm624_vm3, %v3847_v22, %v3849_v16  ;;  %v8992_v22 = vld [vmem:[%s12443_s6 + $0xc0] ss:$12 sps:$4 sm:$0xff]  }
 0x4c2   : > { %3915 = vmatprep.subr.bf16.mxu1 %v3855_v33 }
 0x4c3   : > { %3916 = vmatpush1.bf16.msra.mxu1 %v3854_v25  ;;  %3965 = vmatpush1.bf16.msra.mxu0 %v3818_v6  ;;  %v9030_v25 = vld [vmem:[%s12443_s6 + $0x170] ss:$12 sps:$4 sm:$0xff]  }
 0x4c4   : > { %v3834_v14 = vpop.permute.xlu0 %3833  ;;  %8086 = vmatprep.subr.bf16.mxu1 %v10786_v30  ;;  %v3853_v12 = vpop.permute.xlu1 %3852 }
 0x4c5   : > { %v3838_v9 = vsel %vm588_vm2, %v3832_v46, %v3834_v14 }
 0x4c6   : > { %7647 = vmatmul.mubr.msk.bf16.vlgmr.msra.gmra.mrb[24].mxu1 %vm661_vm4, %v8966_v61  ;;  %3966 = vmatprep.subr.bf16.mxu0 %v3838_v9 }
 0x4c7   : > { %3967 = vmatpush1.bf16.msra.mxu0 %v3837_v17  ;;  %8087 = vmatpush3.bf16.msra.mxu1 %v10786_v30  ;;  %v9015_v30 = vld [vmem:[%s12443_s6 + $0x128] ss:$12 sps:$4 sm:$0xff]  }
 0x4c8   : > { %v3851_v18 = vpop.permute.xlu0 %3850  ;;  %8088 = vmatprep.subr.bf16.mxu1 %v3796_v47  ;;  %3949 = vmatprep.mubr.bf16.mxu1 %v9224_v4 }
 0x4c9   : > { %v3857_v43 = vsel %vm624_vm3, %v3851_v18, %v3853_v12  ;;  %v3856_v34 = vsel %vm624_vm3, %v3849_v16, %v3851_v18  ;;  %v9029_v16 = vld [vmem:[%s12443_s6 + $0x16c] ss:$12 sps:$4 sm:$0xff]  }
 0x4ca   : > { %3968 = vmatprep.subr.bf16.mxu0 %v3857_v43 }
 0x4cb   : > { %3969 = vmatpush1.bf16.msra.mxu0 %v3856_v34  ;;  %8089 = vmatpush3.bf16.msra.mxu1 %v3796_v47  ;;  %v9025_v47 = vld [vmem:[%s12443_s6 + $0x158] ss:$12 sps:$4 sm:$0xff]  }
 0x4cc   : > { %8090 = vmatprep.subr.bf16.mxu1 %v3815_v20  ;;  %4900 = vmatprep.subr.bf16.mxu0 %v8970_v54 }
 0x4ce   : > { %7648 = vmatmul.mubr.msk.bf16.gmra.mrb[28].mxu1 %vm661_vm4, %v8967_v35  ;;  %7649 = vmatmul.mubr.msk.bf16.vlgmr.msra.gmra.mrb[28].mxu0 %vm661_vm4, %v8966_v61 }
 0x4cf   : > { %8091 = vmatpush3.bf16.msra.mxu1 %v3815_v20  ;;  %4002 = vmatprep.mubr.bf16.mxu0 %v9224_v4  ;;  %v9024_v20 = vld [vmem:[%s12443_s6 + $0x154] ss:$12 sps:$4 sm:$0xff]  }
 0x4d0   : > { %8092 = vmatprep.subr.bf16.mxu1 %v3834_v14  ;;  %8096 = vmatprep.mubr.msk.bf16.mxu1 %vm661_vm4, %v8966_v61  ;;  %v9027_v61 = vld [vmem:[%s12443_s6 + $0x168] ss:$12 sps:$4 sm:$0xff]  }
 0x4d1   : > { %4901 = vmatpush1.bf16.msra.mxu0 %v8968_v15 }
 0x4d2   : > { %4902 = vmatprep.subr.bf16.mxu0 %v8973_v11  ;;  %v9034_v11 = vld [vmem:[%s12443_s6 + $0x184] ss:$12 sps:$4 sm:$0xff]  }
 0x4d3   : > { %8093 = vmatpush3.bf16.msra.mxu1 %v3834_v14  ;;  %v9031_v14 = vld [vmem:[%s12443_s6 + $0xb0] ss:$12 sps:$4 sm:$0xff]  }
 0x4d4   : > { %8094 = vmatprep.subr.bf16.mxu1 %v3853_v12 }
 0x4d5   : > { %4903 = vmatpush1.bf16.msra.mxu0 %v8971_v23  ;;  %v10982_v33 = vpop.permute.xlu1 %3878  ;;  %v9035_v23 = vld [vmem:[%s12443_s6 + $0x248] ss:$12 sps:$4 sm:$0xff]  }
 0x4d6   : > { %7650 = vmatmul.mubr.msk.bf16.gmra.mrb[32].mxu0 %vm661_vm4, %v8967_v35  ;;  %4904 = vmatprep.subr.bf16.mxu0 %v8976_v45 }
 0x4d7   : > { %8095 = vmatpush3.bf16.msra.mxu1 %v3853_v12 }
 0x4d8   : > { %8004 = vmatprep.subr.bf16.mxu1 %v8995_v26 }
 0x4d9   : > { %4905 = vmatpush1.bf16.msra.mxu0 %v8974_v13  ;;  %v3874_v5 = vpop.permute.xlu0 %3873 }
 0x4da   : > { %8097 = vmatmul.mubr.msk.bf16.vlgmr.msra.gmra.mrb[32].mxu1 %vm661_vm4, %v8967_v35  ;;  %4906 = vmatprep.subr.bf16.mxu0 %v8979_v52 }
 0x4db   : > { %8005 = vmatpush3.bf16.msra.mxu1 %v8996_v55 }
 0x4dc   : > { %8006 = vmatprep.subr.bf16.mxu1 %v9000_v7 }
 0x4dd   : > { %4907 = vmatpush1.bf16.msra.mxu0 %v8977_v51 }
 0x4de   : > { %4908 = vmatprep.subr.bf16.mxu0 %v8982_v37 }
 0x4df   : > { %8007 = vmatpush3.bf16.msra.mxu1 %v9001_v60 }
 0x4e0   : > { %8008 = vmatprep.subr.bf16.mxu1 %v9005_v21 }
 0x4e1   : > { %4909 = vmatpush1.bf16.msra.mxu0 %v8980_v0 }
 0x4e2   : > { %4910 = vmatprep.subr.bf16.mxu0 %v8985_v57 }
 0x4e3   : > { %8009 = vmatpush3.bf16.msra.mxu1 %v9006_v49  ;;  %v3884_v49 = vpop.permute.xlu0 %3883 }
 0x4e4   : > { %8010 = vmatprep.subr.bf16.mxu1 %v9010_v59 }
 0x4e5   : > { %4911 = vmatpush1.bf16.msra.mxu0 %v8983_v1 }
 0x4e6   : > { %4912 = vmatprep.subr.bf16.mxu0 %v8988_v2 }
 0x4e7   : > { %8011 = vmatpush3.bf16.msra.mxu1 %v9011_v63  ;;  %v3889_v63 = vpop.permute.xlu1 %3888 }
 0x4e8   : > { %8012 = vmatprep.subr.bf16.mxu1 %v9015_v30 }
 0x4e9   : > { %4913 = vmatpush1.bf16.msra.mxu0 %v8986_v24 }
 0x4ea   : > { %4914 = vmatprep.subr.bf16.mxu0 %v8991_v31 }
 0x4eb   : > { %8013 = vmatpush3.bf16.msra.mxu1 %v9016_v3 }
 0x4ec   : > { %8014 = vmatprep.subr.bf16.mxu1 %v9020_v10 }
 0x4ed   : > { %4915 = vmatpush1.bf16.msra.mxu0 %v8989_v56 }
 0x4ee   : > { %4916 = vmatprep.subr.bf16.mxu0 %v8994_v27 }
 0x4ef   : > { %8015 = vmatpush3.bf16.msra.mxu1 %v9021_v19 }
 0x4f0   : > { %8016 = vmatprep.subr.bf16.mxu1 %v9025_v47 }
 0x4f1   : > { %4917 = vmatpush1.bf16.msra.mxu0 %v8992_v22 }
 0x4f2   : > { %4918 = vmatprep.subr.bf16.mxu0 %v8999_v32 }
 0x4f3   : > { %8017 = vmatpush3.bf16.msra.mxu1 %v9026_v58 }
 0x4f4   : > { %8018 = vmatprep.subr.bf16.mxu1 %v9030_v25 }
 0x4f5   : > { %4919 = vmatpush1.bf16.msra.mxu0 %v8997_v28 }
 0x4f6   : > { %4920 = vmatprep.subr.bf16.mxu0 %v9004_v29 }
 0x4f7   : > { %8019 = vmatpush3.bf16.msra.mxu1 %v9031_v14 }
 0x4f8   : > { %8032 = vmatprep.subr.bf16.mxu1 %v9035_v23 }
 0x4f9   : > { %4921 = vmatpush1.bf16.msra.mxu0 %v9002_v38 }
 0x4fa   : > { %4922 = vmatprep.subr.bf16.mxu0 %v9009_v39 }
 0x4fd   : > { %4923 = vmatpush1.bf16.msra.mxu0 %v9007_v41 }
 0x4fe   : > { %4924 = vmatprep.subr.bf16.mxu0 %v9014_v44 }
 0x501   : > { %4925 = vmatpush1.bf16.msra.mxu0 %v9012_v8 }
 0x502   : > { %4926 = vmatprep.subr.bf16.mxu0 %v9019_v42 }
 0x505   : > { %4927 = vmatpush1.bf16.msra.mxu0 %v9017_v53 }
 0x506   : > { %4928 = vmatprep.subr.bf16.mxu0 %v9024_v20 }
 0x509   : > { %4929 = vmatpush1.bf16.msra.mxu0 %v9022_v50 }
 0x50a   : > { %4930 = vmatprep.subr.bf16.mxu0 %v9029_v16 }
 0x50d   : > { %4931 = vmatpush1.bf16.msra.mxu0 %v9027_v61 }
 0x50e   : > { %4953 = vmatprep.subr.bf16.mxu0 %v9034_v11 }
 0x599   : > { %v3941_v36 = vpop.f32.mrb[24].mxu1 }
 0x59a   : > { %v3943_v40 = vpop.f32.mrb[25].mxu1  ;;  %v11006_v45 = vadd.f32 %v3941_v36, %v3874_v5 }
 0x59b   : > { %v3945_v46 = vpop.f32.mrb[26].mxu1  ;;  %v10984_v6 = vadd.f32 %v3943_v40, %v3874_v5 }
 0x59c   : > { %v3947_v48 = vpop.f32.mrb[27].mxu1  ;;  %v10993_v12 = vadd.f32 %v3945_v46, %v10982_v33  ;;  %v4062_v59 = vmax.f32 %v11006_v45, 0.0 }
 0x59d   : > { %v10996_v18 = vadd.f32 %v3947_v48, %v10982_v33  ;;  %v4063_v26 = vmax.f32 %v10984_v6, 0.0 }
 0x59e   : > { %v4067_v60 = vmax.f32 %v10993_v12, 0.0 }
 0x59f   : > { %v4068_v21 = vmax.f32 %v10996_v18, 0.0  ;;  %v9032_v18 = vld [vmem:[%s12443_s6 + $0x180] ss:$12 sps:$4 sm:$0xff]  }
 0x5a0   : > { %v8310_v1 = vpack.i.bf16 %v4067_v60, %v4062_v59 }
 0x5a1   : > { %v3951_v9 = vpop.f32.mrb[28].mxu1  ;;  %v3994_v17 = vpop.f32.mrb[28].mxu0 }
 0x5a2   : > { %v10998_v43 = vadd.f32 %v3994_v17, %v3874_v5  ;;  %v3953_v34 = vpop.f32.mrb[29].mxu1  ;;  %v3996_v35 = vpop.f32.mrb[29].mxu0  ;;  %v11039_v19 = vadd.f32 %v3951_v9, %v3884_v49 }
 0x5a3   : > { %v3955_v15 = vpop.f32.mrb[30].mxu1  ;;  %v3998_v54 = vpop.f32.mrb[30].mxu0  ;;  %v11021_v0 = vadd.f32 %v3953_v34, %v3884_v49  ;;  %v11046_v28 = vadd.f32 %v3996_v35, %v3874_v5 }
 0x5a4   : > { %v4064_v55 = vmax.f32 %v10998_v43, 0.0  ;;  %v11011_v13 = vadd.f32 %v3998_v54, %v10982_v33  ;;  %v3957_v7 = vpop.f32.mrb[31].mxu1  ;;  %v4000_v52 = vpop.f32.mrb[31].mxu0  ;;  %v11032_v2 = vadd.f32 %v3955_v15, %v3889_v63  ;;  %v4072_v40 = vmax.f32 %v11039_v19, 0.0 }
 0x5a5   : > { %v11034_v3 = vadd.f32 %v3957_v7, %v3889_v63  ;;  %v4073_v56 = vmax.f32 %v11021_v0, 0.0  ;;  %v11056_v42 = vadd.f32 %v4000_v52, %v10982_v33  ;;  %v4065_v48 = vmax.f32 %v11046_v28, 0.0  ;;  %v9052_v28 = vld [vmem:[%s12443_s6 + $0x1e0] ss:$12 sps:$4 sm:$0xff]  }
 0x5a6   : > { %v8300_v51 = vpack.i.bf16 %v4064_v55, %v4063_v26  ;;  %v4069_v37 = vmax.f32 %v11011_v13, 0.0  ;;  %v4077_v38 = vmax.f32 %v11032_v2, 0.0  ;;  %v9049_v2 = vld [vmem:[%s12443_s6 + $0x1cc] ss:$12 sps:$4 sm:$0xff]  }
 0x5a7   : > { %v4078_v39 = vmax.f32 %v11034_v3, 0.0  ;;  %v4070_v61 = vmax.f32 %v11056_v42, 0.0  ;;  %v9056_v42 = vld [vmem:[%s12443_s6 + $0x1e8] ss:$12 sps:$4 sm:$0xff]   ;;  %v9072_v13 = vld [vmem:[%s12443_s6 + $0x240] ss:$12 sps:$4 sm:$0xff]  }
 0x5a8   : > { %v8305_v57 = vpack.i.bf16 %v4069_v37, %v4068_v21  ;;  %8301 = vrot.lane.b32.xlu0 %v8300_v51, %s9221_s14 }
 0x5a9   : > { %v4004_v30 = vpop.f32.mrb[32].mxu0 }
 0x5aa   : > { %v11036_v10 = vadd.f32 %v4004_v30, %v3884_v49  ;;  %v4006_v24 = vpop.f32.mrb[33].mxu0  ;;  %8306 = vrot.lane.b32.xlu1 %v8305_v57, %s9221_s14 }
 0x5ab   : > { %v4008_v31 = vpop.f32.mrb[34].mxu0  ;;  %v11077_v16 = vadd.f32 %v4006_v24, %v3884_v49 }
 0x5ac   : > { %v4074_v27 = vmax.f32 %v11036_v10, 0.0  ;;  %v11043_v22 = vadd.f32 %v4008_v31, %v3889_v63  ;;  %v4010_v32 = vpop.f32.mrb[35].mxu0  ;;  %8311 = vrot.lane.b32.xlu0 %v8310_v1, %s9221_s14  ;;  %v9082_v10 = vld [vmem:[%s12443_s6 + $0x288] ss:$12 sps:$4 sm:$0xff]  }
 0x5ad   : > { %v8098_v29 = vpop.f32.mrb[32].mxu1  ;;  %v11088_v9 = vadd.f32 %v4010_v32, %v3889_v63  ;;  %v4075_v35 = vmax.f32 %v11077_v16, 0.0  ;;  %v9075_v16 = vld [vmem:[%s12443_s6 + $0x258] ss:$12 sps:$4 sm:$0xff]  }
 0x5ae   : > { %v8315_v41 = vpack.i.bf16 %v4074_v27, %v4073_v56  ;;  %v4079_v44 = vmax.f32 %v11043_v22, 0.0  ;;  %v4047_v8 = vpop.f32.mrb[33].mxu1  ;;  %v11065_v20 = vadd.f32 %v8098_v29, %v3884_v49 }
 0x5af   : > { %v11058_v53 = vadd.f32 %v4047_v8, %v3874_v5  ;;  %v8099_v36 = vpop.f32.mrb[34].mxu1  ;;  %v8325_v5 = vpack.i.bf16 %v4077_v38, %v4072_v40  ;;  %v4080_v54 = vmax.f32 %v11088_v9, 0.0  ;;  %v9077_v9 = vld [vmem:[%s12443_s6 + $0x25c] ss:$12 sps:$4 sm:$0xff]  }
 0x5b0   : > { %v8320_v46 = vpack.i.bf16 %v4079_v44, %v4078_v39  ;;  %v4050_v47 = vpop.f32.mrb[35].mxu1  ;;  %8316 = vrot.lane.b32.xlu1 %v8315_v41, %s9221_s14  ;;  %v11079_v25 = vadd.f32 %v8099_v36, %v3889_v63  ;;  %v4076_v17 = vmax.f32 %v11065_v20, 0.0  ;;  %v9094_v20 = vld [vmem:[%s12443_s6 + $0x2d4] ss:$12 sps:$4 sm:$0xff]  }
 0x5b1   : > { %v4066_v50 = vmax.f32 %v11058_v53, 0.0  ;;  %v11071_v58 = vadd.f32 %v4050_v47, %v10982_v33 }
 0x5b2   : > { %8321 = vrot.lane.b32.xlu0 %v8320_v46, %s9221_s14  ;;  %v4081_v15 = vmax.f32 %v11079_v25, 0.0  ;;  %v8340_v11 = vpack.i.bf16 %v4076_v17, %v4075_v35  ;;  %v9089_v25 = vld [vmem:[%s12443_s6 + $0x2b8] ss:$12 sps:$4 sm:$0xff]  }
 0x5b3   : > { %v8330_v14 = vpack.i.bf16 %v4066_v50, %v4065_v48  ;;  %v4071_v33 = vmax.f32 %v11071_v58, 0.0 }
 0x5b4   : > { %8326 = vrot.lane.b32.xlu1 %v8325_v5, %s9221_s14  ;;  %v8345_v23 = vpack.i.bf16 %v4081_v15, %v4080_v54 }
 0x5b5   : > { %v8335_v34 = vpack.i.bf16 %v4071_v33, %v4070_v61 }
 0x5b6   : > { %8331 = vrot.lane.b32.xlu0 %v8330_v14, %s9221_s14 }
 0x5b8   : > { %8336 = vrot.lane.b32.xlu1 %v8335_v34, %s9221_s14 }
 0x5ba   : > { %8341 = vrot.lane.b32.xlu0 %v8340_v11, %s9221_s14 }
 0x5bc   : > { %8346 = vrot.lane.b32.xlu1 %v8345_v23, %s9221_s14 }
 0x61a   : > { %v11111_v7 = vpop.permute.xlu0 %8301 }
 0x61b   : > { %v8304_v52 = vunpack.i.h.bf16 %v11111_v7  ;;  %v8303_v51 = vunpack.i.l.bf16 %v11111_v7  ;;  %v9081_v7 = vld [vmem:[%s12443_s6 + $0x308] ss:$12 sps:$4 sm:$0xff]  }
 0x61c   : > { %v11115_v49 = vpop.permute.xlu1 %8306 }
 0x61d   : > { %v8309_v57 = vunpack.i.h.bf16 %v11115_v49  ;;  %v8308_v63 = vunpack.i.l.bf16 %v11115_v49  ;;  %v4143_v30 = vsel %vm516_vm0, %v8303_v51, %v8304_v52  ;;  %v9071_v49 = vld [vmem:[%s12443_s6 + $0x230] ss:$12 sps:$4 sm:$0xff]  }
 0x61e   : > { %v8312_v1 = vpop.permute.xlu0 %8311  ;;  %v4179_v29 = vmax.f32 %v4063_v26, %v4143_v30  ;;  %v9036_v26 = vld [vmem:[%s12443_s6 + $0x188] ss:$12 sps:$4 sm:$0xff]  }
 0x61f   : > { %v8314_v24 = vunpack.i.h.bf16 %v8312_v1  ;;  %v8313_v31 = vunpack.i.l.bf16 %v8312_v1  ;;  %v4147_v32 = vsel %vm516_vm0, %v8308_v63, %v8309_v57  ;;  %v9037_v1 = vld [vmem:[%s12443_s6 + $0x198] ss:$12 sps:$4 sm:$0xff]  }
 0x620   : > { %v4184_v41 = vmax.f32 %v4068_v21, %v4147_v32  ;;  %v9040_v21 = vld [vmem:[%s12443_s6 + $0x260] ss:$12 sps:$4 sm:$0xff]  }
 0x621   : > { %v4146_v8 = vsel %vm516_vm0, %v8314_v24, %v8308_v63  ;;  %v4142_v36 = vsel %vm516_vm0, %v8313_v31, %v8303_v51  ;;  %v9041_v24 = vld [vmem:[%s12443_s6 + $0x1a0] ss:$12 sps:$4 sm:$0xff]  }
 0x622   : > { %v4183_v46 = vmax.f32 %v4067_v60, %v4146_v8  ;;  %v4178_v47 = vmax.f32 %v4062_v59, %v4142_v36  ;;  %v11135_v5 = vpop.permute.xlu1 %8316  ;;  %v4199_v14 = vpack.c.bf16 %v4184_v41, %v4179_v29  ;;  %v9039_v60 = vld [vmem:[%s12443_s6 + $0x19c] ss:$12 sps:$4 sm:$0xff]  }
 0x623   : > { %v8319_v34 = vunpack.i.h.bf16 %v11135_v5  ;;  %v8318_v6 = vunpack.i.l.bf16 %v11135_v5 }
 0x624   : > { %v4198_v12 = vpack.c.bf16 %v4183_v46, %v4178_v47  ;;  %4932 = vmatprep.mubr.bf16.mxu0 %v4199_v14  ;;  %5091 = vmatprep.mubr.bf16.mxu1 %v4199_v14  ;;  %v11145_v45 = vpop.permute.xlu0 %8321  ;;  %v9044_v46 = vld [vmem:[%s12443_s6 + $0x1b4] ss:$12 sps:$4 sm:$0xff]   ;;  %v9045_v47 = vld [vmem:[%s12443_s6 + $0x278] ss:$12 sps:$4 sm:$0xff]  }
 0x625   : > { %v8324_v59 = vunpack.i.h.bf16 %v11145_v45  ;;  %v8323_v11 = vunpack.i.l.bf16 %v11145_v45  ;;  %v4151_v23 = vsel %vm516_vm0, %v8318_v6, %v8319_v34 }
 0x626   : > { %v8327_v51 = vpop.permute.xlu1 %8326  ;;  %4933 = vmatmul.mubr.bf16.vlgmr.msra.gmra.mrb[36].mxu0 %v4198_v12  ;;  %5092 = vmatmul.mubr.bf16.vlgmr.msra.gmra.mrb[36].mxu1 %v4198_v12  ;;  %v4189_v29 = vmax.f32 %v4073_v56, %v4151_v23 }
 0x627   : > { %v8329_v63 = vunpack.i.h.bf16 %v8327_v51  ;;  %v8328_v30 = vunpack.i.l.bf16 %v8327_v51  ;;  %4954 = vmatpush1.bf16.msra.mxu0 %v9032_v18  ;;  %8033 = vmatpush3.bf16.msra.mxu1 %v9036_v26  ;;  %v4155_v31 = vsel %vm516_vm0, %v8323_v11, %v8324_v59 }
 0x628   : > { %v11167_v32 = vpop.permute.xlu0 %8331  ;;  %4955 = vmatprep.subr.bf16.mxu0 %v9039_v60  ;;  %8034 = vmatprep.subr.bf16.mxu1 %v9040_v21  ;;  %v4194_v41 = vmax.f32 %v4078_v39, %v4155_v31  ;;  %v9046_v60 = vld [vmem:[%s12443_s6 + $0x1b8] ss:$12 sps:$4 sm:$0xff]  }
 0x629   : > { %v8334_v8 = vunpack.i.h.bf16 %v11167_v32  ;;  %v8333_v36 = vunpack.i.l.bf16 %v11167_v32  ;;  %v4150_v14 = vsel %vm516_vm0, %v8328_v30, %v8318_v6  ;;  %v4154_v0 = vsel %vm516_vm0, %v8329_v63, %v8323_v11  ;;  %v9042_v6 = vld [vmem:[%s12443_s6 + $0x1b0] ss:$12 sps:$4 sm:$0xff]   ;;  %v9047_v11 = vld [vmem:[%s12443_s6 + $0x1c8] ss:$12 sps:$4 sm:$0xff]   ;;  %v9057_v31 = vld [vmem:[%s12443_s6 + $0x1f8] ss:$12 sps:$4 sm:$0xff]  }
 0x62a   : > { %v11183_v56 = vpop.permute.xlu1 %8336  ;;  %v4204_v3 = vpack.c.bf16 %v4194_v41, %v4189_v29  ;;  %v4188_v39 = vmax.f32 %v4072_v40, %v4150_v14  ;;  %v4193_v18 = vmax.f32 %v4077_v38, %v4154_v0  ;;  %v9050_v38 = vld [vmem:[%s12443_s6 + $0x290] ss:$12 sps:$4 sm:$0xff]   ;;  %v9061_v41 = vld [vmem:[%s12443_s6 + $0x200] ss:$12 sps:$4 sm:$0xff]  }
 0x62b   : > { %v8339_v26 = vunpack.i.h.bf16 %v11183_v56  ;;  %v8338_v12 = vunpack.i.l.bf16 %v11183_v56  ;;  %4956 = vmatpush1.bf16.msra.mxu0 %v9037_v1  ;;  %8035 = vmatpush3.bf16.msra.mxu1 %v9041_v24  ;;  %v4145_v40 = vsel %vm516_vm0, %v8333_v36, %v8334_v8  ;;  %v9051_v63 = vld [vmem:[%s12443_s6 + $0x1d0] ss:$12 sps:$4 sm:$0xff]   ;;  %v9055_v24 = vld [vmem:[%s12443_s6 + $0x2a8] ss:$12 sps:$4 sm:$0xff]   ;;  %v4182_v22 = vmax.f32 %v4066_v50, %v8334_v8 }
 0x62c   : > { %4942 = vmatprep.mubr.bf16.mxu0 %v4204_v3  ;;  %5099 = vmatprep.mubr.bf16.mxu1 %v4204_v3  ;;  %v4203_v19 = vpack.c.bf16 %v4193_v18, %v4188_v39  ;;  %v4181_v23 = vmax.f32 %v4065_v48, %v4145_v40  ;;  %v9054_v1 = vld [vmem:[%s12443_s6 + $0x1e4] ss:$12 sps:$4 sm:$0xff]   ;;  %v9059_v48 = vld [vmem:[%s12443_s6 + $0x1fc] ss:$12 sps:$4 sm:$0xff]   ;;  %v11253_v14 = vpop.permute.xlu0 %8341 }
 0x62d   : > { %4957 = vmatprep.subr.bf16.mxu0 %v9044_v46  ;;  %8036 = vmatprep.subr.bf16.mxu1 %v9045_v47  ;;  %v4149_v21 = vsel %vm516_vm0, %v8338_v12, %v8339_v26  ;;  %v9064_v46 = vld [vmem:[%s12443_s6 + $0x214] ss:$12 sps:$4 sm:$0xff]   ;;  %v9065_v47 = vld [vmem:[%s12443_s6 + $0x2d8] ss:$12 sps:$4 sm:$0xff]   ;;  %v9062_v39 = vld [vmem:[%s12443_s6 + $0x210] ss:$12 sps:$4 sm:$0xff]  }
 0x62e   : > { %4943 = vmatmul.mubr.bf16.gmra.mrb[40].mxu0 %v4203_v19  ;;  %5100 = vmatmul.mubr.bf16.gmra.mrb[40].mxu1 %v4203_v19  ;;  %v4186_v51 = vmax.f32 %v4070_v61, %v4149_v21  ;;  %v9060_v61 = vld [vmem:[%s12443_s6 + $0x2c0] ss:$12 sps:$4 sm:$0xff]   ;;  %v11242_v29 = vpop.permute.xlu1 %8346  ;;  %v9066_v18 = vld [vmem:[%s12443_s6 + $0x218] ss:$12 sps:$4 sm:$0xff]   ;;  %v8343_v19 = vunpack.i.l.bf16 %v11253_v14  ;;  %v9067_v40 = vld [vmem:[%s12443_s6 + $0x228] ss:$12 sps:$4 sm:$0xff]  }
 0x62f   : > { %4958 = vmatpush1.bf16.msra.mxu0 %v9042_v6  ;;  %8037 = vmatpush3.bf16.msra.mxu1 %v9046_v60  ;;  %v8349_v0 = vunpack.i.h.bf16 %v11242_v29  ;;  %v8348_v3 = vunpack.i.l.bf16 %v11242_v29  ;;  %v9069_v6 = vld [vmem:[%s12443_s6 + $0x22c] ss:$12 sps:$4 sm:$0xff]   ;;  %v8344_v60 = vunpack.i.h.bf16 %v11253_v14  ;;  %v9091_v32 = vld [vmem:[%s12443_s6 + $0x2bc] ss:$12 sps:$4 sm:$0xff]  }
 0x630   : > { %4959 = vmatprep.subr.bf16.mxu0 %v9049_v2  ;;  %8038 = vmatprep.subr.bf16.mxu1 %v9050_v38  ;;  %v4201_v30 = vpack.c.bf16 %v4186_v51, %v4181_v23  ;;  %v9070_v2 = vld [vmem:[%s12443_s6 + $0x2f0] ss:$12 sps:$4 sm:$0xff]   ;;  %v4148_v38 = vsel %vm516_vm0, %v8309_v57, %v8338_v12  ;;  %v4152_v45 = vsel %vm516_vm0, %v8319_v34, %v8343_v19  ;;  %v9086_v34 = vld [vmem:[%s12443_s6 + $0x2a0] ss:$12 sps:$4 sm:$0xff]   ;;  %v9095_v56 = vld [vmem:[%s12443_s6 + $0x2e8] ss:$12 sps:$4 sm:$0xff]  }
 0x631   : > { %v4157_v21 = vsel %vm516_vm0, %v8348_v3, %v8349_v0  ;;  %v9074_v57 = vld [vmem:[%s12443_s6 + $0x244] ss:$12 sps:$4 sm:$0xff]   ;;  %v4185_v12 = vmax.f32 %v4069_v37, %v4148_v38  ;;  %v4153_v23 = vsel %vm516_vm0, %v8343_v19, %v8344_v60  ;;  %v4156_v43 = vsel %vm516_vm0, %v8324_v59, %v8348_v3 }
 0x632   : > { %4985 = vmatprep.mubr.bf16.mxu0 %v4201_v30  ;;  %5140 = vmatprep.mubr.bf16.mxu1 %v4201_v30  ;;  %v4191_v37 = vmax.f32 %v4075_v35, %v4153_v23  ;;  %v9080_v35 = vld [vmem:[%s12443_s6 + $0x274] ss:$12 sps:$4 sm:$0xff]   ;;  %v4195_v59 = vmax.f32 %v4079_v44, %v4156_v43  ;;  %v4187_v30 = vmax.f32 %v4071_v33, %v8339_v26  ;;  %v9084_v44 = vld [vmem:[%s12443_s6 + $0x28c] ss:$12 sps:$4 sm:$0xff]   ;;  %v9100_v26 = vld [vmem:[%s12443_s6 + $0x304] ss:$12 sps:$4 sm:$0xff]  }
 0x633   : > { %4960 = vmatpush1.bf16.msra.mxu0 %v9047_v11  ;;  %8039 = vmatpush3.bf16.msra.mxu1 %v9051_v63  ;;  %v4144_v11 = vsel %vm516_vm0, %v8304_v52, %v8333_v36  ;;  %v4196_v52 = vmax.f32 %v4080_v54, %v4157_v21  ;;  %v9085_v36 = vld [vmem:[%s12443_s6 + $0x320] ss:$12 sps:$4 sm:$0x3f]   ;;  %v4190_v5 = vmax.f32 %v4074_v27, %v4152_v45  ;;  %v9088_v27 = vld [vmem:[%s12443_s6 + $0x2a4] ss:$12 sps:$4 sm:$0xff]  }
 0x634   : > { %4961 = vmatprep.subr.bf16.mxu0 %v9054_v1  ;;  %8040 = vmatprep.subr.bf16.mxu1 %v9055_v24  ;;  %v4180_v51 = vmax.f32 %v4064_v55, %v4144_v11  ;;  %v4898_v55 = vand.u32 %v9085_v36, %v9585_v62  ;;  %v9078_v1 = vld [vmem:[%s12443_s6 + $0x270] ss:$12 sps:$4 sm:$0xff]   ;;  %v4202_v33 = vpack.c.bf16 %v4187_v30, %v4182_v22 }
 0x635   : > { %v4206_v63 = vpack.c.bf16 %v4196_v52, %v4191_v37  ;;  %v4205_v58 = vpack.c.bf16 %v4195_v59, %v4190_v5  ;;  %v4197_v53 = vmax.f32 %v4081_v15, %v8349_v0  ;;  %v4192_v50 = vmax.f32 %v4076_v17, %v8344_v60  ;;  %v9092_v17 = vld [vmem:[%s12443_s6 + $0x2d0] ss:$12 sps:$4 sm:$0xff]   ;;  %v9097_v15 = vld [vmem:[%s12443_s6 + $0x2ec] ss:$12 sps:$4 sm:$0xff]  }
 0x636   : > { %v4200_v54 = vpack.c.bf16 %v4185_v12, %v4180_v51  ;;  %v9103_v24 = vld [vmem:[%s12443_s6 + $0x31c] ss:$12 sps:$4 sm:$0x3f]  }
 0x637   : > { %4962 = vmatpush1.bf16.msra.mxu0 %v9052_v28  ;;  %8041 = vmatpush3.bf16.msra.mxu1 %v9056_v42  ;;  %v4207_v8 = vpack.c.bf16 %v4197_v53, %v4192_v50  ;;  %v9098_v28 = vld [vmem:[%s12443_s6 + $0x300] ss:$12 sps:$4 sm:$0xff]   ;;  %v9101_v42 = vld [vmem:[%s12443_s6 + $0x318] ss:$12 sps:$4 sm:$0x3f]  }
 0x638   : > { %4963 = vmatprep.subr.bf16.mxu0 %v9059_v48  ;;  %8042 = vmatprep.subr.bf16.mxu1 %v9060_v61  ;;  %v4895_v48 = vand.u32 %v9103_v24, %v9585_v62  ;;  %v4892_v61 = vand.u32 %v9101_v42, %v9585_v62  ;;  %v5319_v24 = vld [vmem:[%s12445_s8 + $0x28] sm:$0xff] }
 0x63b   : > { %4964 = vmatpush1.bf16.msra.mxu0 %v9057_v31  ;;  %8043 = vmatpush3.bf16.msra.mxu1 %v9061_v41 }
 0x63c   : > { %4965 = vmatprep.subr.bf16.mxu0 %v9064_v46  ;;  %8044 = vmatprep.subr.bf16.mxu1 %v9065_v47 }
 0x63f   : > { %4966 = vmatpush1.bf16.msra.mxu0 %v9062_v39  ;;  %8045 = vmatpush3.bf16.msra.mxu1 %v9066_v18 }
 0x640   : > { %4967 = vmatprep.subr.bf16.mxu0 %v9069_v6  ;;  %8046 = vmatprep.subr.bf16.mxu1 %v9070_v2 }
 0x643   : > { %4968 = vmatpush1.bf16.msra.mxu0 %v9067_v40  ;;  %8047 = vmatpush3.bf16.msra.mxu1 %v9071_v49 }
 0x644   : > { %4969 = vmatprep.subr.bf16.mxu0 %v9074_v57  ;;  %8100 = vmatprep.subr.bf16.mxu1 %v9081_v7 }
 0x646   : > { %5141 = vmatmul.mubr.bf16.vlgmr.msra.gmra.mrb[44].mxu1 %v4200_v54 }
 0x647   : > { %4970 = vmatpush1.bf16.msra.mxu0 %v9072_v13  ;;  %5148 = vmatprep.mubr.bf16.mxu1 %v4206_v63 }
 0x648   : > { %4971 = vmatprep.subr.bf16.mxu0 %v9077_v9  ;;  %8101 = vmatpush3.bf16.msra.mxu1 %v9081_v7 }
 0x649   : > { %8102 = vmatprep.subr.bf16.mxu1 %v4898_v55 }
 0x64b   : > { %4972 = vmatpush1.bf16.msra.mxu0 %v9075_v16 }
 0x64c   : > { %4973 = vmatprep.subr.bf16.mxu0 %v9080_v35  ;;  %8103 = vmatpush3.bf16.msra.mxu1 %v4898_v55 }
 0x64e   : > { %5149 = vmatmul.mubr.bf16.gmra.mrb[48].mxu1 %v4205_v58 }
 0x64f   : > { %4974 = vmatpush1.bf16.msra.mxu0 %v9078_v1  ;;  %8104 = vmatprep.mubr.msk.bf16.mxu1 %vm3119_vm8, %v4202_v33 }
 0x650   : > { %4975 = vmatprep.subr.bf16.mxu0 %v9084_v44 }
 0x653   : > { %4976 = vmatpush1.bf16.msra.mxu0 %v9082_v10 }
 0x654   : > { %4977 = vmatprep.subr.bf16.mxu0 %v9088_v27 }
 0x656   : > { %8105 = vmatmul.mubr.msk.bf16.vlgmr.msra.gmra.mrb[52].mxu1 %vm3119_vm8, %v4207_v8 }
 0x657   : > { %4978 = vmatpush1.bf16.msra.mxu0 %v9086_v34 }
 0x658   : > { %4979 = vmatprep.subr.bf16.mxu0 %v9091_v32 }
 0x65b   : > { %4980 = vmatpush1.bf16.msra.mxu0 %v9089_v25  ;;  %v5314_v25 = vld [vmem:[%s12445_s8] sm:$0xff] }
 0x65c   : > { %4981 = vmatprep.subr.bf16.mxu0 %v9094_v20  ;;  %v5316_v20 = vld [vmem:[%s12445_s8 + $0x10] sm:$0xff] }
 0x65f   : > { %4982 = vmatpush1.bf16.msra.mxu0 %v9092_v17  ;;  %v5318_v17 = vld [vmem:[%s12445_s8 + $0x20] sm:$0xff] }
 0x660   : > { %4983 = vmatprep.subr.bf16.mxu0 %v9097_v15  ;;  %v5315_v15 = vld [vmem:[%s12445_s8 + $0x8] sm:$0xff] }
 0x663   : > { %4984 = vmatpush1.bf16.msra.mxu0 %v9095_v56  ;;  %v5320_v56 = vld [vmem:[%s12445_s8 + $0x30] sm:$0xff] }
 0x664   : > { %5006 = vmatprep.subr.bf16.mxu0 %v9100_v26  ;;  %v5317_v26 = vld [vmem:[%s12445_s8 + $0x18] sm:$0xff] }
 0x666   : > { %4986 = vmatmul.mubr.bf16.vlgmr.msra.gmra.mrb[36].mxu0 %v4200_v54 }
 0x667   : > { %4995 = vmatprep.mubr.bf16.mxu0 %v4206_v63  ;;  %5007 = vmatpush1.bf16.msra.mxu0 %v9098_v28  ;;  %v5321_v28 = vld [vmem:[%s12445_s8 + $0x38] sm:$0xff] }
 0x668   : > { %5008 = vmatprep.subr.bf16.mxu0 %v4895_v48 }
 0x66b   : > { %5009 = vmatpush1.bf16.msra.mxu0 %v4892_v61 }
 0x66e   : > { %4996 = vmatmul.mubr.bf16.gmra.mrb[40].mxu0 %v4205_v58 }
 0x66f   : > { %5038 = vmatprep.mubr.bf16.mxu0 %v9224_v4 }
 0x676   : > { %7755 = vmatmul.mubr.msk.bf16.vlgmr.msra.gmra.mrb[36].mxu0 %vm3119_vm8, %v4202_v33 }
 0x677   : > { %5048 = vmatprep.mubr.bf16.mxu0 %v9224_v4 }
 0x67e   : > { %7756 = vmatmul.mubr.msk.bf16.gmra.mrb[40].mxu0 %vm3119_vm8, %v4207_v8  ;;  %v11429_v8 = vld [vmem:[%s12444_s7 + $0x4] ss:$8 sps:$4 sm:$0xff]  }
 0x67f   : > { %7767 = vmatprep.mubr.msk.bf16.mxu1 %vm5398_vm9, %v11429_v8 }
 0x6f9   : > { %v8020_v31 = vpop.f32.mrb[36].mxu1 }
 0x6fa   : > { %v8021_v29 = vpop.f32.mrb[37].mxu1 }
 0x6fb   : > { %v8022_v41 = vadd.f32 %v8021_v29, %v8020_v31  ;;  %v8023_v46 = vpop.f32.mrb[38].mxu1 }
 0x6fc   : > { %v8024_v47 = vpop.f32.mrb[39].mxu1 }
 0x6fd   : > { %v8025_v14 = vadd.f32 %v8024_v47, %v8023_v46 }
 0x701   : > { %v8026_v0 = vpop.f32.mrb[40].mxu1 }
 0x702   : > { %v8027_v3 = vpop.f32.mrb[41].mxu1 }
 0x703   : > { %v8028_v39 = vadd.f32 %v8027_v3, %v8026_v0  ;;  %v8029_v18 = vpop.f32.mrb[42].mxu1 }
 0x704   : > { %v8030_v6 = vpop.f32.mrb[43].mxu1 }
 0x705   : > { %v8031_v60 = vadd.f32 %v8030_v6, %v8029_v18 }
 0x719   : > { %v8048_v19 = vpop.f32.mrb[44].mxu1 }
 0x71a   : > { %v8049_v2 = vpop.f32.mrb[45].mxu1 }
 0x71b   : > { %v8050_v38 = vadd.f32 %v8049_v2, %v8048_v19  ;;  %v8051_v40 = vpop.f32.mrb[46].mxu1 }
 0x71c   : > { %v8052_v21 = vpop.f32.mrb[47].mxu1 }
 0x71d   : > { %v8053_v11 = vadd.f32 %v8052_v21, %v8051_v40  ;;  %v5143_v49 = vadd.f32 %v8050_v38, %v8022_v41 }
 0x71f   : > { %v5146_v57 = vadd.f32 %v8053_v11, %v8025_v14 }
 0x721   : > { %v8054_v12 = vpop.f32.mrb[48].mxu1 }
 0x722   : > { %v8055_v23 = vpop.f32.mrb[49].mxu1 }
 0x723   : > { %v8056_v7 = vadd.f32 %v8055_v23, %v8054_v12  ;;  %v8057_v52 = vpop.f32.mrb[50].mxu1 }
 0x724   : > { %v8058_v36 = vpop.f32.mrb[51].mxu1 }
 0x725   : > { %v8059_v51 = vadd.f32 %v8058_v36, %v8057_v52  ;;  %v5151_v13 = vadd.f32 %v8056_v7, %v8028_v39 }
 0x727   : > { %v5154_v37 = vadd.f32 %v8059_v51, %v8031_v60 }
 0x729   : > { %v8106_v9 = vpop.f32.mrb[52].mxu1 }
 0x72a   : > { %v5200_v54 = vadd.f32 %v8106_v9, %v5151_v13  ;;  %v5191_v63 = vpop.f32.mrb[53].mxu1 }
 0x72b   : > { %v5192_v43 = vadd.f32 %v5191_v63, %v5143_v49  ;;  %v8107_v55 = vpop.f32.mrb[54].mxu1 }
 0x72c   : > { %v5203_v16 = vadd.f32 %v8107_v55, %v5154_v37  ;;  %v5194_v35 = vpop.f32.mrb[55].mxu1 }
 0x72d   : > { %v5195_v45 = vadd.f32 %v5194_v35, %v5146_v57 }
 0x72e   : > { %v11396_v59 = vpack.c.bf16 %v5203_v16, %v5200_v54 }
 0x72f   : > { %v11398_v30 = vpack.c.bf16 %v5195_v45, %v5192_v43 }
 0x730   : > { %5228 = vrot.lane.b32.xlu0 %v11396_v59, %s9221_s14 }
 0x731   : > { %5222 = vrot.lane.b32.xlu1 %v11398_v30, %s9221_s14 }
 0x734   : > { %5250 = vrot.lane.b32.xlu0 %v11396_v59, %s9222_s15 }
 0x735   : > { %5244 = vrot.lane.b32.xlu1 %v11398_v30, %s9222_s15 }
 0x749   : > { %v5040_v1 = vpop.f32.mrb[36].mxu0 }
 0x74a   : > { %v5042_v5 = vpop.f32.mrb[37].mxu0 }
 0x74b   : > { %v5044_v22 = vpop.f32.mrb[38].mxu0 }
 0x74c   : > { %v5206_v44 = vpack.c.bf16 %v5044_v22, %v5040_v1  ;;  %v5046_v58 = vpop.f32.mrb[39].mxu0  ;;  %v9107_v22 = vld [vmem:[%s12444_s7 + $0x14] ss:$8 sps:$4 sm:$0xff]  }
 0x74d   : > { %v5207_v33 = vpack.c.bf16 %v5046_v58, %v5042_v5  ;;  %v9106_v5 = vld [vmem:[%s12444_s7] ss:$8 sps:$4 sm:$0xff]   ;;  %v9110_v58 = vld [vmem:[%s12444_s7 + $0x24] ss:$8 sps:$4 sm:$0xff]  }
 0x74e   : > { %5218 = vrot.lane.b32.xlu0 %v5206_v44, %s9221_s14 }
 0x74f   : > { %5411 = vmatprep.subr.bf16.mxu1 %v5207_v33 }
 0x750   : > { %5412 = vmatpush1.bf16.msra.mxu1 %v5206_v44 }
 0x751   : > { %v5050_v10 = vpop.f32.mrb[40].mxu0 }
 0x752   : > { %5240 = vrot.lane.b32.xlu0 %v5206_v44, %s9222_s15  ;;  %v5052_v27 = vpop.f32.mrb[41].mxu0 }
 0x753   : > { %v5054_v53 = vpop.f32.mrb[42].mxu0 }
 0x754   : > { %v5209_v50 = vpack.c.bf16 %v5054_v53, %v5050_v10  ;;  %v5056_v34 = vpop.f32.mrb[43].mxu0  ;;  %v9116_v10 = vld [vmem:[%s12446_s9] ss:$8 sps:$4 sm:$0xff]   ;;  %v9121_v53 = vld [vmem:[%s12446_s9 + $0x14] ss:$8 sps:$4 sm:$0xff]  }
 0x755   : > { %v5210_v32 = vpack.c.bf16 %v5056_v34, %v5052_v27  ;;  %v9118_v27 = vld [vmem:[%s12446_s9 + $0x4] ss:$8 sps:$4 sm:$0xff]  }
 0x756   : > { %5220 = vrot.lane.b32.xlu0 %v5207_v33, %s9221_s14  ;;  %5224 = vrot.lane.b32.xlu1 %v5209_v50, %s9221_s14  ;;  %v9124_v34 = vld [vmem:[%s12446_s9 + $0x24] ss:$8 sps:$4 sm:$0xff]  }
 0x757   : > { %5413 = vmatprep.subr.bf16.mxu1 %v5210_v32  ;;  %5953 = vmatprep.subr.bf16.mxu0 %v9118_v27 }
 0x758   : > { %5414 = vmatpush1.bf16.msra.mxu1 %v5209_v50  ;;  %5954 = vmatpush1.bf16.msra.mxu0 %v9116_v10 }
 0x759   : > { %5955 = vmatprep.subr.bf16.mxu0 %v9121_v53 }
 0x75a   : > { %5242 = vrot.lane.b32.xlu0 %v5207_v33, %s9222_s15  ;;  %5246 = vrot.lane.b32.xlu1 %v5209_v50, %s9222_s15 }
 0x75e   : > { %5264 = vrot.lane.b32.xlu0 %v5207_v33, %s9223_s16  ;;  %5226 = vrot.lane.b32.xlu1 %v5210_v32, %s9221_s14 }
 0x762   : > { %5262 = vrot.lane.b32.xlu0 %v5206_v44, %s9223_s16  ;;  %5266 = vrot.lane.b32.xlu1 %v11398_v30, %s9223_s16 }
 0x766   : > { %5272 = vrot.lane.b32.xlu0 %v11396_v59, %s9223_s16  ;;  %5248 = vrot.lane.b32.xlu1 %v5210_v32, %s9222_s15 }
 0x76a   : > { %5286 = vrot.lane.b32.xlu0 %v5207_v33, %s9225_s17  ;;  %5268 = vrot.lane.b32.xlu1 %v5209_v50, %s9223_s16  ;;  %v9115_v33 = vld [vmem:[%s12444_s7 + $0x30] ss:$8 sps:$4 sm:$0xff]  }
 0x76e   : > { %5284 = vrot.lane.b32.xlu0 %v5206_v44, %s9225_s17  ;;  %5270 = vrot.lane.b32.xlu1 %v5210_v32, %s9223_s16  ;;  %v9109_v44 = vld [vmem:[%s12444_s7 + $0x10] ss:$8 sps:$4 sm:$0xff]  }
 0x772   : > { %5294 = vrot.lane.b32.xlu0 %v11396_v59, %s9225_s17  ;;  %5288 = vrot.lane.b32.xlu1 %v11398_v30, %s9225_s17 }
 0x776   : > { %5324 = vperm.xlu0 %8253, %v5314_v25   ;;  %5292 = vrot.lane.b32.xlu1 %v5210_v32, %s9225_s17  ;;  %v9122_v32 = vld [vmem:[%s12446_s9 + $0x20] ss:$8 sps:$4 sm:$0xff]   ;;  %v9125_v25 = vld [vmem:[%s12446_s9 + $0x30] ss:$8 sps:$4 sm:$0xff]  }
 0x77a   : > { %5334 = vperm.xlu0 %8253, %v5316_v20   ;;  %5290 = vrot.lane.b32.xlu1 %v5209_v50, %s9225_s17  ;;  %v9119_v50 = vld [vmem:[%s12446_s9 + $0x10] ss:$8 sps:$4 sm:$0xff]   ;;  %v9130_v20 = vld [vmem:[%s12446_s9 + $0x44] ss:$8 sps:$4 sm:$0xff]  }
 0x77b   : > { %5956 = vmatpush1.bf16.msra.mxu0 %v9119_v50 }
 0x77c   : > { %5957 = vmatprep.subr.bf16.mxu0 %v9124_v34 }
 0x77e   : > { %5344 = vperm.xlu0 %8253, %v5318_v17   ;;  %5329 = vperm.xlu1 %8254, %v5315_v15   ;;  %v9128_v17 = vld [vmem:[%s12446_s9 + $0x40] ss:$8 sps:$4 sm:$0xff]   ;;  %v9133_v15 = vld [vmem:[%s12446_s9 + $0x54] ss:$8 sps:$4 sm:$0xff]  }
 0x77f   : > { %5958 = vmatpush1.bf16.msra.mxu0 %v9122_v32 }
 0x782   : > { %5354 = vperm.xlu0 %8253, %v5320_v56   ;;  %5339 = vperm.xlu1 %8254, %v5317_v26   ;;  %v9131_v56 = vld [vmem:[%s12446_s9 + $0x50] ss:$8 sps:$4 sm:$0xff]   ;;  %v9136_v26 = vld [vmem:[%s12446_s9 + $0x64] ss:$8 sps:$4 sm:$0xff]  }
 0x786   : > { %5349 = vperm.xlu1 %8254, %v5319_v24   ;;  %v9134_v24 = vld [vmem:[%s12446_s9 + $0x60] ss:$8 sps:$4 sm:$0xff]  }
 0x78a   : > { %5359 = vperm.xlu1 %8254, %v5321_v28   ;;  %v9139_v28 = vld [vmem:[%s12446_s9 + $0x74] ss:$8 sps:$4 sm:$0xff]  }
 0x7a2   : > { %v11463_v42 = vpop.permute.xlu0 %5228 }
 0x7a3   : > { %v11467_v61 = vpop.permute.xlu1 %5222 }
 0x7a6   : > { %v11465_v48 = vpop.permute.xlu0 %5250 }
 0x7a7   : > { %v11469_v29 = vpop.permute.xlu1 %5244 }
 0x7c0   : > { %v5219_v31 = vpop.permute.xlu0 %5218 }
 0x7c4   : > { %v5241_v41 = vpop.permute.xlu0 %5240 }
 0x7c8   : > { %v5221_v46 = vpop.permute.xlu0 %5220  ;;  %v5225_v47 = vpop.permute.xlu1 %5224 }
 0x7c9   : > { %v5231_v14 = vsel %vm516_vm0, %v5221_v46, %v11467_v61  ;;  %v5230_v0 = vsel %vm516_vm0, %v5219_v31, %v5221_v46  ;;  %v9145_v31 = vld [vmem:[%s12446_s9 + $0x94] ss:$8 sps:$4 sm:$0xff]   ;;  %v9146_v46 = vld [vmem:[%s12446_s9 + $0xa0] ss:$8 sps:$4 sm:$0xff]  }
 0x7ca   : > { %5415 = vmatprep.subr.bf16.mxu1 %v5231_v14  ;;  %v9149_v14 = vld [vmem:[%s12446_s9 + $0xb0] ss:$8 sps:$4 sm:$0xff]  }
 0x7cb   : > { %5416 = vmatpush1.bf16.msra.mxu1 %v5230_v0  ;;  %v9154_v0 = vld [vmem:[%s12446_s9 + $0xc4] ss:$8 sps:$4 sm:$0xff]  }
 0x7cc   : > { %v5243_v3 = vpop.permute.xlu0 %5242  ;;  %v5247_v39 = vpop.permute.xlu1 %5246 }
 0x7cd   : > { %v5253_v2 = vsel %vm552_vm1, %v5243_v3, %v11469_v29  ;;  %v5252_v21 = vsel %vm552_vm1, %v5241_v41, %v5243_v3  ;;  %v9148_v41 = vld [vmem:[%s12446_s9 + $0xa4] ss:$8 sps:$4 sm:$0xff]   ;;  %v9152_v3 = vld [vmem:[%s12446_s9 + $0xc0] ss:$8 sps:$4 sm:$0xff]  }
 0x7d0   : > { %v5265_v18 = vpop.permute.xlu0 %5264  ;;  %v5227_v6 = vpop.permute.xlu1 %5226 }
 0x7d1   : > { %v5233_v60 = vsel %vm516_vm0, %v5227_v6, %v11463_v42  ;;  %v5232_v19 = vsel %vm516_vm0, %v5225_v47, %v5227_v6  ;;  %v9151_v47 = vld [vmem:[%s12446_s9 + $0xb4] ss:$8 sps:$4 sm:$0xff]  }
 0x7d2   : > { %5417 = vmatprep.subr.bf16.mxu1 %v5233_v60 }
 0x7d3   : > { %5418 = vmatpush1.bf16.msra.mxu1 %v5232_v19 }
 0x7d4   : > { %v5263_v38 = vpop.permute.xlu0 %5262  ;;  %v5267_v40 = vpop.permute.xlu1 %5266  ;;  %5419 = vmatprep.subr.bf16.mxu1 %v5253_v2 }
 0x7d5   : > { %v5275_v23 = vsel %vm588_vm2, %v5265_v18, %v5267_v40  ;;  %v5274_v36 = vsel %vm588_vm2, %v5263_v38, %v5265_v18  ;;  %v9155_v18 = vld [vmem:[%s12446_s9 + $0xd0] ss:$8 sps:$4 sm:$0xff]  }
 0x7d7   : > { %5420 = vmatpush1.bf16.msra.mxu1 %v5252_v21 }
 0x7d8   : > { %v5273_v11 = vpop.permute.xlu0 %5272  ;;  %v5249_v49 = vpop.permute.xlu1 %5248 }
 0x7d9   : > { %v5254_v57 = vsel %vm552_vm1, %v5247_v39, %v5249_v49  ;;  %v5255_v12 = vsel %vm552_vm1, %v5249_v49, %v11465_v48  ;;  %v9157_v39 = vld [vmem:[%s12446_s9 + $0xd4] ss:$8 sps:$4 sm:$0xff]  }
 0x7da   : > { %5421 = vmatprep.subr.bf16.mxu1 %v5255_v12 }
 0x7db   : > { %5422 = vmatpush1.bf16.msra.mxu1 %v5254_v57 }
 0x7dc   : > { %v5287_v7 = vpop.permute.xlu0 %5286  ;;  %v5269_v52 = vpop.permute.xlu1 %5268  ;;  %5423 = vmatprep.subr.bf16.mxu1 %v5275_v23 }
 0x7df   : > { %5424 = vmatpush1.bf16.msra.mxu1 %v5274_v36 }
 0x7e0   : > { %v5271_v51 = vpop.permute.xlu1 %5270  ;;  %v5285_v9 = vpop.permute.xlu0 %5284 }
 0x7e1   : > { %v5276_v13 = vsel %vm588_vm2, %v5269_v52, %v5271_v51  ;;  %v5277_v37 = vsel %vm588_vm2, %v5271_v51, %v5273_v11  ;;  %v5296_v43 = vsel %vm624_vm3, %v5285_v9, %v5287_v7  ;;  %v9158_v9 = vld [vmem:[%s12446_s9 + $0xe0] ss:$8 sps:$4 sm:$0xff]  }
 0x7e2   : > { %5425 = vmatprep.subr.bf16.mxu1 %v5277_v37 }
 0x7e3   : > { %5426 = vmatpush1.bf16.msra.mxu1 %v5276_v13  ;;  %v9160_v13 = vld [vmem:[%s12446_s9 + $0xe4] ss:$8 sps:$4 sm:$0xff]  }
 0x7e4   : > { %v5289_v54 = vpop.permute.xlu1 %5288  ;;  %v5295_v55 = vpop.permute.xlu0 %5294 }
 0x7e5   : > { %v5297_v63 = vsel %vm624_vm3, %v5287_v7, %v5289_v54 }
 0x7e6   : > { %5427 = vmatprep.subr.bf16.mxu1 %v5297_v63 }
 0x7e7   : > { %5428 = vmatpush1.bf16.msra.mxu1 %v5296_v43 }
 0x7e8   : > { %v5293_v16 = vpop.permute.xlu1 %5292 }
 0x7e9   : > { %v5299_v35 = vsel %vm624_vm3, %v5293_v16, %v5295_v55 }
 0x7ea   : > { %5429 = vmatprep.subr.bf16.mxu1 %v5299_v35 }
 0x7ec   : > { %v5291_v45 = vpop.permute.xlu1 %5290 }
 0x7ed   : > { %v5298_v1 = vsel %vm624_vm3, %v5291_v45, %v5293_v16 }
 0x7ee   : > { %5430 = vmatpush1.bf16.msra.mxu1 %v5298_v1  ;;  %v9163_v1 = vld [vmem:[%s12446_s9 + $0xf4] ss:$8 sps:$4 sm:$0xff]  }
 0x7ef   : > { %5484 = vmatprep.subr.bf16.mxu1 %v9224_v4 }
 0x7f1   : > { %5444 = vmatmul.mubr.bf16.vlgmr.msra.gmra.mrb[56].mxu1 %v9106_v5 }
 0x7f2   : > { %5485 = vmatpush1.bf16.msra.mxu1 %v11398_v30  ;;  %7768 = vmatprep.mubr.msk.bf16.mxu1 %vm5398_vm9, %v9107_v22  ;;  %v9112_v30 = vld [vmem:[%s12444_s7 + $0x20] ss:$8 sps:$4 sm:$0xff]  }
 0x7f3   : > { %5486 = vmatprep.subr.bf16.mxu1 %v9224_v4 }
 0x7f5   : > { %v5325_v37 = vpop.permute.xlu0 %5324 }
 0x7f6   : > { %5487 = vmatpush1.bf16.msra.mxu1 %v11396_v59  ;;  %v9113_v59 = vld [vmem:[%s12444_s7 + $0x34] ss:$8 sps:$4 sm:$0xff]  }
 0x7f7   : > { %5488 = vmatprep.subr.bf16.mxu1 %v9224_v4 }
 0x7f9   : > { %5454 = vmatmul.mubr.bf16.gmra.mrb[60].mxu1 %v9109_v44  ;;  %v5335_v34 = vpop.permute.xlu0 %5334 }
 0x7fa   : > { %5489 = vmatpush1.bf16.msra.mxu1 %v11467_v61  ;;  %7769 = vmatprep.mubr.msk.bf16.mxu1 %vm5398_vm9, %v9110_v58  ;;  %v9140_v61 = vld [vmem:[%s12446_s9 + $0x80] ss:$8 sps:$4 sm:$0xff]  }
 0x7fb   : > { %5490 = vmatprep.subr.bf16.mxu1 %v9224_v4 }
 0x7fd   : > { %v5330_v63 = vpop.permute.xlu1 %5329 }
 0x7fe   : > { %5491 = vmatpush1.bf16.msra.mxu1 %v11463_v42  ;;  %v9137_v42 = vld [vmem:[%s12446_s9 + $0x70] ss:$8 sps:$4 sm:$0xff]  }
 0x7ff   : > { %5492 = vmatprep.subr.bf16.mxu1 %v9224_v4 }
 0x801   : > { %5464 = vmatmul.mubr.bf16.gmra.mrb[64].mxu1 %v9112_v30 }
 0x802   : > { %5493 = vmatpush1.bf16.msra.mxu1 %v11469_v29  ;;  %7770 = vmatprep.mubr.msk.bf16.mxu1 %vm5398_vm9, %v9113_v59  ;;  %v9143_v29 = vld [vmem:[%s12446_s9 + $0x90] ss:$8 sps:$4 sm:$0xff]  }
 0x803   : > { %5494 = vmatprep.subr.bf16.mxu1 %v9224_v4 }
 0x806   : > { %5495 = vmatpush1.bf16.msra.mxu1 %v11465_v48  ;;  %v9142_v48 = vld [vmem:[%s12446_s9 + $0x84] ss:$8 sps:$4 sm:$0xff]  }
 0x807   : > { %5496 = vmatprep.subr.bf16.mxu1 %v9224_v4 }
 0x809   : > { %5474 = vmatmul.mubr.bf16.gmra.mrb[68].mxu1 %v9115_v33 }
 0x80a   : > { %5497 = vmatpush1.bf16.msra.mxu1 %v5267_v40  ;;  %7771 = vmatprep.mubr.msk.bf16.mxu1 %vm5398_vm9, %v11429_v8  ;;  %v9127_v8 = vld [vmem:[%s12446_s9 + $0x34] ss:$8 sps:$4 sm:$0xff]  }
 0x80b   : > { %5498 = vmatprep.subr.bf16.mxu1 %v9224_v4  ;;  %5959 = vmatprep.subr.bf16.mxu0 %v9127_v8 }
 0x80c   : > { %5960 = vmatpush1.bf16.msra.mxu0 %v9125_v25 }
 0x80d   : > { %5961 = vmatprep.subr.bf16.mxu0 %v9130_v20  ;;  %v5340_v20 = vpop.permute.xlu1 %5339 }
 0x80e   : > { %5499 = vmatpush1.bf16.msra.mxu1 %v5273_v11 }
 0x80f   : > { %5500 = vmatprep.subr.bf16.mxu1 %v9224_v4 }
 0x810   : > { %5962 = vmatpush1.bf16.msra.mxu0 %v9128_v17 }
 0x811   : > { %5963 = vmatprep.subr.bf16.mxu0 %v9133_v15  ;;  %v9166_v15 = vld [vmem:[%s12446_s9 + $0x104] ss:$8 sps:$4 sm:$0xff]  }
 0x812   : > { %5501 = vmatpush1.bf16.msra.mxu1 %v5289_v54 }
 0x813   : > { %5502 = vmatprep.subr.bf16.mxu1 %v9224_v4 }
 0x814   : > { %5964 = vmatpush1.bf16.msra.mxu0 %v9131_v56 }
 0x815   : > { %5965 = vmatprep.subr.bf16.mxu0 %v9136_v26 }
 0x816   : > { %5503 = vmatpush1.bf16.msra.mxu1 %v5295_v55 }
 0x818   : > { %5966 = vmatpush1.bf16.msra.mxu0 %v9134_v24 }
 0x819   : > { %5517 = vmatmul.mubr.bf16.vlgmr.msra.gmra.mrb[72].mxu1 %v9106_v5  ;;  %5967 = vmatprep.subr.bf16.mxu0 %v9139_v28 }
 0x81a   : > { %7772 = vmatprep.mubr.msk.bf16.mxu1 %vm5398_vm9, %v9107_v22  ;;  %v9161_v22 = vld [vmem:[%s12446_s9 + $0xf0] ss:$8 sps:$4 sm:$0xff]  }
 0x81c   : > { %5968 = vmatpush1.bf16.msra.mxu0 %v9137_v42 }
 0x81d   : > { %5969 = vmatprep.subr.bf16.mxu0 %v9142_v48 }
 0x820   : > { %5970 = vmatpush1.bf16.msra.mxu0 %v9140_v61 }
 0x821   : > { %5525 = vmatmul.mubr.bf16.gmra.mrb[76].mxu1 %v9109_v44  ;;  %5971 = vmatprep.subr.bf16.mxu0 %v9145_v31 }
 0x822   : > { %7773 = vmatprep.mubr.msk.bf16.mxu1 %vm5398_vm9, %v9110_v58 }
 0x824   : > { %5972 = vmatpush1.bf16.msra.mxu0 %v9143_v29 }
 0x825   : > { %5973 = vmatprep.subr.bf16.mxu0 %v9148_v41 }
 0x828   : > { %5974 = vmatpush1.bf16.msra.mxu0 %v9146_v46 }
 0x829   : > { %5533 = vmatmul.mubr.bf16.gmra.mrb[80].mxu1 %v9112_v30  ;;  %5975 = vmatprep.subr.bf16.mxu0 %v9151_v47 }
 0x82a   : > { %7774 = vmatprep.mubr.msk.bf16.mxu1 %vm5398_vm9, %v9113_v59 }
 0x82c   : > { %5976 = vmatpush1.bf16.msra.mxu0 %v9149_v14 }
 0x82d   : > { %5977 = vmatprep.subr.bf16.mxu0 %v9154_v0 }
 0x830   : > { %5978 = vmatpush1.bf16.msra.mxu0 %v9152_v3 }
 0x831   : > { %5541 = vmatmul.mubr.bf16.gmra.mrb[84].mxu1 %v9115_v33  ;;  %5979 = vmatprep.subr.bf16.mxu0 %v9157_v39  ;;  %v5345_v39 = vpop.permute.xlu0 %5344 }
 0x834   : > { %5980 = vmatpush1.bf16.msra.mxu0 %v9155_v18 }
 0x835   : > { %5981 = vmatprep.subr.bf16.mxu0 %v9160_v13 }
 0x838   : > { %5982 = vmatpush1.bf16.msra.mxu0 %v9158_v9 }
 0x839   : > { %5983 = vmatprep.subr.bf16.mxu0 %v9163_v1 }
 0x83c   : > { %5984 = vmatpush1.bf16.msra.mxu0 %v9161_v22 }
 0x83d   : > { %6026 = vmatprep.subr.bf16.mxu0 %v9166_v15 }
 0x8c4   : > { %v5445_v6 = vpop.f32.mrb[56].mxu1 }
 0x8c5   : > { %v5447_v60 = vpop.f32.mrb[57].mxu1  ;;  %v11654_v44 = vadd.f32 %v5445_v6, %v5325_v37 }
 0x8c6   : > { %v5449_v19 = vpop.f32.mrb[58].mxu1  ;;  %v11640_v54 = vadd.f32 %v5447_v60, %v5325_v37 }
 0x8c7   : > { %v5451_v2 = vpop.f32.mrb[59].mxu1  ;;  %v11642_v55 = vadd.f32 %v5449_v19, %v5330_v63  ;;  %v5549_v32 = vmax.f32 %v11654_v44, 0.0  ;;  %v5350_v19 = vpop.permute.xlu1 %5349 }
 0x8c8   : > { %v11644_v16 = vadd.f32 %v5451_v2, %v5330_v63  ;;  %v5550_v58 = vmax.f32 %v11640_v54, 0.0 }
 0x8c9   : > { %v5552_v10 = vmax.f32 %v11642_v55, 0.0 }
 0x8ca   : > { %v5553_v27 = vmax.f32 %v11644_v16, 0.0 }
 0x8cb   : > { %v8360_v56 = vpack.i.bf16 %v5552_v10, %v5549_v32 }
 0x8cc   : > { %v5455_v38 = vpop.f32.mrb[60].mxu1 }
 0x8cd   : > { %v5457_v40 = vpop.f32.mrb[61].mxu1  ;;  %v11689_v61 = vadd.f32 %v5455_v38, %v5335_v34 }
 0x8ce   : > { %v5459_v21 = vpop.f32.mrb[62].mxu1  ;;  %v11668_v8 = vadd.f32 %v5457_v40, %v5335_v34 }
 0x8cf   : > { %v5461_v11 = vpop.f32.mrb[63].mxu1  ;;  %v11682_v26 = vadd.f32 %v5459_v21, %v5340_v20  ;;  %v5555_v18 = vmax.f32 %v11689_v61, 0.0 }
 0x8d0   : > { %v11684_v24 = vadd.f32 %v5461_v11, %v5340_v20  ;;  %v5556_v31 = vmax.f32 %v11668_v8, 0.0 }
 0x8d1   : > { %v5558_v47 = vmax.f32 %v11682_v26, 0.0 }
 0x8d2   : > { %v5559_v14 = vmax.f32 %v11684_v24, 0.0 }
 0x8d3   : > { %v8375_v38 = vpack.i.bf16 %v5558_v47, %v5555_v18 }
 0x8d4   : > { %v11620_v49 = vpop.f32.mrb[64].mxu1 }
 0x8d5   : > { %v5467_v57 = vpop.f32.mrb[65].mxu1 }
 0x8d6   : > { %v11622_v12 = vpop.f32.mrb[66].mxu1  ;;  %v11704_v6 = vadd.f32 %v5467_v57, %v5345_v39 }
 0x8d7   : > { %v11624_v23 = vpop.f32.mrb[67].mxu1  ;;  %v11716_v40 = vadd.f32 %v11622_v12, %v5350_v19 }
 0x8d8   : > { %v11719_v21 = vadd.f32 %v11624_v23, %v5350_v19  ;;  %v5562_v9 = vmax.f32 %v11704_v6, 0.0 }
 0x8d9   : > { %v5564_v23 = vmax.f32 %v11716_v40, 0.0 }
 0x8dc   : > { %v11626_v7 = vpop.f32.mrb[68].mxu1 }
 0x8dd   : > { %v11628_v52 = vpop.f32.mrb[69].mxu1 }
 0x8de   : > { %v11630_v36 = vpop.f32.mrb[70].mxu1 }
 0x8df   : > { %v11632_v51 = vpop.f32.mrb[71].mxu1 }
 0x8ec   : > { %v5518_v43 = vpop.f32.mrb[72].mxu1 }
 0x8ed   : > { %v11646_v35 = vadd.f32 %v5518_v43, %v5325_v37  ;;  %v5520_v45 = vpop.f32.mrb[73].mxu1  ;;  %v11725_v37 = vadd.f32 %v11620_v49, %v5345_v39 }
 0x8ee   : > { %v5521_v5 = vpop.f32.mrb[74].mxu1  ;;  %v5565_v45 = vmax.f32 %v11719_v21, 0.0 }
 0x8ef   : > { %v5551_v30 = vmax.f32 %v11646_v35, 0.0  ;;  %v11658_v59 = vadd.f32 %v5521_v5, %v5330_v63  ;;  %v5523_v33 = vpop.f32.mrb[75].mxu1  ;;  %v5355_v5 = vpop.permute.xlu0 %5354  ;;  %v5561_v22 = vmax.f32 %v11725_v37, 0.0 }
 0x8f0   : > { %v11741_v33 = vadd.f32 %v11628_v52, %v5355_v5 }
 0x8f1   : > { %v8350_v53 = vpack.i.bf16 %v5551_v30, %v5550_v58  ;;  %v5554_v50 = vmax.f32 %v11658_v59, 0.0 }
 0x8f3   : > { %v8355_v25 = vpack.i.bf16 %v5554_v50, %v5553_v27  ;;  %8351 = vrot.lane.b32.xlu0 %v8350_v53, %s9221_s14 }
 0x8f4   : > { %v5526_v17 = vpop.f32.mrb[76].mxu1 }
 0x8f5   : > { %v11686_v28 = vadd.f32 %v5526_v17, %v5335_v34  ;;  %v5528_v42 = vpop.f32.mrb[77].mxu1  ;;  %8356 = vrot.lane.b32.xlu1 %v8355_v25, %s9221_s14  ;;  %v5360_v34 = vpop.permute.xlu1 %5359 }
 0x8f6   : > { %v5529_v48 = vpop.f32.mrb[78].mxu1  ;;  %v11753_v17 = vadd.f32 %v11630_v36, %v5360_v34  ;;  %v11756_v52 = vadd.f32 %v11632_v51, %v5360_v34 }
 0x8f7   : > { %v5557_v29 = vmax.f32 %v11686_v28, 0.0  ;;  %v11693_v41 = vadd.f32 %v5529_v48, %v5340_v20  ;;  %v5531_v46 = vpop.f32.mrb[79].mxu1  ;;  %8361 = vrot.lane.b32.xlu0 %v8360_v56, %s9221_s14  ;;  %v8390_v20 = vpack.i.bf16 %v5564_v23, %v5561_v22  ;;  %v11762_v48 = vadd.f32 %v11626_v7, %v5355_v5 }
 0x8f8   : > { %v5568_v46 = vmax.f32 %v11741_v33, 0.0  ;;  %v5570_v51 = vmax.f32 %v11753_v17, 0.0 }
 0x8f9   : > { %v8365_v0 = vpack.i.bf16 %v5557_v29, %v5556_v31  ;;  %v5560_v3 = vmax.f32 %v11693_v41, 0.0 }
 0x8fb   : > { %v8370_v60 = vpack.i.bf16 %v5560_v3, %v5559_v14  ;;  %8366 = vrot.lane.b32.xlu1 %v8365_v0, %s9221_s14 }
 0x8fc   : > { %v5534_v2 = vpop.f32.mrb[80].mxu1 }
 0x8fd   : > { %v11721_v11 = vadd.f32 %v5534_v2, %v5345_v39  ;;  %v5536_v57 = vpop.f32.mrb[81].mxu1  ;;  %8371 = vrot.lane.b32.xlu0 %v8370_v60, %s9221_s14  ;;  %v5571_v60 = vmax.f32 %v11756_v52, 0.0  ;;  %v5567_v2 = vmax.f32 %v11762_v48, 0.0 }
 0x8fe   : > { %v5537_v13 = vpop.f32.mrb[82].mxu1 }
 0x8ff   : > { %v12453_v63 = vmax.f32 %v11721_v11, 0.0  ;;  %v11729_v43 = vadd.f32 %v5537_v13, %v5350_v19  ;;  %v5539_v12 = vpop.f32.mrb[83].mxu1  ;;  %8376 = vrot.lane.b32.xlu1 %v8375_v38, %s9221_s14  ;;  %v8405_v57 = vpack.i.bf16 %v5570_v51, %v5567_v2 }
 0x901   : > { %v8380_v1 = vpack.i.bf16 %v12453_v63, %v5562_v9  ;;  %v12454_v49 = vmax.f32 %v11729_v43, 0.0  ;;  %v12470_v35 = vmax.f32 %v11729_v43, 0.0 }
 0x903   : > { %v8385_v53 = vpack.i.bf16 %v12454_v49, %v5565_v45  ;;  %8381 = vrot.lane.b32.xlu0 %v8380_v1, %s9221_s14 }
 0x904   : > { %v5542_v25 = vpop.f32.mrb[84].mxu1 }
 0x905   : > { %v11758_v15 = vadd.f32 %v5542_v25, %v5355_v5  ;;  %v5544_v56 = vpop.f32.mrb[85].mxu1  ;;  %8386 = vrot.lane.b32.xlu1 %v8385_v53, %s9221_s14 }
 0x906   : > { %v5545_v42 = vpop.f32.mrb[86].mxu1 }
 0x907   : > { %v12451_v0 = vmax.f32 %v11758_v15, 0.0  ;;  %v11766_v39 = vadd.f32 %v5545_v42, %v5360_v34  ;;  %v5547_v36 = vpop.f32.mrb[87].mxu1  ;;  %8391 = vrot.lane.b32.xlu0 %v8390_v20, %s9221_s14 }
 0x909   : > { %v8395_v19 = vpack.i.bf16 %v12451_v0, %v5568_v46  ;;  %v12452_v7 = vmax.f32 %v11766_v39, 0.0  ;;  %v12472_v41 = vmax.f32 %v11766_v39, 0.0 }
 0x90b   : > { %v8400_v38 = vpack.i.bf16 %v12452_v7, %v5571_v60  ;;  %8396 = vrot.lane.b32.xlu1 %v8395_v19, %s9221_s14 }
 0x90d   : > { %8401 = vrot.lane.b32.xlu0 %v8400_v38, %s9221_s14 }
 0x90f   : > { %8406 = vrot.lane.b32.xlu1 %v8405_v57, %s9221_s14  ;;  %v9169_v57 = vld [vmem:[%s12446_s9 + $0x114] ss:$8 sps:$4 sm:$0x3f]  }
 0x910   : > { %v5951_v44 = vand.u32 %v9169_v57, %v9585_v62 }
 0x965   : > { %v11788_v13 = vpop.permute.xlu0 %8351 }
 0x966   : > { %v8354_v12 = vunpack.i.h.bf16 %v11788_v13  ;;  %v8353_v1 = vunpack.i.l.bf16 %v11788_v13 }
 0x967   : > { %v11792_v5 = vpop.permute.xlu1 %8356 }
 0x968   : > { %v5646_v53 = vsel %vm516_vm0, %v8353_v1, %v8354_v12  ;;  %v8359_v34 = vunpack.i.h.bf16 %v11792_v5  ;;  %v8358_v25 = vunpack.i.l.bf16 %v11792_v5  ;;  %v5687_v52 = vmax.f32 %v5551_v30, %v8354_v12 }
 0x969   : > { %v8362_v20 = vpop.permute.xlu0 %8361  ;;  %v5686_v19 = vmax.f32 %v5550_v58, %v5646_v53 }
 0x96a   : > { %v5648_v56 = vsel %vm516_vm0, %v8358_v25, %v8359_v34  ;;  %v8364_v42 = vunpack.i.h.bf16 %v8362_v20  ;;  %v8363_v36 = vunpack.i.l.bf16 %v8362_v20  ;;  %v5690_v33 = vmax.f32 %v5554_v50, %v8359_v34 }
 0x96b   : > { %v5689_v38 = vmax.f32 %v5553_v27, %v5648_v56  ;;  %v9164_v27 = vld [vmem:[%s12446_s9 + $0x100] ss:$8 sps:$4 sm:$0xff]  }
 0x96c   : > { %v5647_v0 = vsel %vm516_vm0, %v8364_v42, %v8358_v25  ;;  %v5645_v7 = vsel %vm516_vm0, %v8363_v36, %v8353_v1  ;;  %v9167_v1 = vld [vmem:[%s12446_s9 + $0x110] ss:$8 sps:$4 sm:$0x3f]   ;;  %v5711_v48 = vpack.c.bf16 %v5690_v33, %v5687_v52 }
 0x96d   : > { %v5688_v63 = vmax.f32 %v5552_v10, %v5647_v0  ;;  %v5685_v20 = vmax.f32 %v5549_v32, %v5645_v7  ;;  %v11815_v49 = vpop.permute.xlu1 %8366  ;;  %v5710_v54 = vpack.c.bf16 %v5689_v38, %v5686_v19  ;;  %v5948_v42 = vand.u32 %v9167_v1, %v9585_v62 }
 0x96e   : > { %v8369_v16 = vunpack.i.h.bf16 %v11815_v49  ;;  %v8368_v58 = vunpack.i.l.bf16 %v11815_v49 }
 0x96f   : > { %v5709_v55 = vpack.c.bf16 %v5688_v63, %v5685_v20  ;;  %5985 = vmatprep.mubr.bf16.mxu0 %v5710_v54  ;;  %v11825_v10 = vpop.permute.xlu0 %8371 }
 0x970   : > { %v5650_v32 = vsel %vm516_vm0, %v8368_v58, %v8369_v16  ;;  %v8374_v0 = vunpack.i.h.bf16 %v11825_v10  ;;  %v8373_v7 = vunpack.i.l.bf16 %v11825_v10  ;;  %v5693_v59 = vmax.f32 %v5557_v29, %v8369_v16 }
 0x971   : > { %v8377_v53 = vpop.permute.xlu1 %8376  ;;  %5986 = vmatmul.mubr.bf16.vlgmr.msra.gmra.mrb[44].mxu0 %v5709_v55  ;;  %v5692_v36 = vmax.f32 %v5556_v31, %v5650_v32  ;;  %v12473_v29 = vmax.f32 %v11758_v15, 0.0 }
 0x972   : > { %v5652_v25 = vsel %vm516_vm0, %v8373_v7, %v8374_v0  ;;  %v8379_v63 = vunpack.i.h.bf16 %v8377_v53  ;;  %v8378_v56 = vunpack.i.l.bf16 %v8377_v53  ;;  %6027 = vmatpush1.bf16.msra.mxu0 %v9164_v27  ;;  %v5696_v17 = vmax.f32 %v5560_v3, %v8374_v0 }
 0x973   : > { %v5695_v19 = vmax.f32 %v5559_v14, %v5652_v25  ;;  %6028 = vmatprep.subr.bf16.mxu0 %v5951_v44 }
 0x974   : > { %v5649_v38 = vsel %vm516_vm0, %v8378_v56, %v8368_v58  ;;  %v5651_v57 = vsel %vm516_vm0, %v8379_v63, %v8373_v7  ;;  %v5714_v50 = vpack.c.bf16 %v5696_v17, %v5693_v59 }
 0x975   : > { %v11843_v20 = vpop.permute.xlu0 %8381  ;;  %v5713_v54 = vpack.c.bf16 %v5695_v19, %v5692_v36  ;;  %v5691_v55 = vmax.f32 %v5555_v18, %v5649_v38  ;;  %v5694_v27 = vmax.f32 %v5558_v47, %v5651_v57 }
 0x976   : > { %v8384_v8 = vunpack.i.h.bf16 %v11843_v20  ;;  %v8383_v31 = vunpack.i.l.bf16 %v11843_v20  ;;  %6029 = vmatpush1.bf16.msra.mxu0 %v5948_v42 }
 0x977   : > { %v8387_v24 = vpop.permute.xlu1 %8386  ;;  %5995 = vmatprep.mubr.bf16.mxu0 %v5713_v54  ;;  %v5712_v14 = vpack.c.bf16 %v5694_v27, %v5691_v55  ;;  %7056 = vmatprep.subr.bf16.mxu0 %v9224_v4 }
 0x978   : > { %v5654_v58 = vsel %vm516_vm0, %v8383_v31, %v8384_v8  ;;  %v8389_v1 = vunpack.i.h.bf16 %v8387_v24  ;;  %v8388_v44 = vunpack.i.l.bf16 %v8387_v24 }
 0x979   : > { %v8392_v32 = vpop.permute.xlu0 %8391  ;;  %5996 = vmatmul.mubr.bf16.gmra.mrb[48].mxu0 %v5712_v14  ;;  %v5698_v18 = vmax.f32 %v5562_v9, %v5654_v58 }
 0x97a   : > { %v5656_v61 = vsel %vm516_vm0, %v8388_v44, %v8389_v1  ;;  %v8394_v26 = vunpack.i.h.bf16 %v8392_v32  ;;  %v8393_v47 = vunpack.i.l.bf16 %v8392_v32  ;;  %v5702_v30 = vmax.f32 %v12470_v35, %v8389_v1 }
 0x97b   : > { %v5701_v7 = vmax.f32 %v5565_v45, %v5656_v61 }
 0x97c   : > { %v5655_v53 = vsel %vm516_vm0, %v8394_v26, %v8388_v44  ;;  %v5653_v25 = vsel %vm516_vm0, %v8393_v47, %v8383_v31 }
 0x97d   : > { %v8397_v63 = vpop.permute.xlu1 %8396  ;;  %v5716_v56 = vpack.c.bf16 %v5701_v7, %v5698_v18  ;;  %v5697_v42 = vmax.f32 %v5561_v22, %v5653_v25  ;;  %v5700_v36 = vmax.f32 %v5564_v23, %v5655_v53 }
 0x97e   : > { %v8399_v19 = vunpack.i.h.bf16 %v8397_v63  ;;  %v8398_v38 = vunpack.i.l.bf16 %v8397_v63 }
 0x97f   : > { %v8402_v57 = vpop.permute.xlu0 %8401  ;;  %6005 = vmatprep.mubr.bf16.mxu0 %v5716_v56  ;;  %v5715_v6 = vpack.c.bf16 %v5700_v36, %v5697_v42  ;;  %v9172_v56 = vld [vmem:[%s12447_s10 + $0x4] ss:$12 sps:$4 sm:$0xff]   ;;  %v6260_v36 = vld [vmem:[%s12448_s11 + $0x8] sm:$0xff] }
 0x980   : > { %v5658_v21 = vsel %vm516_vm0, %v8398_v38, %v8399_v19  ;;  %v8404_v9 = vunpack.i.h.bf16 %v8402_v57  ;;  %v8403_v45 = vunpack.i.l.bf16 %v8402_v57  ;;  %v5705_v3 = vmax.f32 %v12473_v29, %v8399_v19  ;;  %6532 = vmatprep.mubr.bf16.mxu1 %v9172_v56  ;;  %v6259_v42 = vld [vmem:[%s12448_s11] sm:$0xff]  ;;  %v6261_v19 = vld [vmem:[%s12448_s11 + $0x10] sm:$0xff] }
 0x981   : > { %v8407_v20 = vpop.permute.xlu1 %8406  ;;  %6006 = vmatmul.mubr.bf16.gmra.mrb[52].mxu0 %v5715_v6  ;;  %v5704_v37 = vmax.f32 %v5568_v46, %v5658_v21  ;;  %v12471_v46 = vmax.f32 %v11721_v11, 0.0  ;;  %v6263_v57 = vld [vmem:[%s12448_s11 + $0x20] sm:$0xff]  ;;  %v6264_v6 = vld [vmem:[%s12448_s11 + $0x28] sm:$0xff]  ;;  %v6265_v21 = vld [vmem:[%s12448_s11 + $0x30] sm:$0xff] }
 0x982   : > { %v5660_v54 = vsel %vm516_vm0, %v8403_v45, %v8404_v9  ;;  %v8409_v55 = vunpack.i.h.bf16 %v8407_v20  ;;  %v8408_v27 = vunpack.i.l.bf16 %v8407_v20  ;;  %v5708_v28 = vmax.f32 %v12472_v41, %v8404_v9  ;;  %v6266_v9 = vld [vmem:[%s12448_s11 + $0x38] sm:$0xff]  ;;  %v6268_v20 = vld [vmem:[%s12448_s11 + $0x48] sm:$0xff]  ;;  %v9176_v56 = vld [vmem:[%s12447_s10 + $0x34] ss:$12 sps:$4 sm:$0xff]  }
 0x983   : > { %v5707_v40 = vmax.f32 %v5571_v60, %v5660_v54  ;;  %v6269_v54 = vld [vmem:[%s12448_s11 + $0x50] sm:$0xff] }
 0x984   : > { %v5657_v23 = vsel %vm516_vm0, %v8408_v27, %v8398_v38  ;;  %v5659_v22 = vsel %vm516_vm0, %v8409_v55, %v8403_v45  ;;  %v5720_v49 = vpack.c.bf16 %v5708_v28, %v5705_v3  ;;  %v6262_v38 = vld [vmem:[%s12448_s11 + $0x18] sm:$0xff]  ;;  %v6267_v45 = vld [vmem:[%s12448_s11 + $0x40] sm:$0xff] }
 0x985   : > { %v5719_v31 = vpack.c.bf16 %v5707_v40, %v5704_v37  ;;  %v5703_v24 = vmax.f32 %v5567_v2, %v5657_v23  ;;  %v5706_v14 = vmax.f32 %v5570_v51, %v5659_v22  ;;  %v5699_v51 = vmax.f32 %v12471_v46, %v8384_v8  ;;  %v6270_v55 = vld [vmem:[%s12448_s11 + $0x58] sm:$0xff]  ;;  %v6271_v27 = vld [vmem:[%s12448_s11 + $0x60] sm:$0xff]  ;;  %v6272_v37 = vld [vmem:[%s12448_s11 + $0x68] sm:$0xff] }
 0x986   : > { %v6273_v40 = vld [vmem:[%s12448_s11 + $0x70] sm:$0xff]  ;;  %v6274_v23 = vld [vmem:[%s12448_s11 + $0x78] sm:$0xff] }
 0x987   : > { %6015 = vmatprep.mubr.bf16.mxu0 %v5719_v31  ;;  %v5718_v58 = vpack.c.bf16 %v5706_v14, %v5703_v24  ;;  %v5717_v60 = vpack.c.bf16 %v5702_v30, %v5699_v51 }
 0x989   : > { %6016 = vmatmul.mubr.bf16.gmra.mrb[56].mxu0 %v5718_v58 }
 0x98a   : > { %6058 = vmatprep.mubr.bf16.mxu0 %v9224_v4 }
 0x991   : > { %7811 = vmatmul.mubr.msk.bf16.vlgmr.msra.gmra.mrb[44].mxu0 %vm3119_vm8, %v5711_v48 }
 0x992   : > { %6068 = vmatprep.mubr.bf16.mxu0 %v9224_v4 }
 0x999   : > { %7812 = vmatmul.mubr.msk.bf16.gmra.mrb[48].mxu0 %vm3119_vm8, %v5714_v50 }
 0x99a   : > { %6078 = vmatprep.mubr.bf16.mxu0 %v9224_v4 }
 0x9a1   : > { %7813 = vmatmul.mubr.msk.bf16.gmra.mrb[52].mxu0 %vm3119_vm8, %v5717_v60 }
 0x9a2   : > { %6088 = vmatprep.mubr.bf16.mxu0 %v9224_v4 }
 0x9a9   : > { %7814 = vmatmul.mubr.msk.bf16.gmra.mrb[56].mxu0 %vm3119_vm8, %v5720_v49 }
 0xa64   : > { %v6060_v2 = vpop.f32.mrb[44].mxu0 }
 0xa65   : > { %v6062_v43 = vpop.f32.mrb[45].mxu0 }
 0xa66   : > { %v6064_v13 = vpop.f32.mrb[46].mxu0 }
 0xa67   : > { %v6099_v12 = vpack.c.bf16 %v6064_v13, %v6060_v2  ;;  %v6066_v11 = vpop.f32.mrb[47].mxu0 }
 0xa68   : > { %v6100_v5 = vpack.c.bf16 %v6066_v11, %v6062_v43 }
 0xa69   : > { %6115 = vrot.lane.b32.xlu0 %v6099_v12, %s9221_s14 }
 0xa6a   : > { %6117 = vrot.lane.b32.xlu1 %v6100_v5, %s9221_s14  ;;  %6500 = vmatprep.subr.bf16.mxu1 %v6100_v5 }
 0xa6b   : > { %6501 = vmatpush1.bf16.msra.mxu1 %v6099_v12 }
 0xa6c   : > { %v6070_v39 = vpop.f32.mrb[48].mxu0 }
 0xa6d   : > { %v6072_v34 = vpop.f32.mrb[49].mxu0 }
 0xa6e   : > { %v6074_v16 = vpop.f32.mrb[50].mxu0 }
 0xa6f   : > { %v6101_v15 = vpack.c.bf16 %v6074_v16, %v6070_v39  ;;  %v6076_v10 = vpop.f32.mrb[51].mxu0 }
 0xa70   : > { %v6102_v0 = vpack.c.bf16 %v6076_v10, %v6072_v34 }
 0xa71   : > { %6119 = vrot.lane.b32.xlu0 %v6101_v15, %s9221_s14 }
 0xa72   : > { %6121 = vrot.lane.b32.xlu1 %v6102_v0, %s9221_s14  ;;  %6502 = vmatprep.subr.bf16.mxu1 %v6102_v0 }
 0xa73   : > { %6503 = vmatpush1.bf16.msra.mxu1 %v6101_v15 }
 0xa74   : > { %v6080_v8 = vpop.f32.mrb[52].mxu0 }
 0xa75   : > { %v6082_v1 = vpop.f32.mrb[53].mxu0 }
 0xa76   : > { %v6084_v44 = vpop.f32.mrb[54].mxu0 }
 0xa77   : > { %v6103_v32 = vpack.c.bf16 %v6084_v44, %v6080_v8  ;;  %v6086_v61 = vpop.f32.mrb[55].mxu0 }
 0xa78   : > { %v6104_v26 = vpack.c.bf16 %v6086_v61, %v6082_v1  ;;  %v9173_v61 = vld [vmem:[%s12447_s10 + $0x1c] ss:$12 sps:$4 sm:$0xff]  }
 0xa79   : > { %6123 = vrot.lane.b32.xlu0 %v6103_v32, %s9221_s14 }
 0xa7a   : > { %6125 = vrot.lane.b32.xlu1 %v6104_v26, %s9221_s14  ;;  %6504 = vmatprep.subr.bf16.mxu1 %v6104_v26 }
 0xa7b   : > { %6505 = vmatpush1.bf16.msra.mxu1 %v6103_v32 }
 0xa7c   : > { %v6090_v47 = vpop.f32.mrb[56].mxu0 }
 0xa7d   : > { %v6092_v18 = vpop.f32.mrb[57].mxu0 }
 0xa7e   : > { %v6094_v7 = vpop.f32.mrb[58].mxu0 }
 0xa7f   : > { %v6105_v53 = vpack.c.bf16 %v6094_v7, %v6090_v47  ;;  %v6096_v25 = vpop.f32.mrb[59].mxu0 }
 0xa80   : > { %v6106_v63 = vpack.c.bf16 %v6096_v25, %v6092_v18 }
 0xa81   : > { %6127 = vrot.lane.b32.xlu0 %v6105_v53, %s9221_s14 }
 0xa82   : > { %6129 = vrot.lane.b32.xlu1 %v6106_v63, %s9221_s14  ;;  %6506 = vmatprep.subr.bf16.mxu1 %v6106_v63 }
 0xa83   : > { %6507 = vmatpush1.bf16.msra.mxu1 %v6105_v53 }
 0xa85   : > { %6143 = vrot.lane.b32.xlu0 %v6099_v12, %s9222_s15 }
 0xa86   : > { %6145 = vrot.lane.b32.xlu1 %v6100_v5, %s9222_s15 }
 0xa89   : > { %6147 = vrot.lane.b32.xlu0 %v6101_v15, %s9222_s15 }
 0xa8a   : > { %6149 = vrot.lane.b32.xlu1 %v6102_v0, %s9222_s15 }
 0xa8d   : > { %6151 = vrot.lane.b32.xlu0 %v6103_v32, %s9222_s15 }
 0xa8e   : > { %6153 = vrot.lane.b32.xlu1 %v6104_v26, %s9222_s15 }
 0xa91   : > { %6155 = vrot.lane.b32.xlu0 %v6105_v53, %s9222_s15 }
 0xa92   : > { %6157 = vrot.lane.b32.xlu1 %v6106_v63, %s9222_s15 }
 0xa95   : > { %6171 = vrot.lane.b32.xlu0 %v6099_v12, %s9223_s16 }
 0xa96   : > { %6173 = vrot.lane.b32.xlu1 %v6100_v5, %s9223_s16 }
 0xa99   : > { %6175 = vrot.lane.b32.xlu0 %v6101_v15, %s9223_s16 }
 0xa9a   : > { %6177 = vrot.lane.b32.xlu1 %v6102_v0, %s9223_s16 }
 0xa9d   : > { %6179 = vrot.lane.b32.xlu0 %v6103_v32, %s9223_s16 }
 0xa9e   : > { %6181 = vrot.lane.b32.xlu1 %v6104_v26, %s9223_s16 }
 0xaa1   : > { %6183 = vrot.lane.b32.xlu0 %v6105_v53, %s9223_s16 }
 0xaa2   : > { %6185 = vrot.lane.b32.xlu1 %v6106_v63, %s9223_s16 }
 0xaa5   : > { %6199 = vrot.lane.b32.xlu0 %v6099_v12, %s9225_s17 }
 0xaa6   : > { %6201 = vrot.lane.b32.xlu1 %v6100_v5, %s9225_s17 }
 0xaa9   : > { %6203 = vrot.lane.b32.xlu0 %v6101_v15, %s9225_s17 }
 0xaaa   : > { %6205 = vrot.lane.b32.xlu1 %v6102_v0, %s9225_s17 }
 0xaad   : > { %6207 = vrot.lane.b32.xlu0 %v6103_v32, %s9225_s17  ;;  %v9170_v32 = vld [vmem:[%s12447_s10] ss:$12 sps:$4 sm:$0xff]  }
 0xaae   : > { %6209 = vrot.lane.b32.xlu1 %v6104_v26, %s9225_s17 }
 0xab1   : > { %6211 = vrot.lane.b32.xlu0 %v6105_v53, %s9225_s17 }
 0xab2   : > { %6213 = vrot.lane.b32.xlu1 %v6106_v63, %s9225_s17  ;;  %v9175_v63 = vld [vmem:[%s12447_s10 + $0x18] ss:$12 sps:$4 sm:$0xff]  }
 0xab5   : > { %6277 = vperm.xlu0 %8253, %v6259_v42  }
 0xab6   : > { %6282 = vperm.xlu1 %8254, %v6260_v36  }
 0xab9   : > { %6287 = vperm.xlu0 %8253, %v6261_v19  }
 0xaba   : > { %6292 = vperm.xlu1 %8254, %v6262_v38  }
 0xabd   : > { %6297 = vperm.xlu0 %8253, %v6263_v57  }
 0xabe   : > { %6302 = vperm.xlu1 %8254, %v6264_v6  }
 0xac1   : > { %6307 = vperm.xlu0 %8253, %v6265_v21   ;;  %v9178_v21 = vld [vmem:[%s12447_s10 + $0x30] ss:$12 sps:$4 sm:$0xff]  }
 0xac2   : > { %6312 = vperm.xlu1 %8254, %v6266_v9   ;;  %v9179_v9 = vld [vmem:[%s12447_s10 + $0x4c] ss:$12 sps:$4 sm:$0xff]  }
 0xac5   : > { %6317 = vperm.xlu0 %8253, %v6267_v45   ;;  %v9181_v45 = vld [vmem:[%s12447_s10 + $0x48] ss:$12 sps:$4 sm:$0xff]  }
 0xac6   : > { %6322 = vperm.xlu1 %8254, %v6268_v20   ;;  %v9182_v20 = vld [vmem:[%s12447_s10 + $0x64] ss:$12 sps:$4 sm:$0xff]  }
 0xac9   : > { %6327 = vperm.xlu0 %8253, %v6269_v54   ;;  %v9184_v54 = vld [vmem:[%s12447_s10 + $0x60] ss:$12 sps:$4 sm:$0xff]  }
 0xaca   : > { %6332 = vperm.xlu1 %8254, %v6270_v55   ;;  %v9185_v55 = vld [vmem:[%s12447_s10 + $0x7c] ss:$12 sps:$4 sm:$0xff]  }
 0xacd   : > { %6337 = vperm.xlu0 %8253, %v6271_v27   ;;  %v9187_v27 = vld [vmem:[%s12447_s10 + $0x78] ss:$12 sps:$4 sm:$0xff]  }
 0xace   : > { %6342 = vperm.xlu1 %8254, %v6272_v37   ;;  %v9188_v37 = vld [vmem:[%s12447_s10 + $0x94] ss:$12 sps:$4 sm:$0xff]  }
 0xad1   : > { %6347 = vperm.xlu0 %8253, %v6273_v40   ;;  %v9190_v40 = vld [vmem:[%s12447_s10 + $0x90] ss:$12 sps:$4 sm:$0xff]  }
 0xad2   : > { %6352 = vperm.xlu1 %8254, %v6274_v23   ;;  %v9191_v23 = vld [vmem:[%s12447_s10 + $0xac] ss:$12 sps:$4 sm:$0xff]  }
 0xadb   : > { %v6116_v22 = vpop.permute.xlu0 %6115 }
 0xadc   : > { %v6118_v31 = vpop.permute.xlu1 %6117 }
 0xadd   : > { %v6131_v24 = vsel %vm516_vm0, %v6116_v22, %v6118_v31  ;;  %6508 = vmatprep.subr.bf16.mxu1 %v6118_v31  ;;  %v9193_v22 = vld [vmem:[%s12447_s10 + $0xa8] ss:$12 sps:$4 sm:$0xff]  }
 0xade   : > { %6509 = vmatpush1.bf16.msra.mxu1 %v6131_v24  ;;  %v9194_v31 = vld [vmem:[%s12447_s10 + $0x8] ss:$12 sps:$4 sm:$0xff]   ;;  %v9195_v24 = vld [vmem:[%s12447_s10 + $0x20] ss:$12 sps:$4 sm:$0xff]  }
 0xae3   : > { %v6120_v14 = vpop.permute.xlu0 %6119 }
 0xae4   : > { %v6122_v58 = vpop.permute.xlu1 %6121 }
 0xae5   : > { %v6132_v33 = vsel %vm516_vm0, %v6120_v14, %v6122_v58  ;;  %6510 = vmatprep.subr.bf16.mxu1 %v6122_v58  ;;  %v9196_v14 = vld [vmem:[%s12447_s10 + $0x38] ss:$12 sps:$4 sm:$0xff]   ;;  %v9197_v58 = vld [vmem:[%s12447_s10 + $0x50] ss:$12 sps:$4 sm:$0xff]  }
 0xae6   : > { %6511 = vmatpush1.bf16.msra.mxu1 %v6132_v33  ;;  %v9198_v33 = vld [vmem:[%s12447_s10 + $0x68] ss:$12 sps:$4 sm:$0xff]  }
 0xaeb   : > { %v6124_v52 = vpop.permute.xlu0 %6123 }
 0xaec   : > { %v6126_v48 = vpop.permute.xlu1 %6125 }
 0xaed   : > { %v6133_v17 = vsel %vm516_vm0, %v6124_v52, %v6126_v48  ;;  %6512 = vmatprep.subr.bf16.mxu1 %v6126_v48  ;;  %v9199_v52 = vld [vmem:[%s12447_s10 + $0x80] ss:$12 sps:$4 sm:$0xff]   ;;  %v9200_v48 = vld [vmem:[%s12447_s10 + $0x98] ss:$12 sps:$4 sm:$0xff]  }
 0xaee   : > { %6513 = vmatpush1.bf16.msra.mxu1 %v6133_v17  ;;  %v9201_v17 = vld [vmem:[%s12447_s10 + $0xb0] ss:$12 sps:$4 sm:$0xff]  }
 0xaf3   : > { %v6128_v59 = vpop.permute.xlu0 %6127 }
 0xaf4   : > { %v6130_v50 = vpop.permute.xlu1 %6129 }
 0xaf5   : > { %v6134_v35 = vsel %vm516_vm0, %v6128_v59, %v6130_v50  ;;  %6514 = vmatprep.subr.bf16.mxu1 %v6130_v50  ;;  %v9202_v59 = vld [vmem:[%s12449_s12] sm:$0xff]   ;;  %v9203_v50 = vld [vmem:[%s12449_s12 + $0x8] sm:$0xff]  }
 0xaf6   : > { %6515 = vmatpush1.bf16.msra.mxu1 %v6134_v35  ;;  %7057 = vmatpush1.bf16.msra.mxu0 %v9202_v59  ;;  %v9204_v35 = vld [vmem:[%s12449_s12 + $0x10] sm:$0xff]  }
 0xaf7   : > { %v6144_v30 = vpop.permute.xlu0 %6143  ;;  %7058 = vmatprep.subr.bf16.mxu0 %v9224_v4 }
 0xaf8   : > { %v6146_v46 = vpop.permute.xlu1 %6145 }
 0xaf9   : > { %v6159_v51 = vsel %vm552_vm1, %v6144_v30, %v6146_v46  ;;  %6516 = vmatprep.subr.bf16.mxu1 %v6146_v46  ;;  %v9205_v30 = vld [vmem:[%s12449_s12 + $0x18] sm:$0xff]   ;;  %v9206_v46 = vld [vmem:[%s12449_s12 + $0x20] sm:$0xff]  }
 0xafa   : > { %6517 = vmatpush1.bf16.msra.mxu1 %v6159_v51  ;;  %7059 = vmatpush1.bf16.msra.mxu0 %v9203_v50  ;;  %v9207_v51 = vld [vmem:[%s12449_s12 + $0x28] sm:$0xff]  }
 0xafb   : > { %v6148_v60 = vpop.permute.xlu0 %6147  ;;  %7060 = vmatprep.subr.bf16.mxu0 %v9224_v4 }
 0xafc   : > { %v6150_v41 = vpop.permute.xlu1 %6149 }
 0xafd   : > { %v6160_v28 = vsel %vm552_vm1, %v6148_v60, %v6150_v41  ;;  %6518 = vmatprep.subr.bf16.mxu1 %v6150_v41  ;;  %v9208_v60 = vld [vmem:[%s12449_s12 + $0x30] sm:$0xff]   ;;  %v9209_v41 = vld [vmem:[%s12449_s12 + $0x38] sm:$0xff]  }
 0xafe   : > { %6519 = vmatpush1.bf16.msra.mxu1 %v6160_v28  ;;  %7061 = vmatpush1.bf16.msra.mxu0 %v9204_v35  ;;  %v9210_v28 = vld [vmem:[%s12449_s12 + $0x40] sm:$0xff]  }
 0xaff   : > { %v6152_v29 = vpop.permute.xlu0 %6151  ;;  %7062 = vmatprep.subr.bf16.mxu0 %v9224_v4 }
 0xb00   : > { %v6154_v3 = vpop.permute.xlu1 %6153 }
 0xb01   : > { %v6161_v49 = vsel %vm552_vm1, %v6152_v29, %v6154_v3  ;;  %6520 = vmatprep.subr.bf16.mxu1 %v6154_v3  ;;  %v9211_v29 = vld [vmem:[%s12449_s12 + $0x48] sm:$0x3f]  }
 0xb02   : > { %6521 = vmatpush1.bf16.msra.mxu1 %v6161_v49  ;;  %7063 = vmatpush1.bf16.msra.mxu0 %v9205_v30 }
 0xb03   : > { %v6156_v2 = vpop.permute.xlu0 %6155  ;;  %7064 = vmatprep.subr.bf16.mxu0 %v9224_v4 }
 0xb04   : > { %v6158_v43 = vpop.permute.xlu1 %6157 }
 0xb05   : > { %v6162_v13 = vsel %vm552_vm1, %v6156_v2, %v6158_v43  ;;  %6522 = vmatprep.subr.bf16.mxu1 %v6158_v43 }
 0xb06   : > { %6523 = vmatpush1.bf16.msra.mxu1 %v6162_v13  ;;  %7065 = vmatpush1.bf16.msra.mxu0 %v9206_v46  ;;  %v7054_v13 = vand.u32 %v9211_v29, %v9585_v62 }
 0xb07   : > { %v6172_v12 = vpop.permute.xlu0 %6171  ;;  %7066 = vmatprep.subr.bf16.mxu0 %v9224_v4 }
 0xb08   : > { %v6174_v11 = vpop.permute.xlu1 %6173 }
 0xb09   : > { %v6187_v5 = vsel %vm588_vm2, %v6172_v12, %v6174_v11  ;;  %6524 = vmatprep.subr.bf16.mxu1 %v6174_v11 }
 0xb0a   : > { %6525 = vmatpush1.bf16.msra.mxu1 %v6187_v5  ;;  %7067 = vmatpush1.bf16.msra.mxu0 %v9207_v51 }
 0xb0b   : > { %v6176_v39 = vpop.permute.xlu0 %6175  ;;  %7068 = vmatprep.subr.bf16.mxu0 %v9224_v4 }
 0xb0c   : > { %v6178_v34 = vpop.permute.xlu1 %6177 }
 0xb0d   : > { %v6188_v16 = vsel %vm588_vm2, %v6176_v39, %v6178_v34  ;;  %6526 = vmatprep.subr.bf16.mxu1 %v6178_v34 }
 0xb0e   : > { %6527 = vmatpush1.bf16.msra.mxu1 %v6188_v16  ;;  %7069 = vmatpush1.bf16.msra.mxu0 %v9208_v60 }
 0xb0f   : > { %v6180_v15 = vpop.permute.xlu0 %6179  ;;  %7070 = vmatprep.subr.bf16.mxu0 %v9224_v4 }
 0xb10   : > { %v6182_v10 = vpop.permute.xlu1 %6181 }
 0xb11   : > { %v6189_v0 = vsel %vm588_vm2, %v6180_v15, %v6182_v10  ;;  %6528 = vmatprep.subr.bf16.mxu1 %v6182_v10 }
 0xb12   : > { %6529 = vmatpush1.bf16.msra.mxu1 %v6189_v0  ;;  %7071 = vmatpush1.bf16.msra.mxu0 %v9209_v41 }
 0xb13   : > { %v6184_v8 = vpop.permute.xlu0 %6183  ;;  %7072 = vmatprep.subr.bf16.mxu0 %v9224_v4 }
 0xb14   : > { %v6186_v1 = vpop.permute.xlu1 %6185 }
 0xb15   : > { %v6190_v44 = vsel %vm588_vm2, %v6184_v8, %v6186_v1  ;;  %6530 = vmatprep.subr.bf16.mxu1 %v6186_v1 }
 0xb16   : > { %6531 = vmatpush1.bf16.msra.mxu1 %v6190_v44  ;;  %7073 = vmatpush1.bf16.msra.mxu0 %v9210_v28 }
 0xb17   : > { %v6200_v26 = vpop.permute.xlu0 %6199  ;;  %7074 = vmatprep.subr.bf16.mxu0 %v9224_v4 }
 0xb18   : > { %v6202_v47 = vpop.permute.xlu1 %6201 }
 0xb19   : > { %v6215_v18 = vsel %vm624_vm3, %v6200_v26, %v6202_v47  ;;  %6533 = vmatmul.mubr.bf16.vlgmr.msra.gmra.mrb[88].mxu1 %v9170_v32  ;;  %6613 = vmatprep.subr.bf16.mxu1 %v6202_v47 }
 0xb1a   : > { %6614 = vmatpush1.bf16.msra.mxu1 %v6215_v18  ;;  %6542 = vmatprep.mubr.bf16.mxu1 %v9173_v61 }
 0xb1b   : > { %v6204_v7 = vpop.permute.xlu0 %6203  ;;  %7075 = vmatpush1.bf16.msra.mxu0 %v7054_v13 }
 0xb1c   : > { %v6206_v53 = vpop.permute.xlu1 %6205 }
 0xb1d   : > { %v6216_v25 = vsel %vm624_vm3, %v6204_v7, %v6206_v53  ;;  %6615 = vmatprep.subr.bf16.mxu1 %v6206_v53 }
 0xb1e   : > { %6616 = vmatpush1.bf16.msra.mxu1 %v6216_v25 }
 0xb1f   : > { %v6208_v42 = vpop.permute.xlu0 %6207 }
 0xb20   : > { %v6210_v36 = vpop.permute.xlu1 %6209 }
 0xb21   : > { %v6217_v19 = vsel %vm624_vm3, %v6208_v42, %v6210_v36  ;;  %6543 = vmatmul.mubr.bf16.gmra.mrb[92].mxu1 %v9175_v63  ;;  %6617 = vmatprep.subr.bf16.mxu1 %v6210_v36 }
 0xb22   : > { %6618 = vmatpush1.bf16.msra.mxu1 %v6217_v19  ;;  %6552 = vmatprep.mubr.bf16.mxu1 %v9176_v56 }
 0xb23   : > { %v6212_v38 = vpop.permute.xlu0 %6211 }
 0xb24   : > { %v6214_v57 = vpop.permute.xlu1 %6213 }
 0xb25   : > { %v6218_v6 = vsel %vm624_vm3, %v6212_v38, %v6214_v57  ;;  %6619 = vmatprep.subr.bf16.mxu1 %v6214_v57 }
 0xb26   : > { %6620 = vmatpush1.bf16.msra.mxu1 %v6218_v6 }
 0xb29   : > { %6553 = vmatmul.mubr.bf16.gmra.mrb[96].mxu1 %v9178_v21 }
 0xb2a   : > { %6562 = vmatprep.mubr.bf16.mxu1 %v9179_v9 }
 0xb31   : > { %6563 = vmatmul.mubr.bf16.gmra.mrb[100].mxu1 %v9181_v45 }
 0xb32   : > { %6572 = vmatprep.mubr.bf16.mxu1 %v9182_v20 }
 0xb34   : > { %v6278_v3 = vpop.permute.xlu0 %6277 }
 0xb35   : > { %v6283_v12 = vpop.permute.xlu1 %6282 }
 0xb38   : > { %v6288_v8 = vpop.permute.xlu0 %6287 }
 0xb39   : > { %6573 = vmatmul.mubr.bf16.gmra.mrb[104].mxu1 %v9184_v54  ;;  %v6293_v26 = vpop.permute.xlu1 %6292 }
 0xb3a   : > { %6582 = vmatprep.mubr.bf16.mxu1 %v9185_v55 }
 0xb3c   : > { %v6298_v38 = vpop.permute.xlu0 %6297 }
 0xb3d   : > { %v6303_v45 = vpop.permute.xlu1 %6302 }
 0xb41   : > { %6583 = vmatmul.mubr.bf16.gmra.mrb[108].mxu1 %v9187_v27 }
 0xb42   : > { %6592 = vmatprep.mubr.bf16.mxu1 %v9188_v37 }
 0xb49   : > { %6593 = vmatmul.mubr.bf16.gmra.mrb[112].mxu1 %v9190_v40 }
 0xb4a   : > { %6602 = vmatprep.mubr.bf16.mxu1 %v9191_v23 }
 0xb51   : > { %6603 = vmatmul.mubr.bf16.gmra.mrb[116].mxu1 %v9193_v22 }
 0xb52   : > { %6645 = vmatprep.mubr.bf16.mxu1 %v9224_v4 }
 0xb59   : > { %7839 = vmatmul.mubr.msk.bf16.vlgmr.msra.gmra.mrb[88].mxu1 %vm6475_vm10, %v9194_v31 }
 0xb5a   : > { %6655 = vmatprep.mubr.bf16.mxu1 %v9224_v4 }
 0xb61   : > { %7840 = vmatmul.mubr.msk.bf16.gmra.mrb[92].mxu1 %vm6475_vm10, %v9195_v24 }
 0xb62   : > { %6665 = vmatprep.mubr.bf16.mxu1 %v9224_v4 }
 0xb69   : > { %7841 = vmatmul.mubr.msk.bf16.gmra.mrb[96].mxu1 %vm6475_vm10, %v9196_v14  ;;  %v6308_v14 = vpop.permute.xlu0 %6307 }
 0xb6a   : > { %6675 = vmatprep.mubr.bf16.mxu1 %v9224_v4 }
 0xb71   : > { %7842 = vmatmul.mubr.msk.bf16.gmra.mrb[100].mxu1 %vm6475_vm10, %v9197_v58 }
 0xb72   : > { %6685 = vmatprep.mubr.bf16.mxu1 %v9224_v4 }
 0xb79   : > { %7843 = vmatmul.mubr.msk.bf16.gmra.mrb[104].mxu1 %vm6475_vm10, %v9198_v33 }
 0xb7a   : > { %6695 = vmatprep.mubr.bf16.mxu1 %v9224_v4 }
 0xb81   : > { %7844 = vmatmul.mubr.msk.bf16.gmra.mrb[108].mxu1 %vm6475_vm10, %v9199_v52 }
 0xb82   : > { %6705 = vmatprep.mubr.bf16.mxu1 %v9224_v4 }
 0xb89   : > { %7845 = vmatmul.mubr.msk.bf16.gmra.mrb[112].mxu1 %vm6475_vm10, %v9200_v48 }
 0xb8a   : > { %6715 = vmatprep.mubr.bf16.mxu1 %v9224_v4 }
 0xb91   : > { %7846 = vmatmul.mubr.msk.bf16.gmra.mrb[116].mxu1 %vm6475_vm10, %v9201_v17  ;;  %v6313_v17 = vpop.permute.xlu1 %6312 }
 0xc2c   : > { %v6647_v49 = vpop.f32.mrb[88].mxu1 }
 0xc2d   : > { %v12131_v2 = vadd.f32 %v6647_v49, %v6278_v3  ;;  %v6649_v43 = vpop.f32.mrb[89].mxu1 }
 0xc2e   : > { %v12134_v11 = vadd.f32 %v6649_v43, %v6278_v3  ;;  %v6651_v5 = vpop.f32.mrb[90].mxu1  ;;  %v6318_v3 = vpop.permute.xlu0 %6317 }
 0xc2f   : > { %v6726_v39 = vmax.f32 %v12131_v2, 0.0  ;;  %v12137_v34 = vadd.f32 %v6651_v5, %v6283_v12  ;;  %v6653_v16 = vpop.f32.mrb[91].mxu1  ;;  %v6323_v5 = vpop.permute.xlu1 %6322 }
 0xc30   : > { %v6727_v15 = vmax.f32 %v12134_v11, 0.0  ;;  %v12140_v10 = vadd.f32 %v6653_v16, %v6283_v12 }
 0xc31   : > { %v6728_v4 = vmax.f32 %v12137_v34, 0.0 }
 0xc32   : > { %v8410_v62 = vpack.i.bf16 %v6727_v15, %v6726_v39  ;;  %v6729_v0 = vmax.f32 %v12140_v10, 0.0 }
 0xc34   : > { %v8415_v1 = vpack.i.bf16 %v6729_v0, %v6728_v4  ;;  %v6657_v44 = vpop.f32.mrb[92].mxu1  ;;  %8411 = vrot.lane.b32.xlu0 %v8410_v62, %s9221_s14 }
 0xc35   : > { %v12153_v32 = vadd.f32 %v6657_v44, %v6288_v8  ;;  %v6659_v61 = vpop.f32.mrb[93].mxu1 }
 0xc36   : > { %v12155_v47 = vadd.f32 %v6659_v61, %v6288_v8  ;;  %v6661_v18 = vpop.f32.mrb[94].mxu1  ;;  %8416 = vrot.lane.b32.xlu1 %v8415_v1, %s9221_s14 }
 0xc37   : > { %v6730_v7 = vmax.f32 %v12153_v32, 0.0  ;;  %v12159_v53 = vadd.f32 %v6661_v18, %v6293_v26  ;;  %v6663_v25 = vpop.f32.mrb[95].mxu1 }
 0xc38   : > { %v6731_v63 = vmax.f32 %v12155_v47, 0.0  ;;  %v12162_v56 = vadd.f32 %v6663_v25, %v6293_v26 }
 0xc39   : > { %v6732_v42 = vmax.f32 %v12159_v53, 0.0 }
 0xc3a   : > { %v8420_v36 = vpack.i.bf16 %v6731_v63, %v6730_v7  ;;  %v6733_v19 = vmax.f32 %v12162_v56, 0.0 }
 0xc3c   : > { %v8425_v57 = vpack.i.bf16 %v6733_v19, %v6732_v42  ;;  %v6667_v6 = vpop.f32.mrb[96].mxu1  ;;  %8421 = vrot.lane.b32.xlu0 %v8420_v36, %s9221_s14 }
 0xc3d   : > { %v12175_v21 = vadd.f32 %v6667_v6, %v6298_v38  ;;  %v6669_v9 = vpop.f32.mrb[97].mxu1 }
 0xc3e   : > { %v12177_v20 = vadd.f32 %v6669_v9, %v6298_v38  ;;  %v6671_v54 = vpop.f32.mrb[98].mxu1  ;;  %8426 = vrot.lane.b32.xlu1 %v8425_v57, %s9221_s14  ;;  %v6328_v38 = vpop.permute.xlu0 %6327 }
 0xc3f   : > { %v6734_v55 = vmax.f32 %v12175_v21, 0.0  ;;  %v12181_v27 = vadd.f32 %v6671_v54, %v6303_v45  ;;  %v6673_v37 = vpop.f32.mrb[99].mxu1  ;;  %v6333_v54 = vpop.permute.xlu1 %6332 }
 0xc40   : > { %v6735_v40 = vmax.f32 %v12177_v20, 0.0  ;;  %v12184_v23 = vadd.f32 %v6673_v37, %v6303_v45 }
 0xc41   : > { %v6736_v22 = vmax.f32 %v12181_v27, 0.0 }
 0xc42   : > { %v8430_v31 = vpack.i.bf16 %v6735_v40, %v6734_v55  ;;  %v6737_v24 = vmax.f32 %v12184_v23, 0.0 }
 0xc44   : > { %v8435_v58 = vpack.i.bf16 %v6737_v24, %v6736_v22  ;;  %v6677_v33 = vpop.f32.mrb[100].mxu1  ;;  %8431 = vrot.lane.b32.xlu0 %v8430_v31, %s9221_s14 }
 0xc45   : > { %v12197_v52 = vadd.f32 %v6677_v33, %v6308_v14  ;;  %v6679_v48 = vpop.f32.mrb[101].mxu1 }
 0xc46   : > { %v12199_v59 = vadd.f32 %v6679_v48, %v6308_v14  ;;  %v6681_v50 = vpop.f32.mrb[102].mxu1  ;;  %8436 = vrot.lane.b32.xlu1 %v8435_v58, %s9221_s14 }
 0xc47   : > { %v6738_v35 = vmax.f32 %v12197_v52, 0.0  ;;  %v12203_v30 = vadd.f32 %v6681_v50, %v6313_v17  ;;  %v6683_v46 = vpop.f32.mrb[103].mxu1 }
 0xc48   : > { %v6739_v51 = vmax.f32 %v12199_v59, 0.0  ;;  %v12206_v60 = vadd.f32 %v6683_v46, %v6313_v17 }
 0xc49   : > { %v6740_v41 = vmax.f32 %v12203_v30, 0.0 }
 0xc4a   : > { %v8440_v28 = vpack.i.bf16 %v6739_v51, %v6738_v35  ;;  %v6741_v29 = vmax.f32 %v12206_v60, 0.0 }
 0xc4c   : > { %v8445_v49 = vpack.i.bf16 %v6741_v29, %v6740_v41  ;;  %v6687_v43 = vpop.f32.mrb[104].mxu1  ;;  %8441 = vrot.lane.b32.xlu0 %v8440_v28, %s9221_s14 }
 0xc4d   : > { %v12219_v13 = vadd.f32 %v6687_v43, %v6318_v3  ;;  %v6689_v12 = vpop.f32.mrb[105].mxu1 }
 0xc4e   : > { %v12221_v16 = vadd.f32 %v6689_v12, %v6318_v3  ;;  %v6691_v62 = vpop.f32.mrb[106].mxu1  ;;  %8446 = vrot.lane.b32.xlu1 %v8445_v49, %s9221_s14  ;;  %v6338_v3 = vpop.permute.xlu0 %6337 }
 0xc4f   : > { %v12468_v8 = vmax.f32 %v12219_v13, 0.0  ;;  %v12225_v1 = vadd.f32 %v6691_v62, %v6323_v5  ;;  %v6693_v44 = vpop.f32.mrb[107].mxu1  ;;  %v6343_v62 = vpop.permute.xlu1 %6342 }
 0xc50   : > { %v6743_v61 = vmax.f32 %v12221_v16, 0.0  ;;  %v12228_v26 = vadd.f32 %v6693_v44, %v6323_v5 }
 0xc51   : > { %v12463_v18 = vmax.f32 %v12225_v1, 0.0 }
 0xc52   : > { %v8450_v25 = vpack.i.bf16 %v6743_v61, %v12468_v8  ;;  %v12469_v36 = vmax.f32 %v12228_v26, 0.0 }
 0xc54   : > { %v8455_v57 = vpack.i.bf16 %v12469_v36, %v12463_v18  ;;  %v6697_v6 = vpop.f32.mrb[108].mxu1  ;;  %8451 = vrot.lane.b32.xlu0 %v8450_v25, %s9221_s14 }
 0xc55   : > { %v12241_v9 = vadd.f32 %v6697_v6, %v6328_v38  ;;  %v6699_v45 = vpop.f32.mrb[109].mxu1 }
 0xc56   : > { %v12243_v37 = vadd.f32 %v6699_v45, %v6328_v38  ;;  %v6701_v31 = vpop.f32.mrb[110].mxu1  ;;  %8456 = vrot.lane.b32.xlu1 %v8455_v57, %s9221_s14 }
 0xc57   : > { %v12458_v14 = vmax.f32 %v12241_v9, 0.0  ;;  %v12247_v58 = vadd.f32 %v6701_v31, %v6333_v54  ;;  %v6703_v33 = vpop.f32.mrb[111].mxu1 }
 0xc58   : > { %v12462_v48 = vmax.f32 %v12243_v37, 0.0  ;;  %v12250_v17 = vadd.f32 %v6703_v33, %v6333_v54 }
 0xc59   : > { %v12455_v50 = vmax.f32 %v12247_v58, 0.0 }
 0xc5a   : > { %v8460_v46 = vpack.i.bf16 %v12462_v48, %v12458_v14  ;;  %v12459_v28 = vmax.f32 %v12250_v17, 0.0 }
 0xc5c   : > { %v8465_v49 = vpack.i.bf16 %v12459_v28, %v12455_v50  ;;  %v6707_v43 = vpop.f32.mrb[112].mxu1  ;;  %8461 = vrot.lane.b32.xlu0 %v8460_v46, %s9221_s14 }
 0xc5d   : > { %v12263_v12 = vadd.f32 %v6707_v43, %v6338_v3  ;;  %v6709_v5 = vpop.f32.mrb[113].mxu1 }
 0xc5e   : > { %v12265_v44 = vadd.f32 %v6709_v5, %v6338_v3  ;;  %v6711_v25 = vpop.f32.mrb[114].mxu1  ;;  %8466 = vrot.lane.b32.xlu1 %v8465_v49, %s9221_s14  ;;  %v6348_v3 = vpop.permute.xlu0 %6347 }
 0xc5f   : > { %v12456_v38 = vmax.f32 %v12263_v12, 0.0  ;;  %v12269_v57 = vadd.f32 %v6711_v25, %v6343_v62  ;;  %v6713_v6 = vpop.f32.mrb[115].mxu1  ;;  %v6353_v25 = vpop.permute.xlu1 %6352 }
 0xc60   : > { %v12457_v45 = vmax.f32 %v12265_v44, 0.0  ;;  %v12272_v54 = vadd.f32 %v6713_v6, %v6343_v62 }
 0xc61   : > { %v12460_v31 = vmax.f32 %v12269_v57, 0.0 }
 0xc62   : > { %v8470_v33 = vpack.i.bf16 %v12457_v45, %v12456_v38  ;;  %v12461_v46 = vmax.f32 %v12272_v54, 0.0 }
 0xc64   : > { %v8475_v49 = vpack.i.bf16 %v12461_v46, %v12460_v31  ;;  %v6717_v43 = vpop.f32.mrb[116].mxu1  ;;  %8471 = vrot.lane.b32.xlu0 %v8470_v33, %s9221_s14 }
 0xc65   : > { %v12285_v5 = vadd.f32 %v6717_v43, %v6348_v3  ;;  %v6719_v62 = vpop.f32.mrb[117].mxu1 }
 0xc66   : > { %v12287_v6 = vadd.f32 %v6719_v62, %v6348_v3  ;;  %v6721_v50 = vpop.f32.mrb[118].mxu1  ;;  %8476 = vrot.lane.b32.xlu1 %v8475_v49, %s9221_s14 }
 0xc67   : > { %v12464_v38 = vmax.f32 %v12285_v5, 0.0  ;;  %v12291_v45 = vadd.f32 %v6721_v50, %v6353_v25  ;;  %v6723_v14 = vpop.f32.mrb[119].mxu1 }
 0xc68   : > { %v12465_v28 = vmax.f32 %v12287_v6, 0.0  ;;  %v12294_v31 = vadd.f32 %v6723_v14, %v6353_v25 }
 0xc69   : > { %v12466_v33 = vmax.f32 %v12291_v45, 0.0 }
 0xc6a   : > { %v8480_v3 = vpack.i.bf16 %v12465_v28, %v12464_v38  ;;  %v12467_v43 = vmax.f32 %v12294_v31, 0.0 }
 0xc6c   : > { %v8485_v50 = vpack.i.bf16 %v12467_v43, %v12466_v33  ;;  %8481 = vrot.lane.b32.xlu0 %v8480_v3, %s9221_s14 }
 0xc6e   : > { %8486 = vrot.lane.b32.xlu1 %v8485_v50, %s9221_s14  ;;  %s7883_s14 = sshll.u32 %s12490_s26, 6 }
 0xc6f   : > { %s12400_s16 = scalar_lea.vmem %s12450_s13, %s7883_s14 }
 0xca6   : > { %v8412_v14 = vpop.permute.xlu0 %8411 }
 0xca7   : > { %v8414_v49 = vunpack.i.h.bf16 %v8412_v14  ;;  %v8413_v62 = vunpack.i.l.bf16 %v8412_v14 }
 0xca8   : > { %v8417_v25 = vpop.permute.xlu1 %8416 }
 0xca9   : > { %v6854_v46 = vsel %vm516_vm0, %v8413_v62, %v8414_v49  ;;  %v8419_v48 = vunpack.i.h.bf16 %v8417_v25  ;;  %v8418_v18 = vunpack.i.l.bf16 %v8417_v25  ;;  %v6903_v38 = vmax.f32 %v6727_v15, %v8414_v49 }
 0xcaa   : > { %v6902_v3 = vmax.f32 %v6726_v39, %v6854_v46 }
 0xcab   : > { %v6905_v28 = vmax.f32 %v6729_v0, %v8419_v48  ;;  %v6855_v33 = vsel %vm516_vm0, %v8418_v18, %v8419_v48 }
 0xcac   : > { %v6904_v50 = vmax.f32 %v6728_v4, %v6855_v33 }
 0xcad   : > { %v6935_v14 = vpack.c.bf16 %v6905_v28, %v6903_v38 }
 0xcae   : > { %v6934_v43 = vpack.c.bf16 %v6904_v50, %v6902_v3  ;;  %v8422_v8 = vpop.permute.xlu0 %8421 }
 0xcaf   : > { %v8424_v62 = vunpack.i.h.bf16 %v8422_v8  ;;  %v8423_v36 = vunpack.i.l.bf16 %v8422_v8  ;;  %7857 = vmatprep.mubr.msk.bf16.mxu0 %vm3119_vm8, %v6935_v14 }
 0xcb0   : > { %v8427_v11 = vpop.permute.xlu1 %8426  ;;  %7089 = vmatmul.mubr.bf16.vlgmr.msra.gmra.mrb[60].mxu0 %v6934_v43 }
 0xcb1   : > { %v6856_v15 = vsel %vm516_vm0, %v8423_v36, %v8424_v62  ;;  %v8429_v10 = vunpack.i.h.bf16 %v8427_v11  ;;  %v8428_v0 = vunpack.i.l.bf16 %v8427_v11  ;;  %v6907_v2 = vmax.f32 %v6731_v63, %v8424_v62 }
 0xcb2   : > { %v6906_v4 = vmax.f32 %v6730_v7, %v6856_v15 }
 0xcb3   : > { %v6909_v39 = vmax.f32 %v6733_v19, %v8429_v10  ;;  %v6857_v34 = vsel %vm516_vm0, %v8428_v0, %v8429_v10  ;;  %v12475_v0 = vmax.f32 %v12219_v13, 0.0 }
 0xcb4   : > { %v6908_v8 = vmax.f32 %v6732_v42, %v6857_v34 }
 0xcb5   : > { %v6937_v18 = vpack.c.bf16 %v6909_v39, %v6907_v2  ;;  %v12476_v39 = vmax.f32 %v12225_v1, 0.0 }
 0xcb6   : > { %v8432_v48 = vpop.permute.xlu0 %8431  ;;  %v6936_v28 = vpack.c.bf16 %v6908_v8, %v6906_v4 }
 0xcb7   : > { %v8434_v36 = vunpack.i.h.bf16 %v8432_v48  ;;  %v8433_v38 = vunpack.i.l.bf16 %v8432_v48  ;;  %7858 = vmatprep.mubr.msk.bf16.mxu0 %vm3119_vm8, %v6937_v18 }
 0xcb8   : > { %v8437_v47 = vpop.permute.xlu1 %8436  ;;  %7097 = vmatmul.mubr.bf16.gmra.mrb[64].mxu0 %v6936_v28 }
 0xcb9   : > { %v6858_v63 = vsel %vm516_vm0, %v8433_v38, %v8434_v36  ;;  %v8439_v56 = vunpack.i.h.bf16 %v8437_v47  ;;  %v8438_v19 = vunpack.i.l.bf16 %v8437_v47  ;;  %v6911_v32 = vmax.f32 %v6735_v40, %v8434_v36 }
 0xcba   : > { %v6910_v42 = vmax.f32 %v6734_v55, %v6858_v63  ;;  %v12477_v38 = vmax.f32 %v12243_v37, 0.0  ;;  %v12478_v47 = vmax.f32 %v12250_v17, 0.0 }
 0xcbb   : > { %v6913_v7 = vmax.f32 %v6737_v24, %v8439_v56  ;;  %v6859_v53 = vsel %vm516_vm0, %v8438_v19, %v8439_v56  ;;  %v12479_v56 = vmax.f32 %v12241_v9, 0.0 }
 0xcbc   : > { %v6912_v46 = vmax.f32 %v6736_v22, %v6859_v53 }
 0xcbd   : > { %v6939_v33 = vpack.c.bf16 %v6913_v7, %v6911_v32  ;;  %v12480_v32 = vmax.f32 %v12247_v58, 0.0 }
 0xcbe   : > { %v8442_v43 = vpop.permute.xlu0 %8441  ;;  %v6938_v49 = vpack.c.bf16 %v6912_v46, %v6910_v42 }
 0xcbf   : > { %v8444_v25 = vunpack.i.h.bf16 %v8442_v43  ;;  %v8443_v3 = vunpack.i.l.bf16 %v8442_v43  ;;  %7859 = vmatprep.mubr.msk.bf16.mxu0 %vm3119_vm8, %v6939_v33 }
 0xcc0   : > { %v8447_v20 = vpop.permute.xlu1 %8446  ;;  %7105 = vmatmul.mubr.bf16.gmra.mrb[68].mxu0 %v6938_v49 }
 0xcc1   : > { %v6860_v40 = vsel %vm516_vm0, %v8443_v3, %v8444_v25  ;;  %v8449_v23 = vunpack.i.h.bf16 %v8447_v20  ;;  %v8448_v24 = vunpack.i.l.bf16 %v8447_v20  ;;  %v6915_v21 = vmax.f32 %v6739_v51, %v8444_v25 }
 0xcc2   : > { %v6914_v22 = vmax.f32 %v6738_v35, %v6860_v40  ;;  %v12474_v35 = vmax.f32 %v12228_v26, 0.0  ;;  %v12481_v3 = vmax.f32 %v12265_v44, 0.0  ;;  %v12482_v20 = vmax.f32 %v12272_v54, 0.0 }
 0xcc3   : > { %v6917_v55 = vmax.f32 %v6741_v29, %v8449_v23  ;;  %v6861_v27 = vsel %vm516_vm0, %v8448_v24, %v8449_v23  ;;  %v12483_v23 = vmax.f32 %v12263_v12, 0.0  ;;  %v12485_v12 = vmax.f32 %v12287_v6, 0.0 }
 0xcc4   : > { %v6916_v50 = vmax.f32 %v6740_v41, %v6861_v27 }
 0xcc5   : > { %v6941_v14 = vpack.c.bf16 %v6917_v55, %v6915_v21  ;;  %v12484_v21 = vmax.f32 %v12269_v57, 0.0  ;;  %v12486_v57 = vmax.f32 %v12294_v31, 0.0 }
 0xcc6   : > { %v8452_v62 = vpop.permute.xlu0 %8451  ;;  %v6940_v11 = vpack.c.bf16 %v6916_v50, %v6914_v22 }
 0xcc7   : > { %v8454_v15 = vunpack.i.h.bf16 %v8452_v62  ;;  %v8453_v10 = vunpack.i.l.bf16 %v8452_v62  ;;  %7860 = vmatprep.mubr.msk.bf16.mxu0 %vm3119_vm8, %v6941_v14 }
 0xcc8   : > { %v8457_v59 = vpop.permute.xlu1 %8456  ;;  %7113 = vmatmul.mubr.bf16.gmra.mrb[72].mxu0 %v6940_v11 }
 0xcc9   : > { %v6862_v51 = vsel %vm516_vm0, %v8453_v10, %v8454_v15  ;;  %v8459_v60 = vunpack.i.h.bf16 %v8457_v59  ;;  %v8458_v29 = vunpack.i.l.bf16 %v8457_v59  ;;  %v6919_v52 = vmax.f32 %v6743_v61, %v8454_v15 }
 0xcca   : > { %v6918_v2 = vmax.f32 %v12475_v0, %v6862_v51 }
 0xccb   : > { %v6921_v30 = vmax.f32 %v12474_v35, %v8459_v60  ;;  %v6863_v41 = vsel %vm516_vm0, %v8458_v29, %v8459_v60  ;;  %v12487_v60 = vmax.f32 %v12285_v5, 0.0 }
 0xccc   : > { %v6920_v34 = vmax.f32 %v12476_v39, %v6863_v41 }
 0xccd   : > { %v6943_v4 = vpack.c.bf16 %v6921_v30, %v6919_v52  ;;  %v12488_v52 = vmax.f32 %v12291_v45, 0.0 }
 0xcce   : > { %v8462_v8 = vpop.permute.xlu0 %8461  ;;  %v6942_v18 = vpack.c.bf16 %v6920_v34, %v6918_v2 }
 0xccf   : > { %v8464_v48 = vunpack.i.h.bf16 %v8462_v8  ;;  %v8463_v28 = vunpack.i.l.bf16 %v8462_v8  ;;  %7861 = vmatprep.mubr.msk.bf16.mxu0 %vm3119_vm8, %v6943_v4 }
 0xcd0   : > { %v8467_v16 = vpop.permute.xlu1 %8466  ;;  %7121 = vmatmul.mubr.bf16.gmra.mrb[76].mxu0 %v6942_v18 }
 0xcd1   : > { %v6864_v61 = vsel %vm516_vm0, %v8463_v28, %v8464_v48  ;;  %v8469_v26 = vunpack.i.h.bf16 %v8467_v16  ;;  %v8468_v36 = vunpack.i.l.bf16 %v8467_v16  ;;  %v6923_v13 = vmax.f32 %v12477_v38, %v8464_v48 }
 0xcd2   : > { %v6922_v19 = vmax.f32 %v12479_v56, %v6864_v61 }
 0xcd3   : > { %v6925_v1 = vmax.f32 %v12478_v47, %v8469_v26  ;;  %v6865_v63 = vsel %vm516_vm0, %v8468_v36, %v8469_v26 }
 0xcd4   : > { %v6924_v7 = vmax.f32 %v12480_v32, %v6865_v63 }
 0xcd5   : > { %v6945_v53 = vpack.c.bf16 %v6925_v1, %v6923_v13 }
 0xcd6   : > { %v8472_v42 = vpop.permute.xlu0 %8471  ;;  %v6944_v46 = vpack.c.bf16 %v6924_v7, %v6922_v19 }
 0xcd7   : > { %v8474_v33 = vunpack.i.h.bf16 %v8472_v42  ;;  %v8473_v43 = vunpack.i.l.bf16 %v8472_v42  ;;  %7862 = vmatprep.mubr.msk.bf16.mxu0 %vm3119_vm8, %v6945_v53 }
 0xcd8   : > { %v8477_v37 = vpop.permute.xlu1 %8476  ;;  %7129 = vmatmul.mubr.bf16.gmra.mrb[80].mxu0 %v6944_v46 }
 0xcd9   : > { %v6866_v17 = vsel %vm516_vm0, %v8473_v43, %v8474_v33  ;;  %v8479_v49 = vunpack.i.h.bf16 %v8477_v37  ;;  %v8478_v25 = vunpack.i.l.bf16 %v8477_v37  ;;  %v6927_v9 = vmax.f32 %v12481_v3, %v8474_v33 }
 0xcda   : > { %v6926_v24 = vmax.f32 %v12483_v23, %v6866_v17 }
 0xcdb   : > { %v6929_v58 = vmax.f32 %v12482_v20, %v8479_v49  ;;  %v6867_v40 = vsel %vm516_vm0, %v8478_v25, %v8479_v49 }
 0xcdc   : > { %v6928_v55 = vmax.f32 %v12484_v21, %v6867_v40 }
 0xcdd   : > { %v6947_v27 = vpack.c.bf16 %v6929_v58, %v6927_v9 }
 0xcde   : > { %v8482_v22 = vpop.permute.xlu0 %8481  ;;  %v6946_v50 = vpack.c.bf16 %v6928_v55, %v6926_v24 }
 0xcdf   : > { %v8484_v14 = vunpack.i.h.bf16 %v8482_v22  ;;  %v8483_v62 = vunpack.i.l.bf16 %v8482_v22  ;;  %7863 = vmatprep.mubr.msk.bf16.mxu0 %vm3119_vm8, %v6947_v27 }
 0xce0   : > { %v8487_v44 = vpop.permute.xlu1 %8486  ;;  %7137 = vmatmul.mubr.bf16.gmra.mrb[84].mxu0 %v6946_v50 }
 0xce1   : > { %v6868_v54 = vsel %vm516_vm0, %v8483_v62, %v8484_v14  ;;  %v8489_v11 = vunpack.i.h.bf16 %v8487_v44  ;;  %v8488_v15 = vunpack.i.l.bf16 %v8487_v44  ;;  %v6931_v10 = vmax.f32 %v12485_v12, %v8484_v14 }
 0xce2   : > { %v6930_v29 = vmax.f32 %v12487_v60, %v6868_v54 }
 0xce3   : > { %v6933_v59 = vmax.f32 %v12486_v57, %v8489_v11  ;;  %v6869_v51 = vsel %vm516_vm0, %v8488_v15, %v8489_v11 }
 0xce4   : > { %v6932_v35 = vmax.f32 %v12488_v52, %v6869_v51 }
 0xce5   : > { %v6949_v30 = vpack.c.bf16 %v6933_v59, %v6931_v10 }
 0xce6   : > { %v6948_v41 = vpack.c.bf16 %v6932_v35, %v6930_v29 }
 0xce7   : > { %7864 = vmatprep.mubr.msk.bf16.mxu0 %vm3119_vm8, %v6949_v30 }
 0xce8   : > { %7145 = vmatmul.mubr.bf16.gmra.mrb[88].mxu0 %v6948_v41 }
 0xd83   : > { %v7090_v31 = vpop.f32.mrb[60].mxu0 }
 0xd84   : > { %v7884_v5 = vpack.c.bf16 %v7090_v31, %v7090_v31  ;;  %v7092_v45 = vpop.f32.mrb[61].mxu0 }
 0xd85   : > { %v7093_v6 = vpop.f32.mrb[62].mxu0 }
 0xd86   : > { %7218 = vst.msk [vmem:[%s12400_s16] sm:$0xf] %vm7217_vm11, %v7884_v5  ;;  %v7885_v0 = vpack.c.bf16 %v7093_v6, %v7093_v6  ;;  %v7095_v2 = vpop.f32.mrb[63].mxu0 }
 0xd88   : > { %7219 = vst.msk [vmem:[%s12400_s16 + $0x4] sm:$0xf] %vm7217_vm11, %v7885_v0 }
 0xd8b   : > { %v7098_v39 = vpop.f32.mrb[64].mxu0 }
 0xd8c   : > { %v7886_v34 = vpack.c.bf16 %v7098_v39, %v7098_v39  ;;  %v7100_v4 = vpop.f32.mrb[65].mxu0 }
 0xd8d   : > { %v7101_v8 = vpop.f32.mrb[66].mxu0 }
 0xd8e   : > { %7220 = vst.msk [vmem:[%s12400_s16 + $0x8] sm:$0xf] %vm7217_vm11, %v7886_v34  ;;  %v7887_v18 = vpack.c.bf16 %v7101_v8, %v7101_v8  ;;  %v7103_v48 = vpop.f32.mrb[67].mxu0 }
 0xd90   : > { %7221 = vst.msk [vmem:[%s12400_s16 + $0xc] sm:$0xf] %vm7217_vm11, %v7887_v18 }
 0xd93   : > { %v7106_v28 = vpop.f32.mrb[68].mxu0 }
 0xd94   : > { %v7888_v16 = vpack.c.bf16 %v7106_v28, %v7106_v28  ;;  %v7108_v61 = vpop.f32.mrb[69].mxu0 }
 0xd95   : > { %v7109_v26 = vpop.f32.mrb[70].mxu0 }
 0xd96   : > { %7222 = vst.msk [vmem:[%s12400_s16 + $0x10] sm:$0xf] %vm7217_vm11, %v7888_v16  ;;  %v7889_v36 = vpack.c.bf16 %v7109_v26, %v7109_v26  ;;  %v7111_v38 = vpop.f32.mrb[71].mxu0 }
 0xd98   : > { %7223 = vst.msk [vmem:[%s12400_s16 + $0x14] sm:$0xf] %vm7217_vm11, %v7889_v36 }
 0xd9b   : > { %v7114_v13 = vpop.f32.mrb[72].mxu0 }
 0xd9c   : > { %v7890_v47 = vpack.c.bf16 %v7114_v13, %v7114_v13  ;;  %v7116_v1 = vpop.f32.mrb[73].mxu0 }
 0xd9d   : > { %v7117_v63 = vpop.f32.mrb[74].mxu0 }
 0xd9e   : > { %7224 = vst.msk [vmem:[%s12400_s16 + $0x18] sm:$0xf] %vm7217_vm11, %v7890_v47  ;;  %v7891_v56 = vpack.c.bf16 %v7117_v63, %v7117_v63  ;;  %v7119_v19 = vpop.f32.mrb[75].mxu0 }
 0xda0   : > { %7225 = vst.msk [vmem:[%s12400_s16 + $0x1c] sm:$0xf] %vm7217_vm11, %v7891_v56 }
 0xda3   : > { %v7122_v32 = vpop.f32.mrb[76].mxu0 }
 0xda4   : > { %v7892_v7 = vpack.c.bf16 %v7122_v32, %v7122_v32  ;;  %v7124_v53 = vpop.f32.mrb[77].mxu0 }
 0xda5   : > { %v7125_v42 = vpop.f32.mrb[78].mxu0 }
 0xda6   : > { %7226 = vst.msk [vmem:[%s12400_s16 + $0x20] sm:$0xf] %vm7217_vm11, %v7892_v7  ;;  %v7893_v46 = vpack.c.bf16 %v7125_v42, %v7125_v42  ;;  %v7127_v33 = vpop.f32.mrb[79].mxu0 }
 0xda8   : > { %7227 = vst.msk [vmem:[%s12400_s16 + $0x24] sm:$0xf] %vm7217_vm11, %v7893_v46 }
 0xdab   : > { %v7130_v43 = vpop.f32.mrb[80].mxu0 }
 0xdac   : > { %v7894_v37 = vpack.c.bf16 %v7130_v43, %v7130_v43  ;;  %v7132_v17 = vpop.f32.mrb[81].mxu0 }
 0xdad   : > { %v7133_v49 = vpop.f32.mrb[82].mxu0 }
 0xdae   : > { %7228 = vst.msk [vmem:[%s12400_s16 + $0x28] sm:$0xf] %vm7217_vm11, %v7894_v37  ;;  %v7895_v25 = vpack.c.bf16 %v7133_v49, %v7133_v49  ;;  %v7135_v3 = vpop.f32.mrb[83].mxu0 }
 0xdb0   : > { %7229 = vst.msk [vmem:[%s12400_s16 + $0x2c] sm:$0xf] %vm7217_vm11, %v7895_v25 }
 0xdb3   : > { %v7138_v9 = vpop.f32.mrb[84].mxu0 }
 0xdb4   : > { %v7896_v20 = vpack.c.bf16 %v7138_v9, %v7138_v9  ;;  %v7140_v58 = vpop.f32.mrb[85].mxu0 }
 0xdb5   : > { %v7141_v40 = vpop.f32.mrb[86].mxu0 }
 0xdb6   : > { %7230 = vst.msk [vmem:[%s12400_s16 + $0x30] sm:$0xf] %vm7217_vm11, %v7896_v20  ;;  %v7897_v23 = vpack.c.bf16 %v7141_v40, %v7141_v40  ;;  %v7143_v24 = vpop.f32.mrb[87].mxu0 }
 0xdb8   : > { %7231 = vst.msk [vmem:[%s12400_s16 + $0x34] sm:$0xf] %vm7217_vm11, %v7897_v23 }
 0xdbb   : > { %v7146_v21 = vpop.f32.mrb[88].mxu0 }
 0xdbc   : > { %v7898_v55 = vpack.c.bf16 %v7146_v21, %v7146_v21  ;;  %v7148_v27 = vpop.f32.mrb[89].mxu0 }
 0xdbd   : > { %v7149_v22 = vpop.f32.mrb[90].mxu0 }
 0xdbe   : > { %7232 = vst.msk [vmem:[%s12400_s16 + $0x38] sm:$0xf] %vm7217_vm11, %v7898_v55  ;;  %v7899_v50 = vpack.c.bf16 %v7149_v22, %v7149_v22  ;;  %v7151_v14 = vpop.f32.mrb[91].mxu0 }
 0xdc0   : > { %7233 = vst.msk [vmem:[%s12400_s16 + $0x3c] sm:$0xf] %vm7217_vm11, %v7899_v50 }
 0xdc1 PF: > { %s23_s25 = sadd.s32 1, %s9219_s25  }
 0xdc2   : > { %p20_p4 = scmp.ge.s32.totalorder %s23_s25, 4  }
 0xdc4   :  { %22 = sbr.rel (!%p20_p4) target bundleno = 1 (0x1), region = 102 }

</bundles_post_ra>
